<compile_context>
chip_gen: v6e
topology: v6e:2x2x1
jax: 0.10.0
libtpu: 0.0.40
codegen_flags: <defaults>
</compile_context>

<pallas_src>
import numpy as np
import jax
import jax.numpy as jnp
from jax.experimental import pallas as pl
from jax.experimental.pallas import tpu as pltpu

BN_EPS = 1e-5


# ------------------------------ Pallas kernel -------------------------------

def _bn_relu(y, gamma, beta):
    """Training-mode BatchNorm over all rows of y (per-channel), fused w/ ReLU."""
    inv_m = 1.0 / y.shape[0]
    mean = jnp.sum(y, axis=0, keepdims=True) * inv_m
    mean_sq = jnp.sum(y * y, axis=0, keepdims=True) * inv_m
    var = mean_sq - mean * mean                      # biased, like torch BN fwd
    scale = gamma * jax.lax.rsqrt(var + BN_EPS)
    shift = beta - mean * scale
    return jnp.maximum(y * scale + shift, 0.0)       # single FMA + ReLU


def _twin_q_kernel(patches1_ref, sel2_ref, sel3_ref, action_ref,
                   w1_ref, g1_ref, bt1_ref,
                   w2_ref, g2_ref, bt2_ref,
                   w3_ref, g3_ref, bt3_ref,
                   wl1a_ref, wl1b_ref, bl1_ref,
                   wl2_ref, bl2_ref, wl3_ref, bl3_ref,
                   out_ref):
    f32 = jnp.float32

    def gathered_conv(sel_ref, x, w_ref):
        # k=3 / s=2 conv as 9 accumulated matmuls. The per-tap row gather is a
        # 0/1 selection matmul (runs on the MXU), so activations stay 2-D
        # (rows = batch*spatial, lanes = 128 = both branches' channels).
        acc = None
        for k in range(9):
            rows = jnp.dot(sel_ref[k], x, preferred_element_type=f32)
            tap = jnp.dot(rows, w_ref[k], preferred_element_type=f32)
            acc = tap if acc is None else acc + tap
        return acc

    # conv1/conv4 + bn + relu: both branches share the same im2col patches,
    # their output channels are simply stacked on the lane axis (36 -> 128).
    y = jnp.dot(patches1_ref[...], w1_ref[...], preferred_element_type=f32)
    y = _bn_relu(y, g1_ref[...], bt1_ref[...])
    # conv2/conv5 + bn + relu (block-diagonal weights keep branches independent)
    y = _bn_relu(gathered_conv(sel2_ref, y, w2_ref), g2_ref[...], bt2_ref[...])
    # conv3/conv6 + bn + relu -> (N, 128); final spatial is 1x1 so flatten == id
    y = _bn_relu(gathered_conv(sel3_ref, y, w3_ref), g3_ref[...], bt3_ref[...])

    # Q heads: cat([conv_feat, action], 1) @ W1 split into two dots (no concat);
    # block-diagonal linear weights compute both branches at once.
    h = jnp.dot(y, wl1a_ref[...], preferred_element_type=f32)
    h = h + jnp.dot(action_ref[...], wl1b_ref[...], preferred_element_type=f32)
    h = jnp.maximum(h + bl1_ref[...], 0.0)
    h = jnp.maximum(jnp.dot(h, wl2_ref[...], preferred_element_type=f32)
                    + bl2_ref[...], 0.0)
    out_ref[...] = (jnp.dot(h, wl3_ref[...], preferred_element_type=f32)
                    + bl3_ref[...])                   # (N, 2): lane0=q1, lane1=q2


# ------------------------------- glue (JAX) ---------------------------------

def _conv_out(s):
    return (s - 3) // 2 + 1


def _im2col_stride2_k3(x):
    """x: (N, C, H, W) -> patches (N*Ho*Wo, 9*C); rows ordered (n, i, j),
    columns ordered (kh, kw, c)."""
    n, c, h, w = x.shape
    ho, wo = _conv_out(h), _conv_out(w)
    cols = []
    for kh in range(3):
        for kw in range(3):
            sub = x[:, :, kh:kh + 2 * ho - 1:2, kw:kw + 2 * wo - 1:2]   # (N,C,Ho,Wo)
            cols.append(jnp.transpose(sub, (0, 2, 3, 1)))               # (N,Ho,Wo,C)
    p = jnp.concatenate(cols, axis=-1)                                  # (N,Ho,Wo,9C)
    return p.reshape(n * ho * wo, 9 * c), ho, wo


def _selection_matrices(n, h_in, w_in):
    """0/1 gather matrices: sel[k] @ act picks, for every output position
    (sample, i, j), the input row (sample, 2i+kh, 2j+kw) for tap k = kh*3+kw."""
    ho, wo = _conv_out(h_in), _conv_out(w_in)
    sel = np.zeros((9, n * ho * wo, n * h_in * w_in), np.float32)
    for kh in range(3):
        for kw in range(3):
            k = kh * 3 + kw
            for b in range(n):
                for i in range(ho):
                    for j in range(wo):
                        r = (b * ho + i) * wo + j
                        src = (b * h_in + 2 * i + kh) * w_in + (2 * j + kw)
                        sel[k, r, src] = 1.0
    return jnp.asarray(sel), ho, wo


def init_params(key, h, w, num_inputs, num_actions, hidden_dim):
    convw = _conv_out(_conv_out(_conv_out(w)))
    convh = _conv_out(_conv_out(_conv_out(h)))
    conv_feat = convw * convh * 64
    lin_in = conv_feat + num_actions

    keys = iter(jax.random.split(key, 12))

    def xavier(k, fan_in, fan_out, shape):
        a = (6.0 / (fan_in + fan_out)) ** 0.5
        return jax.random.uniform(k, shape, jnp.float32, -a, a)

    def conv_w(c_in):          # two branches stacked: (2, 3, 3, c_in, 64)
        return jnp.stack([xavier(next(keys), c_in * 9, 64 * 9, (3, 3, c_in, 64))
                          for _ in range(2)])

    def lin_w(f_in, f_out):
        return jnp.stack([xavier(next(keys), f_in, f_out, (f_in, f_out))
                          for _ in range(2)])

    return {
        "conv1_w": conv_w(num_inputs),          # conv1 / conv4
        "conv2_w": conv_w(64),                  # conv2 / conv5
        "conv3_w": conv_w(64),                  # conv3 / conv6
        "bn_gamma": jnp.ones((3, 2, 64), jnp.float32),
        "bn_beta": jnp.zeros((3, 2, 64), jnp.float32),
        "lin1_w": lin_w(lin_in, hidden_dim),    # linear1 / linear4
        "lin1_b": jnp.zeros((2, hidden_dim), jnp.float32),
        "lin2_w": lin_w(hidden_dim, hidden_dim),
        "lin2_b": jnp.zeros((2, hidden_dim), jnp.float32),
        "lin3_w": lin_w(hidden_dim, 1),
        "lin3_b": jnp.zeros((2, 1), jnp.float32),
    }


def _stack_lanes(x2b):
    """(2, ..., K) per-branch -> (..., 2K): branch1 in the low lanes."""
    return jnp.concatenate([x2b[0], x2b[1]], axis=-1)


def _block_diag(x2b):
    """(2, ..., M, K) per-branch -> (..., 2M, 2K) block-diagonal."""
    a, b = x2b[0], x2b[1]
    top = jnp.concatenate([a, jnp.zeros_like(b)], axis=-1)
    bot = jnp.concatenate([jnp.zeros_like(a), b], axis=-1)
    return jnp.concatenate([top, bot], axis=-2)


def conv_qnetwork_forward(params, state, action):
    n, c_in = state.shape[0], state.shape[1]
    num_actions = action.shape[1]

    patches1, ho1, wo1 = _im2col_stride2_k3(state)
    sel2, ho2, wo2 = _selection_matrices(n, ho1, wo1)
    sel3, ho3, wo3 = _selection_matrices(n, ho2, wo2)
    # For a 16x16 input the conv stack ends at 1x1 spatial, so torch's
    # .view(N, -1) is the identity on the per-sample 64-channel features.
    assert ho3 * wo3 == 1, "fused kernel assumes the conv stack ends at 1x1 spatial"

    # Stack the two branches on the lane axis (64 + 64 = 128 channels).
    w1 = _stack_lanes(params["conv1_w"].reshape(2, 9 * c_in, 64))     # (9C, 128)
    w2 = _block_diag(params["conv2_w"].reshape(2, 9, 64, 64))         # (9,128,128)
    w3 = _block_diag(params["conv3_w"].reshape(2, 9, 64, 64))         # (9,128,128)
    gs = [_stack_lanes(params["bn_gamma"][l])[None, :] for l in range(3)]
    bts = [_stack_lanes(params["bn_beta"][l])[None, :] for l in range(3)]

    conv_feat = params["lin1_w"].shape[1] - num_actions               # = 64 here
    wl1a = _block_diag(params["lin1_w"][:, :conv_feat, :])            # (128, 2h)
    wl1b = _stack_lanes(params["lin1_w"][:, conv_feat:, :])           # (A, 2h)
    bl1 = _stack_lanes(params["lin1_b"])[None, :]                     # (1, 2h)
    wl2 = _block_diag(params["lin2_w"])                               # (2h, 2h)
    bl2 = _stack_lanes(params["lin2_b"])[None, :]
    wl3 = _block_diag(params["lin3_w"])                               # (2h, 2)
    bl3 = _stack_lanes(params["lin3_b"])[None, :]                     # (1, 2)

    args = (patches1, sel2, sel3, action,
            w1, gs[0], bts[0],
            w2, gs[1], bts[1],
            w3, gs[2], bts[2],
            wl1a, wl1b, bl1, wl2, bl2, wl3, bl3)

    def full_block(a):             # whole array resident in VMEM
        nd = a.ndim
        return pl.BlockSpec(a.shape, lambda i: (0,) * nd)

    out = pl.pallas_call(
        _twin_q_kernel,
        grid=(1,),                                 # single fused invocation
        in_specs=[full_block(a) for a in args],
        out_specs=pl.BlockSpec((n, 2), lambda i: (0, 0)),
        out_shape=jax.ShapeDtypeStruct((n, 2), jnp.float32),
        compiler_params=pltpu.CompilerParams(dimension_semantics=("arbitrary",)),
    )(*args)
    return out[:, 0:1], out[:, 1:2]


# --------------------------- pure-JAX reference -----------------------------

def _reference_forward(params, state, action):
    hp = jax.lax.Precision.HIGHEST

    def conv_bn_relu(x, w_hwio, gamma, beta):
        w_oihw = jnp.transpose(w_hwio, (3, 2, 0, 1))           # (O, I, kh, kw)
        y = jax.lax.conv_general_dilated(
            x, w_oihw, window_strides=(2, 2), padding="VALID",
            dimension_numbers=("NCHW", "OIHW", "NCHW"), precision=hp)
        mean = jnp.mean(y, axis=(0, 2, 3), keepdims=True)
        var = jnp.mean((y - mean) ** 2, axis=(0, 2, 3), keepdims=True)
        y = (y - mean) * jax.lax.rsqrt(var + BN_EPS)
        y = y * gamma.reshape(1, -1, 1, 1) + beta.reshape(1, -1, 1, 1)
        return jnp.maximum(y, 0.0)

    def branch(b):
        x = conv_bn_relu(state, params["conv1_w"][b],
                         params["bn_gamma"][0, b], params["bn_beta"][0, b])
        x = conv_bn_relu(x, params["conv2_w"][b],
                         params["bn_gamma"][1, b], params["bn_beta"][1, b])
        x = conv_bn_relu(x, params["conv3_w"][b],
                         params["bn_gamma"][2, b], params["bn_beta"][2, b])
        feat = jnp.concatenate([x.reshape(x.shape[0], -1), action], axis=1)
        h = jnp.maximum(jnp.dot(feat, params["lin1_w"][b], precision=hp)
                        + params["lin1_b"][b], 0.0)
        h = jnp.maximum(jnp.dot(h, params["lin2_w"][b], precision=hp)
                        + params["lin2_b"][b], 0.0)
        return jnp.dot(h, params["lin3_w"][b], precision=hp) + params["lin3_b"][b]

    return branch(0), branch(1)


if __name__ == "__main__":
    H = W = 16
    NUM_INPUTS = 4
    NUM_ACTIONS = 4
    HIDDEN_DIM = 32
    BATCH = 2

    key = jax.random.PRNGKey(0)
    pkey, skey, akey = jax.random.split(key, 3)
    params = init_params(pkey, H, W, NUM_INPUTS, NUM_ACTIONS, HIDDEN_DIM)
    state = jax.random.normal(skey, (BATCH, NUM_INPUTS, H, W), jnp.float32)
    action = jax.random.normal(akey, (BATCH, NUM_ACTIONS), jnp.float32)

    q1, q2 = conv_qnetwork_forward(params, state, action)
    jax.block_until_ready((q1, q2))
    assert q1.shape == (BATCH, 1) and q2.shape == (BATCH, 1)
    assert bool(jnp.all(jnp.isfinite(q1))) and bool(jnp.all(jnp.isfinite(q2)))

    r1, r2 = _reference_forward(params, state, action)
    np.testing.assert_allclose(np.asarray(q1), np.asarray(r1), rtol=5e-2, atol=5e-3)
    np.testing.assert_allclose(np.asarray(q2), np.asarray(r2), rtol=5e-2, atol=5e-3)
    print("KERNEL_OK")
</pallas_src>

<mosaic_0001>
module attributes {stable_mosaic.version = 11 : i64} {
  func.func @_twin_q_kernel(%arg0: i32, %arg1: memref<98x36xf32, #tpu.memory_space<vmem>>, %arg2: memref<9x18x98xf32, #tpu.memory_space<vmem>>, %arg3: memref<9x2x18xf32, #tpu.memory_space<vmem>>, %arg4: memref<2x4xf32, #tpu.memory_space<vmem>>, %arg5: memref<36x128xf32, #tpu.memory_space<vmem>>, %arg6: memref<1x128xf32, #tpu.memory_space<vmem>>, %arg7: memref<1x128xf32, #tpu.memory_space<vmem>>, %arg8: memref<9x128x128xf32, #tpu.memory_space<vmem>>, %arg9: memref<1x128xf32, #tpu.memory_space<vmem>>, %arg10: memref<1x128xf32, #tpu.memory_space<vmem>>, %arg11: memref<9x128x128xf32, #tpu.memory_space<vmem>>, %arg12: memref<1x128xf32, #tpu.memory_space<vmem>>, %arg13: memref<1x128xf32, #tpu.memory_space<vmem>>, %arg14: memref<128x64xf32, #tpu.memory_space<vmem>>, %arg15: memref<4x64xf32, #tpu.memory_space<vmem>>, %arg16: memref<1x64xf32, #tpu.memory_space<vmem>>, %arg17: memref<64x64xf32, #tpu.memory_space<vmem>>, %arg18: memref<1x64xf32, #tpu.memory_space<vmem>>, %arg19: memref<64x2xf32, #tpu.memory_space<vmem>>, %arg20: memref<1x2xf32, #tpu.memory_space<vmem>>, %arg21: memref<2x2xf32, #tpu.memory_space<vmem>>) attributes {dimension_semantics = [#tpu.dimension_semantics<arbitrary>], iteration_bounds = array<i64: 1>, scalar_prefetch = 0 : i64, scratch_operands = 0 : i64, tpu.core_type = #tpu.core_type<tc>, window_params = [{pipeline_mode = #tpu.pipeline_mode<synchronous>, transform_indices = @transform_0, window_bounds = array<i64: 98, 36>}, {pipeline_mode = #tpu.pipeline_mode<synchronous>, transform_indices = @transform_1, window_bounds = array<i64: 9, 18, 98>}, {pipeline_mode = #tpu.pipeline_mode<synchronous>, transform_indices = @transform_2, window_bounds = array<i64: 9, 2, 18>}, {pipeline_mode = #tpu.pipeline_mode<synchronous>, transform_indices = @transform_3, window_bounds = array<i64: 2, 4>}, {pipeline_mode = #tpu.pipeline_mode<synchronous>, transform_indices = @transform_4, window_bounds = array<i64: 36, 128>}, {pipeline_mode = #tpu.pipeline_mode<synchronous>, transform_indices = @transform_5, window_bounds = array<i64: 1, 128>}, {pipeline_mode = #tpu.pipeline_mode<synchronous>, transform_indices = @transform_6, window_bounds = array<i64: 1, 128>}, {pipeline_mode = #tpu.pipeline_mode<synchronous>, transform_indices = @transform_7, window_bounds = array<i64: 9, 128, 128>}, {pipeline_mode = #tpu.pipeline_mode<synchronous>, transform_indices = @transform_8, window_bounds = array<i64: 1, 128>}, {pipeline_mode = #tpu.pipeline_mode<synchronous>, transform_indices = @transform_9, window_bounds = array<i64: 1, 128>}, {pipeline_mode = #tpu.pipeline_mode<synchronous>, transform_indices = @transform_10, window_bounds = array<i64: 9, 128, 128>}, {pipeline_mode = #tpu.pipeline_mode<synchronous>, transform_indices = @transform_11, window_bounds = array<i64: 1, 128>}, {pipeline_mode = #tpu.pipeline_mode<synchronous>, transform_indices = @transform_12, window_bounds = array<i64: 1, 128>}, {pipeline_mode = #tpu.pipeline_mode<synchronous>, transform_indices = @transform_13, window_bounds = array<i64: 128, 64>}, {pipeline_mode = #tpu.pipeline_mode<synchronous>, transform_indices = @transform_14, window_bounds = array<i64: 4, 64>}, {pipeline_mode = #tpu.pipeline_mode<synchronous>, transform_indices = @transform_15, window_bounds = array<i64: 1, 64>}, {pipeline_mode = #tpu.pipeline_mode<synchronous>, transform_indices = @transform_16, window_bounds = array<i64: 64, 64>}, {pipeline_mode = #tpu.pipeline_mode<synchronous>, transform_indices = @transform_17, window_bounds = array<i64: 1, 64>}, {pipeline_mode = #tpu.pipeline_mode<synchronous>, transform_indices = @transform_18, window_bounds = array<i64: 64, 2>}, {pipeline_mode = #tpu.pipeline_mode<synchronous>, transform_indices = @transform_19, window_bounds = array<i64: 1, 2>}, {pipeline_mode = #tpu.pipeline_mode<synchronous>, transform_indices = @transform_20, window_bounds = array<i64: 2, 2>}]} {
    %c0 = arith.constant 0 : index
    %c0_0 = arith.constant 0 : index
    %0 = vector.load %arg1[%c0, %c0_0] : memref<98x36xf32, #tpu.memory_space<vmem>>, vector<98x36xf32>
    %c0_1 = arith.constant 0 : index
    %c0_2 = arith.constant 0 : index
    %1 = vector.load %arg5[%c0_1, %c0_2] : memref<36x128xf32, #tpu.memory_space<vmem>>, vector<36x128xf32>
    %cst = arith.constant dense<0.000000e+00> : vector<98x128xf32>
    %2 = tpu.matmul %0, %1, %cst {dimension_numbers = #tpu.dot_dimension_numbers<[1], [0], [0], [1], [0, 0, 1, 1], [], []>} : vector<98x36xf32>, vector<36x128xf32>, vector<98x128xf32> -> vector<98x128xf32>
    %c0_3 = arith.constant 0 : index
    %c0_4 = arith.constant 0 : index
    %3 = vector.load %arg6[%c0_3, %c0_4] : memref<1x128xf32, #tpu.memory_space<vmem>>, vector<1x128xf32>
    %c0_5 = arith.constant 0 : index
    %c0_6 = arith.constant 0 : index
    %4 = vector.load %arg7[%c0_5, %c0_6] : memref<1x128xf32, #tpu.memory_space<vmem>>, vector<1x128xf32>
    %cst_7 = arith.constant dense<0.000000e+00> : vector<128xf32>
    %5 = vector.multi_reduction <add>, %2, %cst_7 [0] : vector<98x128xf32> to vector<128xf32>
    %6 = vector.shape_cast %5 : vector<128xf32> to vector<1x128xf32>
    %cst_8 = arith.constant 0.0102040814 : f32
    %7 = vector.broadcast %cst_8 : f32 to vector<1x128xf32>
    %8 = arith.mulf %6, %7 : vector<1x128xf32>
    %9 = arith.mulf %2, %2 : vector<98x128xf32>
    %cst_9 = arith.constant dense<0.000000e+00> : vector<128xf32>
    %10 = vector.multi_reduction <add>, %9, %cst_9 [0] : vector<98x128xf32> to vector<128xf32>
    %11 = vector.shape_cast %10 : vector<128xf32> to vector<1x128xf32>
    %cst_10 = arith.constant 0.0102040814 : f32
    %12 = vector.broadcast %cst_10 : f32 to vector<1x128xf32>
    %13 = arith.mulf %11, %12 : vector<1x128xf32>
    %14 = arith.mulf %8, %8 : vector<1x128xf32>
    %15 = arith.subf %13, %14 : vector<1x128xf32>
    %cst_11 = arith.constant 9.99999974E-6 : f32
    %16 = vector.broadcast %cst_11 : f32 to vector<1x128xf32>
    %17 = arith.addf %15, %16 : vector<1x128xf32>
    %18 = math.rsqrt %17 : vector<1x128xf32>
    %19 = arith.mulf %3, %18 : vector<1x128xf32>
    %20 = arith.mulf %8, %19 : vector<1x128xf32>
    %21 = arith.subf %4, %20 : vector<1x128xf32>
    %22 = vector.broadcast %19 : vector<1x128xf32> to vector<98x128xf32>
    %23 = arith.mulf %2, %22 : vector<98x128xf32>
    %24 = vector.broadcast %21 : vector<1x128xf32> to vector<98x128xf32>
    %25 = arith.addf %23, %24 : vector<98x128xf32>
    %cst_12 = arith.constant 0.000000e+00 : f32
    %26 = vector.broadcast %cst_12 : f32 to vector<98x128xf32>
    %27 = arith.maximumf %25, %26 : vector<98x128xf32>
    %c0_13 = arith.constant 0 : index
    %c0_14 = arith.constant 0 : index
    %c0_15 = arith.constant 0 : index
    %28 = vector.load %arg2[%c0_13, %c0_14, %c0_15] : memref<9x18x98xf32, #tpu.memory_space<vmem>>, vector<1x18x98xf32>
    %29 = vector.shape_cast %28 : vector<1x18x98xf32> to vector<18x98xf32>
    %cst_16 = arith.constant dense<0.000000e+00> : vector<18x128xf32>
    %30 = tpu.matmul %29, %27, %cst_16 {dimension_numbers = #tpu.dot_dimension_numbers<[1], [0], [0], [1], [0, 0, 1, 1], [], []>} : vector<18x98xf32>, vector<98x128xf32>, vector<18x128xf32> -> vector<18x128xf32>
    %c0_17 = arith.constant 0 : index
    %c0_18 = arith.constant 0 : index
    %c0_19 = arith.constant 0 : index
    %31 = vector.load %arg8[%c0_17, %c0_18, %c0_19] : memref<9x128x128xf32, #tpu.memory_space<vmem>>, vector<1x128x128xf32>
    %32 = vector.shape_cast %31 : vector<1x128x128xf32> to vector<128x128xf32>
    %cst_20 = arith.constant dense<0.000000e+00> : vector<18x128xf32>
    %33 = tpu.matmul %30, %32, %cst_20 {dimension_numbers = #tpu.dot_dimension_numbers<[1], [0], [0], [1], [0, 0, 1, 1], [], []>} : vector<18x128xf32>, vector<128x128xf32>, vector<18x128xf32> -> vector<18x128xf32>
    %c1 = arith.constant 1 : index
    %c0_21 = arith.constant 0 : index
    %c0_22 = arith.constant 0 : index
    %34 = vector.load %arg2[%c1, %c0_21, %c0_22] : memref<9x18x98xf32, #tpu.memory_space<vmem>>, vector<1x18x98xf32>
    %35 = vector.shape_cast %34 : vector<1x18x98xf32> to vector<18x98xf32>
    %cst_23 = arith.constant dense<0.000000e+00> : vector<18x128xf32>
    %36 = tpu.matmul %35, %27, %cst_23 {dimension_numbers = #tpu.dot_dimension_numbers<[1], [0], [0], [1], [0, 0, 1, 1], [], []>} : vector<18x98xf32>, vector<98x128xf32>, vector<18x128xf32> -> vector<18x128xf32>
    %c1_24 = arith.constant 1 : index
    %c0_25 = arith.constant 0 : index
    %c0_26 = arith.constant 0 : index
    %37 = vector.load %arg8[%c1_24, %c0_25, %c0_26] : memref<9x128x128xf32, #tpu.memory_space<vmem>>, vector<1x128x128xf32>
    %38 = vector.shape_cast %37 : vector<1x128x128xf32> to vector<128x128xf32>
    %cst_27 = arith.constant dense<0.000000e+00> : vector<18x128xf32>
    %39 = tpu.matmul %36, %38, %cst_27 {dimension_numbers = #tpu.dot_dimension_numbers<[1], [0], [0], [1], [0, 0, 1, 1], [], []>} : vector<18x128xf32>, vector<128x128xf32>, vector<18x128xf32> -> vector<18x128xf32>
    %40 = arith.addf %33, %39 : vector<18x128xf32>
    %c2 = arith.constant 2 : index
    %c0_28 = arith.constant 0 : index
    %c0_29 = arith.constant 0 : index
    %41 = vector.load %arg2[%c2, %c0_28, %c0_29] : memref<9x18x98xf32, #tpu.memory_space<vmem>>, vector<1x18x98xf32>
    %42 = vector.shape_cast %41 : vector<1x18x98xf32> to vector<18x98xf32>
    %cst_30 = arith.constant dense<0.000000e+00> : vector<18x128xf32>
    %43 = tpu.matmul %42, %27, %cst_30 {dimension_numbers = #tpu.dot_dimension_numbers<[1], [0], [0], [1], [0, 0, 1, 1], [], []>} : vector<18x98xf32>, vector<98x128xf32>, vector<18x128xf32> -> vector<18x128xf32>
    %c2_31 = arith.constant 2 : index
    %c0_32 = arith.constant 0 : index
    %c0_33 = arith.constant 0 : index
    %44 = vector.load %arg8[%c2_31, %c0_32, %c0_33] : memref<9x128x128xf32, #tpu.memory_space<vmem>>, vector<1x128x128xf32>
    %45 = vector.shape_cast %44 : vector<1x128x128xf32> to vector<128x128xf32>
    %cst_34 = arith.constant dense<0.000000e+00> : vector<18x128xf32>
    %46 = tpu.matmul %43, %45, %cst_34 {dimension_numbers = #tpu.dot_dimension_numbers<[1], [0], [0], [1], [0, 0, 1, 1], [], []>} : vector<18x128xf32>, vector<128x128xf32>, vector<18x128xf32> -> vector<18x128xf32>
    %47 = arith.addf %40, %46 : vector<18x128xf32>
    %c3 = arith.constant 3 : index
    %c0_35 = arith.constant 0 : index
    %c0_36 = arith.constant 0 : index
    %48 = vector.load %arg2[%c3, %c0_35, %c0_36] : memref<9x18x98xf32, #tpu.memory_space<vmem>>, vector<1x18x98xf32>
    %49 = vector.shape_cast %48 : vector<1x18x98xf32> to vector<18x98xf32>
    %cst_37 = arith.constant dense<0.000000e+00> : vector<18x128xf32>
    %50 = tpu.matmul %49, %27, %cst_37 {dimension_numbers = #tpu.dot_dimension_numbers<[1], [0], [0], [1], [0, 0, 1, 1], [], []>} : vector<18x98xf32>, vector<98x128xf32>, vector<18x128xf32> -> vector<18x128xf32>
    %c3_38 = arith.constant 3 : index
    %c0_39 = arith.constant 0 : index
    %c0_40 = arith.constant 0 : index
    %51 = vector.load %arg8[%c3_38, %c0_39, %c0_40] : memref<9x128x128xf32, #tpu.memory_space<vmem>>, vector<1x128x128xf32>
    %52 = vector.shape_cast %51 : vector<1x128x128xf32> to vector<128x128xf32>
    %cst_41 = arith.constant dense<0.000000e+00> : vector<18x128xf32>
    %53 = tpu.matmul %50, %52, %cst_41 {dimension_numbers = #tpu.dot_dimension_numbers<[1], [0], [0], [1], [0, 0, 1, 1], [], []>} : vector<18x128xf32>, vector<128x128xf32>, vector<18x128xf32> -> vector<18x128xf32>
    %54 = arith.addf %47, %53 : vector<18x128xf32>
    %c4 = arith.constant 4 : index
    %c0_42 = arith.constant 0 : index
    %c0_43 = arith.constant 0 : index
    %55 = vector.load %arg2[%c4, %c0_42, %c0_43] : memref<9x18x98xf32, #tpu.memory_space<vmem>>, vector<1x18x98xf32>
    %56 = vector.shape_cast %55 : vector<1x18x98xf32> to vector<18x98xf32>
    %cst_44 = arith.constant dense<0.000000e+00> : vector<18x128xf32>
    %57 = tpu.matmul %56, %27, %cst_44 {dimension_numbers = #tpu.dot_dimension_numbers<[1], [0], [0], [1], [0, 0, 1, 1], [], []>} : vector<18x98xf32>, vector<98x128xf32>, vector<18x128xf32> -> vector<18x128xf32>
    %c4_45 = arith.constant 4 : index
    %c0_46 = arith.constant 0 : index
    %c0_47 = arith.constant 0 : index
    %58 = vector.load %arg8[%c4_45, %c0_46, %c0_47] : memref<9x128x128xf32, #tpu.memory_space<vmem>>, vector<1x128x128xf32>
    %59 = vector.shape_cast %58 : vector<1x128x128xf32> to vector<128x128xf32>
    %cst_48 = arith.constant dense<0.000000e+00> : vector<18x128xf32>
    %60 = tpu.matmul %57, %59, %cst_48 {dimension_numbers = #tpu.dot_dimension_numbers<[1], [0], [0], [1], [0, 0, 1, 1], [], []>} : vector<18x128xf32>, vector<128x128xf32>, vector<18x128xf32> -> vector<18x128xf32>
    %61 = arith.addf %54, %60 : vector<18x128xf32>
    %c5 = arith.constant 5 : index
    %c0_49 = arith.constant 0 : index
    %c0_50 = arith.constant 0 : index
    %62 = vector.load %arg2[%c5, %c0_49, %c0_50] : memref<9x18x98xf32, #tpu.memory_space<vmem>>, vector<1x18x98xf32>
    %63 = vector.shape_cast %62 : vector<1x18x98xf32> to vector<18x98xf32>
    %cst_51 = arith.constant dense<0.000000e+00> : vector<18x128xf32>
    %64 = tpu.matmul %63, %27, %cst_51 {dimension_numbers = #tpu.dot_dimension_numbers<[1], [0], [0], [1], [0, 0, 1, 1], [], []>} : vector<18x98xf32>, vector<98x128xf32>, vector<18x128xf32> -> vector<18x128xf32>
    %c5_52 = arith.constant 5 : index
    %c0_53 = arith.constant 0 : index
    %c0_54 = arith.constant 0 : index
    %65 = vector.load %arg8[%c5_52, %c0_53, %c0_54] : memref<9x128x128xf32, #tpu.memory_space<vmem>>, vector<1x128x128xf32>
    %66 = vector.shape_cast %65 : vector<1x128x128xf32> to vector<128x128xf32>
    %cst_55 = arith.constant dense<0.000000e+00> : vector<18x128xf32>
    %67 = tpu.matmul %64, %66, %cst_55 {dimension_numbers = #tpu.dot_dimension_numbers<[1], [0], [0], [1], [0, 0, 1, 1], [], []>} : vector<18x128xf32>, vector<128x128xf32>, vector<18x128xf32> -> vector<18x128xf32>
    %68 = arith.addf %61, %67 : vector<18x128xf32>
    %c6 = arith.constant 6 : index
    %c0_56 = arith.constant 0 : index
    %c0_57 = arith.constant 0 : index
    %69 = vector.load %arg2[%c6, %c0_56, %c0_57] : memref<9x18x98xf32, #tpu.memory_space<vmem>>, vector<1x18x98xf32>
    %70 = vector.shape_cast %69 : vector<1x18x98xf32> to vector<18x98xf32>
    %cst_58 = arith.constant dense<0.000000e+00> : vector<18x128xf32>
    %71 = tpu.matmul %70, %27, %cst_58 {dimension_numbers = #tpu.dot_dimension_numbers<[1], [0], [0], [1], [0, 0, 1, 1], [], []>} : vector<18x98xf32>, vector<98x128xf32>, vector<18x128xf32> -> vector<18x128xf32>
    %c6_59 = arith.constant 6 : index
    %c0_60 = arith.constant 0 : index
    %c0_61 = arith.constant 0 : index
    %72 = vector.load %arg8[%c6_59, %c0_60, %c0_61] : memref<9x128x128xf32, #tpu.memory_space<vmem>>, vector<1x128x128xf32>
    %73 = vector.shape_cast %72 : vector<1x128x128xf32> to vector<128x128xf32>
    %cst_62 = arith.constant dense<0.000000e+00> : vector<18x128xf32>
    %74 = tpu.matmul %71, %73, %cst_62 {dimension_numbers = #tpu.dot_dimension_numbers<[1], [0], [0], [1], [0, 0, 1, 1], [], []>} : vector<18x128xf32>, vector<128x128xf32>, vector<18x128xf32> -> vector<18x128xf32>
    %75 = arith.addf %68, %74 : vector<18x128xf32>
    %c7 = arith.constant 7 : index
    %c0_63 = arith.constant 0 : index
    %c0_64 = arith.constant 0 : index
    %76 = vector.load %arg2[%c7, %c0_63, %c0_64] : memref<9x18x98xf32, #tpu.memory_space<vmem>>, vector<1x18x98xf32>
    %77 = vector.shape_cast %76 : vector<1x18x98xf32> to vector<18x98xf32>
    %cst_65 = arith.constant dense<0.000000e+00> : vector<18x128xf32>
    %78 = tpu.matmul %77, %27, %cst_65 {dimension_numbers = #tpu.dot_dimension_numbers<[1], [0], [0], [1], [0, 0, 1, 1], [], []>} : vector<18x98xf32>, vector<98x128xf32>, vector<18x128xf32> -> vector<18x128xf32>
    %c7_66 = arith.constant 7 : index
    %c0_67 = arith.constant 0 : index
    %c0_68 = arith.constant 0 : index
    %79 = vector.load %arg8[%c7_66, %c0_67, %c0_68] : memref<9x128x128xf32, #tpu.memory_space<vmem>>, vector<1x128x128xf32>
    %80 = vector.shape_cast %79 : vector<1x128x128xf32> to vector<128x128xf32>
    %cst_69 = arith.constant dense<0.000000e+00> : vector<18x128xf32>
    %81 = tpu.matmul %78, %80, %cst_69 {dimension_numbers = #tpu.dot_dimension_numbers<[1], [0], [0], [1], [0, 0, 1, 1], [], []>} : vector<18x128xf32>, vector<128x128xf32>, vector<18x128xf32> -> vector<18x128xf32>
    %82 = arith.addf %75, %81 : vector<18x128xf32>
    %c8 = arith.constant 8 : index
    %c0_70 = arith.constant 0 : index
    %c0_71 = arith.constant 0 : index
    %83 = vector.load %arg2[%c8, %c0_70, %c0_71] : memref<9x18x98xf32, #tpu.memory_space<vmem>>, vector<1x18x98xf32>
    %84 = vector.shape_cast %83 : vector<1x18x98xf32> to vector<18x98xf32>
    %cst_72 = arith.constant dense<0.000000e+00> : vector<18x128xf32>
    %85 = tpu.matmul %84, %27, %cst_72 {dimension_numbers = #tpu.dot_dimension_numbers<[1], [0], [0], [1], [0, 0, 1, 1], [], []>} : vector<18x98xf32>, vector<98x128xf32>, vector<18x128xf32> -> vector<18x128xf32>
    %c8_73 = arith.constant 8 : index
    %c0_74 = arith.constant 0 : index
    %c0_75 = arith.constant 0 : index
    %86 = vector.load %arg8[%c8_73, %c0_74, %c0_75] : memref<9x128x128xf32, #tpu.memory_space<vmem>>, vector<1x128x128xf32>
    %87 = vector.shape_cast %86 : vector<1x128x128xf32> to vector<128x128xf32>
    %cst_76 = arith.constant dense<0.000000e+00> : vector<18x128xf32>
    %88 = tpu.matmul %85, %87, %cst_76 {dimension_numbers = #tpu.dot_dimension_numbers<[1], [0], [0], [1], [0, 0, 1, 1], [], []>} : vector<18x128xf32>, vector<128x128xf32>, vector<18x128xf32> -> vector<18x128xf32>
    %89 = arith.addf %82, %88 : vector<18x128xf32>
    %c0_77 = arith.constant 0 : index
    %c0_78 = arith.constant 0 : index
    %90 = vector.load %arg9[%c0_77, %c0_78] : memref<1x128xf32, #tpu.memory_space<vmem>>, vector<1x128xf32>
    %c0_79 = arith.constant 0 : index
    %c0_80 = arith.constant 0 : index
    %91 = vector.load %arg10[%c0_79, %c0_80] : memref<1x128xf32, #tpu.memory_space<vmem>>, vector<1x128xf32>
    %cst_81 = arith.constant dense<0.000000e+00> : vector<128xf32>
    %92 = vector.multi_reduction <add>, %89, %cst_81 [0] : vector<18x128xf32> to vector<128xf32>
    %93 = vector.shape_cast %92 : vector<128xf32> to vector<1x128xf32>
    %cst_82 = arith.constant 0.055555556 : f32
    %94 = vector.broadcast %cst_82 : f32 to vector<1x128xf32>
    %95 = arith.mulf %93, %94 : vector<1x128xf32>
    %96 = arith.mulf %89, %89 : vector<18x128xf32>
    %cst_83 = arith.constant dense<0.000000e+00> : vector<128xf32>
    %97 = vector.multi_reduction <add>, %96, %cst_83 [0] : vector<18x128xf32> to vector<128xf32>
    %98 = vector.shape_cast %97 : vector<128xf32> to vector<1x128xf32>
    %cst_84 = arith.constant 0.055555556 : f32
    %99 = vector.broadcast %cst_84 : f32 to vector<1x128xf32>
    %100 = arith.mulf %98, %99 : vector<1x128xf32>
    %101 = arith.mulf %95, %95 : vector<1x128xf32>
    %102 = arith.subf %100, %101 : vector<1x128xf32>
    %cst_85 = arith.constant 9.99999974E-6 : f32
    %103 = vector.broadcast %cst_85 : f32 to vector<1x128xf32>
    %104 = arith.addf %102, %103 : vector<1x128xf32>
    %105 = math.rsqrt %104 : vector<1x128xf32>
    %106 = arith.mulf %90, %105 : vector<1x128xf32>
    %107 = arith.mulf %95, %106 : vector<1x128xf32>
    %108 = arith.subf %91, %107 : vector<1x128xf32>
    %109 = vector.broadcast %106 : vector<1x128xf32> to vector<18x128xf32>
    %110 = arith.mulf %89, %109 : vector<18x128xf32>
    %111 = vector.broadcast %108 : vector<1x128xf32> to vector<18x128xf32>
    %112 = arith.addf %110, %111 : vector<18x128xf32>
    %cst_86 = arith.constant 0.000000e+00 : f32
    %113 = vector.broadcast %cst_86 : f32 to vector<18x128xf32>
    %114 = arith.maximumf %112, %113 : vector<18x128xf32>
    %c0_87 = arith.constant 0 : index
    %c0_88 = arith.constant 0 : index
    %c0_89 = arith.constant 0 : index
    %115 = vector.load %arg3[%c0_87, %c0_88, %c0_89] : memref<9x2x18xf32, #tpu.memory_space<vmem>>, vector<1x2x18xf32>
    %116 = vector.shape_cast %115 : vector<1x2x18xf32> to vector<2x18xf32>
    %cst_90 = arith.constant dense<0.000000e+00> : vector<2x128xf32>
    %117 = tpu.matmul %116, %114, %cst_90 {dimension_numbers = #tpu.dot_dimension_numbers<[1], [0], [0], [1], [0, 0, 1, 1], [], []>} : vector<2x18xf32>, vector<18x128xf32>, vector<2x128xf32> -> vector<2x128xf32>
    %c0_91 = arith.constant 0 : index
    %c0_92 = arith.constant 0 : index
    %c0_93 = arith.constant 0 : index
    %118 = vector.load %arg11[%c0_91, %c0_92, %c0_93] : memref<9x128x128xf32, #tpu.memory_space<vmem>>, vector<1x128x128xf32>
    %119 = vector.shape_cast %118 : vector<1x128x128xf32> to vector<128x128xf32>
    %cst_94 = arith.constant dense<0.000000e+00> : vector<2x128xf32>
    %120 = tpu.matmul %117, %119, %cst_94 {dimension_numbers = #tpu.dot_dimension_numbers<[1], [0], [0], [1], [0, 0, 1, 1], [], []>} : vector<2x128xf32>, vector<128x128xf32>, vector<2x128xf32> -> vector<2x128xf32>
    %c1_95 = arith.constant 1 : index
    %c0_96 = arith.constant 0 : index
    %c0_97 = arith.constant 0 : index
    %121 = vector.load %arg3[%c1_95, %c0_96, %c0_97] : memref<9x2x18xf32, #tpu.memory_space<vmem>>, vector<1x2x18xf32>
    %122 = vector.shape_cast %121 : vector<1x2x18xf32> to vector<2x18xf32>
    %cst_98 = arith.constant dense<0.000000e+00> : vector<2x128xf32>
    %123 = tpu.matmul %122, %114, %cst_98 {dimension_numbers = #tpu.dot_dimension_numbers<[1], [0], [0], [1], [0, 0, 1, 1], [], []>} : vector<2x18xf32>, vector<18x128xf32>, vector<2x128xf32> -> vector<2x128xf32>
    %c1_99 = arith.constant 1 : index
    %c0_100 = arith.constant 0 : index
    %c0_101 = arith.constant 0 : index
    %124 = vector.load %arg11[%c1_99, %c0_100, %c0_101] : memref<9x128x128xf32, #tpu.memory_space<vmem>>, vector<1x128x128xf32>
    %125 = vector.shape_cast %124 : vector<1x128x128xf32> to vector<128x128xf32>
    %cst_102 = arith.constant dense<0.000000e+00> : vector<2x128xf32>
    %126 = tpu.matmul %123, %125, %cst_102 {dimension_numbers = #tpu.dot_dimension_numbers<[1], [0], [0], [1], [0, 0, 1, 1], [], []>} : vector<2x128xf32>, vector<128x128xf32>, vector<2x128xf32> -> vector<2x128xf32>
    %127 = arith.addf %120, %126 : vector<2x128xf32>
    %c2_103 = arith.constant 2 : index
    %c0_104 = arith.constant 0 : index
    %c0_105 = arith.constant 0 : index
    %128 = vector.load %arg3[%c2_103, %c0_104, %c0_105] : memref<9x2x18xf32, #tpu.memory_space<vmem>>, vector<1x2x18xf32>
    %129 = vector.shape_cast %128 : vector<1x2x18xf32> to vector<2x18xf32>
    %cst_106 = arith.constant dense<0.000000e+00> : vector<2x128xf32>
    %130 = tpu.matmul %129, %114, %cst_106 {dimension_numbers = #tpu.dot_dimension_numbers<[1], [0], [0], [1], [0, 0, 1, 1], [], []>} : vector<2x18xf32>, vector<18x128xf32>, vector<2x128xf32> -> vector<2x128xf32>
    %c2_107 = arith.constant 2 : index
    %c0_108 = arith.constant 0 : index
    %c0_109 = arith.constant 0 : index
    %131 = vector.load %arg11[%c2_107, %c0_108, %c0_109] : memref<9x128x128xf32, #tpu.memory_space<vmem>>, vector<1x128x128xf32>
    %132 = vector.shape_cast %131 : vector<1x128x128xf32> to vector<128x128xf32>
    %cst_110 = arith.constant dense<0.000000e+00> : vector<2x128xf32>
    %133 = tpu.matmul %130, %132, %cst_110 {dimension_numbers = #tpu.dot_dimension_numbers<[1], [0], [0], [1], [0, 0, 1, 1], [], []>} : vector<2x128xf32>, vector<128x128xf32>, vector<2x128xf32> -> vector<2x128xf32>
    %134 = arith.addf %127, %133 : vector<2x128xf32>
    %c3_111 = arith.constant 3 : index
    %c0_112 = arith.constant 0 : index
    %c0_113 = arith.constant 0 : index
    %135 = vector.load %arg3[%c3_111, %c0_112, %c0_113] : memref<9x2x18xf32, #tpu.memory_space<vmem>>, vector<1x2x18xf32>
    %136 = vector.shape_cast %135 : vector<1x2x18xf32> to vector<2x18xf32>
    %cst_114 = arith.constant dense<0.000000e+00> : vector<2x128xf32>
    %137 = tpu.matmul %136, %114, %cst_114 {dimension_numbers = #tpu.dot_dimension_numbers<[1], [0], [0], [1], [0, 0, 1, 1], [], []>} : vector<2x18xf32>, vector<18x128xf32>, vector<2x128xf32> -> vector<2x128xf32>
    %c3_115 = arith.constant 3 : index
    %c0_116 = arith.constant 0 : index
    %c0_117 = arith.constant 0 : index
    %138 = vector.load %arg11[%c3_115, %c0_116, %c0_117] : memref<9x128x128xf32, #tpu.memory_space<vmem>>, vector<1x128x128xf32>
    %139 = vector.shape_cast %138 : vector<1x128x128xf32> to vector<128x128xf32>
    %cst_118 = arith.constant dense<0.000000e+00> : vector<2x128xf32>
    %140 = tpu.matmul %137, %139, %cst_118 {dimension_numbers = #tpu.dot_dimension_numbers<[1], [0], [0], [1], [0, 0, 1, 1], [], []>} : vector<2x128xf32>, vector<128x128xf32>, vector<2x128xf32> -> vector<2x128xf32>
    %141 = arith.addf %134, %140 : vector<2x128xf32>
    %c4_119 = arith.constant 4 : index
    %c0_120 = arith.constant 0 : index
    %c0_121 = arith.constant 0 : index
    %142 = vector.load %arg3[%c4_119, %c0_120, %c0_121] : memref<9x2x18xf32, #tpu.memory_space<vmem>>, vector<1x2x18xf32>
    %143 = vector.shape_cast %142 : vector<1x2x18xf32> to vector<2x18xf32>
    %cst_122 = arith.constant dense<0.000000e+00> : vector<2x128xf32>
    %144 = tpu.matmul %143, %114, %cst_122 {dimension_numbers = #tpu.dot_dimension_numbers<[1], [0], [0], [1], [0, 0, 1, 1], [], []>} : vector<2x18xf32>, vector<18x128xf32>, vector<2x128xf32> -> vector<2x128xf32>
    %c4_123 = arith.constant 4 : index
    %c0_124 = arith.constant 0 : index
    %c0_125 = arith.constant 0 : index
    %145 = vector.load %arg11[%c4_123, %c0_124, %c0_125] : memref<9x128x128xf32, #tpu.memory_space<vmem>>, vector<1x128x128xf32>
    %146 = vector.shape_cast %145 : vector<1x128x128xf32> to vector<128x128xf32>
    %cst_126 = arith.constant dense<0.000000e+00> : vector<2x128xf32>
    %147 = tpu.matmul %144, %146, %cst_126 {dimension_numbers = #tpu.dot_dimension_numbers<[1], [0], [0], [1], [0, 0, 1, 1], [], []>} : vector<2x128xf32>, vector<128x128xf32>, vector<2x128xf32> -> vector<2x128xf32>
    %148 = arith.addf %141, %147 : vector<2x128xf32>
    %c5_127 = arith.constant 5 : index
    %c0_128 = arith.constant 0 : index
    %c0_129 = arith.constant 0 : index
    %149 = vector.load %arg3[%c5_127, %c0_128, %c0_129] : memref<9x2x18xf32, #tpu.memory_space<vmem>>, vector<1x2x18xf32>
    %150 = vector.shape_cast %149 : vector<1x2x18xf32> to vector<2x18xf32>
    %cst_130 = arith.constant dense<0.000000e+00> : vector<2x128xf32>
    %151 = tpu.matmul %150, %114, %cst_130 {dimension_numbers = #tpu.dot_dimension_numbers<[1], [0], [0], [1], [0, 0, 1, 1], [], []>} : vector<2x18xf32>, vector<18x128xf32>, vector<2x128xf32> -> vector<2x128xf32>
    %c5_131 = arith.constant 5 : index
    %c0_132 = arith.constant 0 : index
    %c0_133 = arith.constant 0 : index
    %152 = vector.load %arg11[%c5_131, %c0_132, %c0_133] : memref<9x128x128xf32, #tpu.memory_space<vmem>>, vector<1x128x128xf32>
    %153 = vector.shape_cast %152 : vector<1x128x128xf32> to vector<128x128xf32>
    %cst_134 = arith.constant dense<0.000000e+00> : vector<2x128xf32>
    %154 = tpu.matmul %151, %153, %cst_134 {dimension_numbers = #tpu.dot_dimension_numbers<[1], [0], [0], [1], [0, 0, 1, 1], [], []>} : vector<2x128xf32>, vector<128x128xf32>, vector<2x128xf32> -> vector<2x128xf32>
    %155 = arith.addf %148, %154 : vector<2x128xf32>
    %c6_135 = arith.constant 6 : index
    %c0_136 = arith.constant 0 : index
    %c0_137 = arith.constant 0 : index
    %156 = vector.load %arg3[%c6_135, %c0_136, %c0_137] : memref<9x2x18xf32, #tpu.memory_space<vmem>>, vector<1x2x18xf32>
    %157 = vector.shape_cast %156 : vector<1x2x18xf32> to vector<2x18xf32>
    %cst_138 = arith.constant dense<0.000000e+00> : vector<2x128xf32>
    %158 = tpu.matmul %157, %114, %cst_138 {dimension_numbers = #tpu.dot_dimension_numbers<[1], [0], [0], [1], [0, 0, 1, 1], [], []>} : vector<2x18xf32>, vector<18x128xf32>, vector<2x128xf32> -> vector<2x128xf32>
    %c6_139 = arith.constant 6 : index
    %c0_140 = arith.constant 0 : index
    %c0_141 = arith.constant 0 : index
    %159 = vector.load %arg11[%c6_139, %c0_140, %c0_141] : memref<9x128x128xf32, #tpu.memory_space<vmem>>, vector<1x128x128xf32>
    %160 = vector.shape_cast %159 : vector<1x128x128xf32> to vector<128x128xf32>
    %cst_142 = arith.constant dense<0.000000e+00> : vector<2x128xf32>
    %161 = tpu.matmul %158, %160, %cst_142 {dimension_numbers = #tpu.dot_dimension_numbers<[1], [0], [0], [1], [0, 0, 1, 1], [], []>} : vector<2x128xf32>, vector<128x128xf32>, vector<2x128xf32> -> vector<2x128xf32>
    %162 = arith.addf %155, %161 : vector<2x128xf32>
    %c7_143 = arith.constant 7 : index
    %c0_144 = arith.constant 0 : index
    %c0_145 = arith.constant 0 : index
    %163 = vector.load %arg3[%c7_143, %c0_144, %c0_145] : memref<9x2x18xf32, #tpu.memory_space<vmem>>, vector<1x2x18xf32>
    %164 = vector.shape_cast %163 : vector<1x2x18xf32> to vector<2x18xf32>
    %cst_146 = arith.constant dense<0.000000e+00> : vector<2x128xf32>
    %165 = tpu.matmul %164, %114, %cst_146 {dimension_numbers = #tpu.dot_dimension_numbers<[1], [0], [0], [1], [0, 0, 1, 1], [], []>} : vector<2x18xf32>, vector<18x128xf32>, vector<2x128xf32> -> vector<2x128xf32>
    %c7_147 = arith.constant 7 : index
    %c0_148 = arith.constant 0 : index
    %c0_149 = arith.constant 0 : index
    %166 = vector.load %arg11[%c7_147, %c0_148, %c0_149] : memref<9x128x128xf32, #tpu.memory_space<vmem>>, vector<1x128x128xf32>
    %167 = vector.shape_cast %166 : vector<1x128x128xf32> to vector<128x128xf32>
    %cst_150 = arith.constant dense<0.000000e+00> : vector<2x128xf32>
    %168 = tpu.matmul %165, %167, %cst_150 {dimension_numbers = #tpu.dot_dimension_numbers<[1], [0], [0], [1], [0, 0, 1, 1], [], []>} : vector<2x128xf32>, vector<128x128xf32>, vector<2x128xf32> -> vector<2x128xf32>
    %169 = arith.addf %162, %168 : vector<2x128xf32>
    %c8_151 = arith.constant 8 : index
    %c0_152 = arith.constant 0 : index
    %c0_153 = arith.constant 0 : index
    %170 = vector.load %arg3[%c8_151, %c0_152, %c0_153] : memref<9x2x18xf32, #tpu.memory_space<vmem>>, vector<1x2x18xf32>
    %171 = vector.shape_cast %170 : vector<1x2x18xf32> to vector<2x18xf32>
    %cst_154 = arith.constant dense<0.000000e+00> : vector<2x128xf32>
    %172 = tpu.matmul %171, %114, %cst_154 {dimension_numbers = #tpu.dot_dimension_numbers<[1], [0], [0], [1], [0, 0, 1, 1], [], []>} : vector<2x18xf32>, vector<18x128xf32>, vector<2x128xf32> -> vector<2x128xf32>
    %c8_155 = arith.constant 8 : index
    %c0_156 = arith.constant 0 : index
    %c0_157 = arith.constant 0 : index
    %173 = vector.load %arg11[%c8_155, %c0_156, %c0_157] : memref<9x128x128xf32, #tpu.memory_space<vmem>>, vector<1x128x128xf32>
    %174 = vector.shape_cast %173 : vector<1x128x128xf32> to vector<128x128xf32>
    %cst_158 = arith.constant dense<0.000000e+00> : vector<2x128xf32>
    %175 = tpu.matmul %172, %174, %cst_158 {dimension_numbers = #tpu.dot_dimension_numbers<[1], [0], [0], [1], [0, 0, 1, 1], [], []>} : vector<2x128xf32>, vector<128x128xf32>, vector<2x128xf32> -> vector<2x128xf32>
    %176 = arith.addf %169, %175 : vector<2x128xf32>
    %c0_159 = arith.constant 0 : index
    %c0_160 = arith.constant 0 : index
    %177 = vector.load %arg12[%c0_159, %c0_160] : memref<1x128xf32, #tpu.memory_space<vmem>>, vector<1x128xf32>
    %c0_161 = arith.constant 0 : index
    %c0_162 = arith.constant 0 : index
    %178 = vector.load %arg13[%c0_161, %c0_162] : memref<1x128xf32, #tpu.memory_space<vmem>>, vector<1x128xf32>
    %cst_163 = arith.constant dense<0.000000e+00> : vector<128xf32>
    %179 = vector.multi_reduction <add>, %176, %cst_163 [0] : vector<2x128xf32> to vector<128xf32>
    %180 = vector.shape_cast %179 : vector<128xf32> to vector<1x128xf32>
    %cst_164 = arith.constant 5.000000e-01 : f32
    %181 = vector.broadcast %cst_164 : f32 to vector<1x128xf32>
    %182 = arith.mulf %180, %181 : vector<1x128xf32>
    %183 = arith.mulf %176, %176 : vector<2x128xf32>
    %cst_165 = arith.constant dense<0.000000e+00> : vector<128xf32>
    %184 = vector.multi_reduction <add>, %183, %cst_165 [0] : vector<2x128xf32> to vector<128xf32>
    %185 = vector.shape_cast %184 : vector<128xf32> to vector<1x128xf32>
    %cst_166 = arith.constant 5.000000e-01 : f32
    %186 = vector.broadcast %cst_166 : f32 to vector<1x128xf32>
    %187 = arith.mulf %185, %186 : vector<1x128xf32>
    %188 = arith.mulf %182, %182 : vector<1x128xf32>
    %189 = arith.subf %187, %188 : vector<1x128xf32>
    %cst_167 = arith.constant 9.99999974E-6 : f32
    %190 = vector.broadcast %cst_167 : f32 to vector<1x128xf32>
    %191 = arith.addf %189, %190 : vector<1x128xf32>
    %192 = math.rsqrt %191 : vector<1x128xf32>
    %193 = arith.mulf %177, %192 : vector<1x128xf32>
    %194 = arith.mulf %182, %193 : vector<1x128xf32>
    %195 = arith.subf %178, %194 : vector<1x128xf32>
    %196 = vector.broadcast %193 : vector<1x128xf32> to vector<2x128xf32>
    %197 = arith.mulf %176, %196 : vector<2x128xf32>
    %198 = vector.broadcast %195 : vector<1x128xf32> to vector<2x128xf32>
    %199 = arith.addf %197, %198 : vector<2x128xf32>
    %cst_168 = arith.constant 0.000000e+00 : f32
    %200 = vector.broadcast %cst_168 : f32 to vector<2x128xf32>
    %201 = arith.maximumf %199, %200 : vector<2x128xf32>
    %c0_169 = arith.constant 0 : index
    %c0_170 = arith.constant 0 : index
    %202 = vector.load %arg14[%c0_169, %c0_170] : memref<128x64xf32, #tpu.memory_space<vmem>>, vector<128x64xf32>
    %cst_171 = arith.constant dense<0.000000e+00> : vector<2x64xf32>
    %203 = tpu.matmul %201, %202, %cst_171 {dimension_numbers = #tpu.dot_dimension_numbers<[1], [0], [0], [1], [0, 0, 1, 1], [], []>} : vector<2x128xf32>, vector<128x64xf32>, vector<2x64xf32> -> vector<2x64xf32>
    %c0_172 = arith.constant 0 : index
    %c0_173 = arith.constant 0 : index
    %204 = vector.load %arg4[%c0_172, %c0_173] : memref<2x4xf32, #tpu.memory_space<vmem>>, vector<2x4xf32>
    %c0_174 = arith.constant 0 : index
    %c0_175 = arith.constant 0 : index
    %205 = vector.load %arg15[%c0_174, %c0_175] : memref<4x64xf32, #tpu.memory_space<vmem>>, vector<4x64xf32>
    %cst_176 = arith.constant dense<0.000000e+00> : vector<2x64xf32>
    %206 = tpu.matmul %204, %205, %cst_176 {dimension_numbers = #tpu.dot_dimension_numbers<[1], [0], [0], [1], [0, 0, 1, 1], [], []>} : vector<2x4xf32>, vector<4x64xf32>, vector<2x64xf32> -> vector<2x64xf32>
    %207 = arith.addf %203, %206 : vector<2x64xf32>
    %c0_177 = arith.constant 0 : index
    %c0_178 = arith.constant 0 : index
    %208 = vector.load %arg16[%c0_177, %c0_178] : memref<1x64xf32, #tpu.memory_space<vmem>>, vector<1x64xf32>
    %209 = vector.broadcast %208 : vector<1x64xf32> to vector<2x64xf32>
    %210 = arith.addf %207, %209 : vector<2x64xf32>
    %cst_179 = arith.constant 0.000000e+00 : f32
    %211 = vector.broadcast %cst_179 : f32 to vector<2x64xf32>
    %212 = arith.maximumf %210, %211 : vector<2x64xf32>
    %c0_180 = arith.constant 0 : index
    %c0_181 = arith.constant 0 : index
    %213 = vector.load %arg17[%c0_180, %c0_181] : memref<64x64xf32, #tpu.memory_space<vmem>>, vector<64x64xf32>
    %cst_182 = arith.constant dense<0.000000e+00> : vector<2x64xf32>
    %214 = tpu.matmul %212, %213, %cst_182 {dimension_numbers = #tpu.dot_dimension_numbers<[1], [0], [0], [1], [0, 0, 1, 1], [], []>} : vector<2x64xf32>, vector<64x64xf32>, vector<2x64xf32> -> vector<2x64xf32>
    %c0_183 = arith.constant 0 : index
    %c0_184 = arith.constant 0 : index
    %215 = vector.load %arg18[%c0_183, %c0_184] : memref<1x64xf32, #tpu.memory_space<vmem>>, vector<1x64xf32>
    %216 = vector.broadcast %215 : vector<1x64xf32> to vector<2x64xf32>
    %217 = arith.addf %214, %216 : vector<2x64xf32>
    %cst_185 = arith.constant 0.000000e+00 : f32
    %218 = vector.broadcast %cst_185 : f32 to vector<2x64xf32>
    %219 = arith.maximumf %217, %218 : vector<2x64xf32>
    %c0_186 = arith.constant 0 : index
    %c0_187 = arith.constant 0 : index
    %220 = vector.load %arg19[%c0_186, %c0_187] : memref<64x2xf32, #tpu.memory_space<vmem>>, vector<64x2xf32>
    %cst_188 = arith.constant dense<0.000000e+00> : vector<2x2xf32>
    %221 = tpu.matmul %219, %220, %cst_188 {dimension_numbers = #tpu.dot_dimension_numbers<[1], [0], [0], [1], [0, 0, 1, 1], [], []>} : vector<2x64xf32>, vector<64x2xf32>, vector<2x2xf32> -> vector<2x2xf32>
    %c0_189 = arith.constant 0 : index
    %c0_190 = arith.constant 0 : index
    %222 = vector.load %arg20[%c0_189, %c0_190] : memref<1x2xf32, #tpu.memory_space<vmem>>, vector<1x2xf32>
    %223 = vector.broadcast %222 : vector<1x2xf32> to vector<2x2xf32>
    %224 = arith.addf %221, %223 : vector<2x2xf32>
    %c0_191 = arith.constant 0 : index
    %c0_192 = arith.constant 0 : index
    %225 = vector.load %arg21[%c0_191, %c0_192] : memref<2x2xf32, #tpu.memory_space<vmem>>, vector<2x2xf32>
    tpu.vector_store %arg21[%c0_191, %c0_192], %224 {strides = array<i32>} : memref<2x2xf32, #tpu.memory_space<vmem>>, vector<2x2xf32>,
    return
  }
  func.func @transform_0(%arg0: i32) -> (i32, i32) {
    %c0_i32 = arith.constant 0 : i32
    %c0_i32_0 = arith.constant 0 : i32
    %c0_i32_1 = arith.constant 0 : i32
    return %c0_i32, %c0_i32_0 : i32, i32
  }
  func.func @transform_1(%arg0: i32) -> (i32, i32, i32) {
    %c0_i32 = arith.constant 0 : i32
    %c0_i32_0 = arith.constant 0 : i32
    %c0_i32_1 = arith.constant 0 : i32
    %c0_i32_2 = arith.constant 0 : i32
    return %c0_i32, %c0_i32_0, %c0_i32_1 : i32, i32, i32
  }
  func.func @transform_2(%arg0: i32) -> (i32, i32, i32) {
    %c0_i32 = arith.constant 0 : i32
    %c0_i32_0 = arith.constant 0 : i32
    %c0_i32_1 = arith.constant 0 : i32
    %c0_i32_2 = arith.constant 0 : i32
    return %c0_i32, %c0_i32_0, %c0_i32_1 : i32, i32, i32
  }
  func.func @transform_3(%arg0: i32) -> (i32, i32) {
    %c0_i32 = arith.constant 0 : i32
    %c0_i32_0 = arith.constant 0 : i32
    %c0_i32_1 = arith.constant 0 : i32
    return %c0_i32, %c0_i32_0 : i32, i32
  }
  func.func @transform_4(%arg0: i32) -> (i32, i32) {
    %c0_i32 = arith.constant 0 : i32
    %c0_i32_0 = arith.constant 0 : i32
    %c0_i32_1 = arith.constant 0 : i32
    return %c0_i32, %c0_i32_0 : i32, i32
  }
  func.func @transform_5(%arg0: i32) -> (i32, i32) {
    %c0_i32 = arith.constant 0 : i32
    %c0_i32_0 = arith.constant 0 : i32
    %c0_i32_1 = arith.constant 0 : i32
    return %c0_i32, %c0_i32_0 : i32, i32
  }
  func.func @transform_6(%arg0: i32) -> (i32, i32) {
    %c0_i32 = arith.constant 0 : i32
    %c0_i32_0 = arith.constant 0 : i32
    %c0_i32_1 = arith.constant 0 : i32
    return %c0_i32, %c0_i32_0 : i32, i32
  }
  func.func @transform_7(%arg0: i32) -> (i32, i32, i32) {
    %c0_i32 = arith.constant 0 : i32
    %c0_i32_0 = arith.constant 0 : i32
    %c0_i32_1 = arith.constant 0 : i32
    %c0_i32_2 = arith.constant 0 : i32
    return %c0_i32, %c0_i32_0, %c0_i32_1 : i32, i32, i32
  }
  func.func @transform_8(%arg0: i32) -> (i32, i32) {
    %c0_i32 = arith.constant 0 : i32
    %c0_i32_0 = arith.constant 0 : i32
    %c0_i32_1 = arith.constant 0 : i32
    return %c0_i32, %c0_i32_0 : i32, i32
  }
  func.func @transform_9(%arg0: i32) -> (i32, i32) {
    %c0_i32 = arith.constant 0 : i32
    %c0_i32_0 = arith.constant 0 : i32
    %c0_i32_1 = arith.constant 0 : i32
    return %c0_i32, %c0_i32_0 : i32, i32
  }
  func.func @transform_10(%arg0: i32) -> (i32, i32, i32) {
    %c0_i32 = arith.constant 0 : i32
    %c0_i32_0 = arith.constant 0 : i32
    %c0_i32_1 = arith.constant 0 : i32
    %c0_i32_2 = arith.constant 0 : i32
    return %c0_i32, %c0_i32_0, %c0_i32_1 : i32, i32, i32
  }
  func.func @transform_11(%arg0: i32) -> (i32, i32) {
    %c0_i32 = arith.constant 0 : i32
    %c0_i32_0 = arith.constant 0 : i32
    %c0_i32_1 = arith.constant 0 : i32
    return %c0_i32, %c0_i32_0 : i32, i32
  }
  func.func @transform_12(%arg0: i32) -> (i32, i32) {
    %c0_i32 = arith.constant 0 : i32
    %c0_i32_0 = arith.constant 0 : i32
    %c0_i32_1 = arith.constant 0 : i32
    return %c0_i32, %c0_i32_0 : i32, i32
  }
  func.func @transform_13(%arg0: i32) -> (i32, i32) {
    %c0_i32 = arith.constant 0 : i32
    %c0_i32_0 = arith.constant 0 : i32
    %c0_i32_1 = arith.constant 0 : i32
    return %c0_i32, %c0_i32_0 : i32, i32
  }
  func.func @transform_14(%arg0: i32) -> (i32, i32) {
    %c0_i32 = arith.constant 0 : i32
    %c0_i32_0 = arith.constant 0 : i32
    %c0_i32_1 = arith.constant 0 : i32
    return %c0_i32, %c0_i32_0 : i32, i32
  }
  func.func @transform_15(%arg0: i32) -> (i32, i32) {
    %c0_i32 = arith.constant 0 : i32
    %c0_i32_0 = arith.constant 0 : i32
    %c0_i32_1 = arith.constant 0 : i32
    return %c0_i32, %c0_i32_0 : i32, i32
  }
  func.func @transform_16(%arg0: i32) -> (i32, i32) {
    %c0_i32 = arith.constant 0 : i32
    %c0_i32_0 = arith.constant 0 : i32
    %c0_i32_1 = arith.constant 0 : i32
    return %c0_i32, %c0_i32_0 : i32, i32
  }
  func.func @transform_17(%arg0: i32) -> (i32, i32) {
    %c0_i32 = arith.constant 0 : i32
    %c0_i32_0 = arith.constant 0 : i32
    %c0_i32_1 = arith.constant 0 : i32
    return %c0_i32, %c0_i32_0 : i32, i32
  }
  func.func @transform_18(%arg0: i32) -> (i32, i32) {
    %c0_i32 = arith.constant 0 : i32
    %c0_i32_0 = arith.constant 0 : i32
    %c0_i32_1 = arith.constant 0 : i32
    return %c0_i32, %c0_i32_0 : i32, i32
  }
  func.func @transform_19(%arg0: i32) -> (i32, i32) {
    %c0_i32 = arith.constant 0 : i32
    %c0_i32_0 = arith.constant 0 : i32
    %c0_i32_1 = arith.constant 0 : i32
    return %c0_i32, %c0_i32_0 : i32, i32
  }
  func.func @transform_20(%arg0: i32) -> (i32, i32) {
    %c0_i32 = arith.constant 0 : i32
    %c0_i32_0 = arith.constant 0 : i32
    %c0_i32_1 = arith.constant 0 : i32
    return %c0_i32, %c0_i32_0 : i32, i32
  }
}

</mosaic_0001>

<bundles_post_ra>
// kernel: tpu_custom_call.1
= control target key start
LH: loop header
LB: loop body
LE: loop exit
PB: predicated region body
PF: predicated region fallthrough
CT: control target
= control target key end

     0   :  { %s7484_s0 = inlined_call_operand.vmem [shape: f32[98,36], index: 0, kind: input, shape index: {}]   ;;  %s7485_s1 = inlined_call_operand.vmem [shape: f32[9,18,98], index: 1, kind: input, shape index: {}]   ;;  %s7486_s2 = inlined_call_operand.vmem [shape: f32[9,2,18], index: 2, kind: input, shape index: {}]   ;;  %s7487_s3 = inlined_call_operand.hbm [shape: f32[2,4], index: 3, kind: input, shape index: {}]   ;;  %s7488_s4 = inlined_call_operand.vmem [shape: f32[36,128], index: 4, kind: input, shape index: {}]   ;;  %s7489_s5 = inlined_call_operand.vmem [shape: f32[1,128], index: 5, kind: input, shape index: {}]   ;;  %s7490_s6 = inlined_call_operand.vmem [shape: f32[1,128], index: 6, kind: input, shape index: {}]   ;;  %s7491_s7 = inlined_call_operand.hbm [shape: f32[9,128,128], index: 7, kind: input, shape index: {}]   ;;  %s7492_s8 = inlined_call_operand.vmem [shape: f32[1,128], index: 8, kind: input, shape index: {}]   ;;  %s7493_s9 = inlined_call_operand.vmem [shape: f32[1,128], index: 9, kind: input, shape index: {}]   ;;  %s7494_s10 = inlined_call_operand.hbm [shape: f32[9,128,128], index: 10, kind: input, shape index: {}]   ;;  %s7495_s11 = inlined_call_operand.vmem [shape: f32[1,128], index: 11, kind: input, shape index: {}]   ;;  %s7496_s12 = inlined_call_operand.vmem [shape: f32[1,128], index: 12, kind: input, shape index: {}]   ;;  %s7497_s13 = inlined_call_operand.vmem [shape: f32[128,64], index: 13, kind: input, shape index: {}]   ;;  %s7498_s14 = inlined_call_operand.vmem [shape: f32[4,64], index: 14, kind: input, shape index: {}]   ;;  %s7499_s15 = inlined_call_operand.vmem [shape: f32[1,64], index: 15, kind: input, shape index: {}]   ;;  %s7500_s16 = inlined_call_operand.vmem [shape: f32[64,64], index: 16, kind: input, shape index: {}]   ;;  %s7501_s17 = inlined_call_operand.vmem [shape: f32[1,64], index: 17, kind: input, shape index: {}]   ;;  %s7502_s18 = inlined_call_operand.vmem [shape: f32[64,2], index: 18, kind: input, shape index: {}]   ;;  %s7503_s19 = inlined_call_operand.vmem [shape: f32[1,2], index: 19, kind: input, shape index: {}]   ;;  %s7504_s20 = inlined_call_operand.hbm [shape: f32[2,2], index: 20, kind: output, shape index: {}]  }
   0x1   :  { %7509 = sst [smem:[#allocation12_spill]] %s7484_s0 }
   0x2   :  { %7510 = sst [smem:[#allocation13_spill]] %s7485_s1 }
   0x3   :  { %7511 = sst [smem:[#allocation14_spill]] %s7486_s2 }
   0x4   :  { %7512 = sst [smem:[#allocation15_spill]] %s7487_s3 }
   0x5   :  { %7513 = sst [smem:[#allocation16_spill]] %s7488_s4 }
   0x6   :  { %25 = vsyncpa [#allocation3], 0 }
   0x7   :  { %26 = vsyncpa [#allocation6], 0 }
   0x8   :  { %27 = vsyncpa [#allocation4], 0  ;;  %s6048_s1 = smov [#allocation5]  }
   0x9   :  { %s55_s22 = sshll.u32 %s6048_s1, 4  ;;  %s56_s22 = int_to_ptr.vmem [resolvable:$true] %s55_s22 }
   0xa   :  { %s5970_s23 = scalar_lea.vmem %s56_s22, 18432  ;;  %p5975_p1 = scmp.lt.s32.totalorder %s56_s22, %s56_s22 }
   0xb   :  { %p5971_p0 = scmp.ne.s32.totalorder %s56_s22, %s5970_s23  ;;  %p5976_p2 = scmp.lt.s32.totalorder %s5970_s23, %s5970_s23 }
   0xd   :  { %p5977_p3 = por %p5976_p2, %p5975_p1 }
   0xf   :  { %p5978_p4 = pnand %p5977_p3, %p5971_p0 }
  0x11   :  { %5981 = shalt.err (!%p5978_p4)
}
  0x12   :  { %s6049_s24 = smov 128   ;;  %s6050_s2 = smov 8  }
  0x13   :  { %61 = dma.hbm_to_vmem [thread:$0]  %s7491_s7, 18432, %s56_s22, [#allocation6], %s6049_s24, %s6049_s24, %s6050_s2  }
  0x14   :  { %s6051_s26 = smov [#allocation2]   ;;  %s6052_s28 = smov [#allocation7]  }
  0x15   :  { %s40_s27 = sshll.u32 %s6051_s26, 4  ;;  %s71_s4 = sshll.u32 %s6052_s28, 4  ;;  %s41_s27 = int_to_ptr.vmem [resolvable:$true] %s40_s27  ;;  %s72_s4 = int_to_ptr.vmem [resolvable:$true] %s71_s4 }
  0x16   :  { %s5990_s29 = scalar_lea.vmem %s41_s27, 32  ;;  %p5995_p6 = scmp.lt.s32.totalorder %s41_s27, %s41_s27 }
  0x17   :  { %p5991_p5 = scmp.ne.s32.totalorder %s41_s27, %s5990_s29  ;;  %p5996_p7 = scmp.lt.s32.totalorder %s5990_s29, %s5990_s29 }
  0x19   :  { %p5997_p8 = por %p5996_p7, %p5995_p6 }
  0x1b   :  { %p5998_p9 = pnand %p5997_p8, %p5991_p5 }
  0x1d   :  { %6001 = shalt.err (!%p5998_p9)
}
  0x1e   :  { %s7514_s21 = sld [smem:[#allocation15_spill]]  ;;  %s6010_s1 = scalar_lea.vmem %s72_s4, 18432 }
  0x1f   :  { %p6011_p10 = scmp.ne.s32.totalorder %s72_s4, %s6010_s1  ;;  %p6015_p11 = scmp.lt.s32.totalorder %s72_s4, %s72_s4 }
  0x20   :  { %p6016_p12 = scmp.lt.s32.totalorder %s6010_s1, %s6010_s1 }
  0x22   :  { %p6017_p13 = por %p6016_p12, %p6015_p11 }
  0x24   :  { %43 = dma.hbm_to_vmem [thread:$0]  %s7514_s21, 32, %s41_s27, [#allocation3]  }
  0x25   :  { %p6018_p0 = pnand %p6017_p13, %p6011_p10 }
  0x27   :  { %6021 = shalt.err (!%p6018_p0)
}
  0x28   :  { %77 = dma.hbm_to_vmem [thread:$0]  %s7494_s10, 18432, %s72_s4, [#allocation6], %s6049_s24, %s6049_s24, %s6050_s2  }
  0x29   :  { %6042 = dma.done.wait [#allocation3], 32  }
  0x2a   :  { %6043 = vsyncadd [#allocation3], 4294967264 }
  0x2b   :  { %6044 = dma.done.wait [#allocation6], 36864  }
  0x2c   :  { %6045 = vsyncadd [#allocation6], 4294930432  ;;  %v6053_v0 = vmov 0.0   ;;  %vm6054_vm0 = vmmov 0   ;;  %vm163_vm1 = vcmask 1043456   ;;  %s7515_s10 = sld [smem:[#allocation16_spill]] }
  0x2d   :  { %4741 = vmatprep.subr.mxu0 %v6053_v0  ;;  %4751 = vmatprep.mubr.msk.f32.mxu0 %vm6054_vm0, %v6053_v0  ;;  %s7516_s21 = sld [smem:[#allocation12_spill]]  ;;  %vm123_vm2 = vcmask 293888   ;;  %v632_v46 = vld [vmem:[#allocation5 + $0xf8] sm:$0xff]  ;;  %v631_v55 = vld [vmem:[#allocation5 + $0xf0] sm:$0xff]  ;;  %v630_v60 = vld [vmem:[#allocation5 + $0xe8] sm:$0xff]  ;;  %vm310_vm3 = vcmask 1041408  }
  0x2e   :  { %4790 = vmatprep.subr.mxu1 %v6053_v0  ;;  %4816 = vmatprep.mubr.msk.f32.mxu1 %vm6054_vm0, %v6053_v0  ;;  %s7517_s28 = sld [smem:[#allocation13_spill]]  ;;  %vm414_vm4 = vcmask 801792   ;;  %vm2198_vm5 = vcmask 146432   ;;  %vm3723_vm6 = vcmask 31744   ;;  %vm3894_vm7 = vcmask 523264  }
  0x2f   :  { %s7518_s29 = sld [smem:[#allocation14_spill]]  ;;  %vm4057_vm8 = vcmask 9216  }
  0x32   :  { %v122_v1 = vld [vmem:[%s7515_s10 + $0x20] sm:$0xf]  ;;  %v121_v2 = vld [vmem:[%s7515_s10 + $0x18] sm:$0xff]  ;;  %v120_v3 = vld [vmem:[%s7515_s10 + $0x10] sm:$0xff] }
  0x33   :  { %4742 = vmatpush3.msk.msra.mxu0 %vm163_vm1, %v122_v1  ;;  %v119_v4 = vld [vmem:[%s7515_s10 + $0x8] sm:$0xff]  ;;  %v118_v5 = vld [vmem:[%s7515_s10] sm:$0xff]  ;;  %v107_v8 = vld [vmem:[%s7516_s21 + $0x10] sm:$0xff] }
  0x34   :  { %4743 = vmatprep.subr.mxu0 %v6053_v0  ;;  %v105_v6 = vld [vmem:[%s7516_s21] sm:$0xff]  ;;  %v106_v7 = vld [vmem:[%s7516_s21 + $0x8] sm:$0xff]  ;;  %v108_v9 = vld [vmem:[%s7516_s21 + $0x18] sm:$0xff] }
  0x35   :  { %4744 = vmatpush3.msra.mxu0 %v121_v2  ;;  %v109_v10 = vld [vmem:[%s7516_s21 + $0x20] sm:$0xff]  ;;  %v110_v11 = vld [vmem:[%s7516_s21 + $0x28] sm:$0xff]  ;;  %v111_v12 = vld [vmem:[%s7516_s21 + $0x30] sm:$0xff] }
  0x36   :  { %4745 = vmatprep.subr.mxu0 %v6053_v0  ;;  %v112_v13 = vld [vmem:[%s7516_s21 + $0x38] sm:$0xff]  ;;  %v113_v14 = vld [vmem:[%s7516_s21 + $0x40] sm:$0xff]  ;;  %v114_v15 = vld [vmem:[%s7516_s21 + $0x48] sm:$0xff] }
  0x37   :  { %4746 = vmatpush3.msra.mxu0 %v120_v3  ;;  %v115_v16 = vld [vmem:[%s7516_s21 + $0x50] sm:$0xff]  ;;  %v116_v17 = vld [vmem:[%s7516_s21 + $0x58] sm:$0xff]  ;;  %v117_v18 = vld [vmem:[%s7516_s21 + $0x60] sm:$0x3] }
  0x38   :  { %4747 = vmatprep.subr.mxu0 %v6053_v0 }
  0x39   :  { %4748 = vmatpush3.msra.mxu0 %v119_v4 }
  0x3a   :  { %4749 = vmatprep.subr.mxu0 %v6053_v0 }
  0x3b   :  { %4750 = vmatpush3.msra.mxu0 %v118_v5 }
  0x3c   :  { %4752 = vmatmul.mubr.msk.f32.vlgmr.msra.gmra.mxu0 %vm123_vm2, %v105_v6  ;;  %4860 = vmatprep.subr.mxu0 %v6053_v0  ;;  %v629_v6 = vld [vmem:[#allocation5 + $0xe0] sm:$0xff] }
  0x3d   :  { %4754 = vmatprep.mubr.msk.f32.mxu0 %vm6054_vm0, %v6053_v0  ;;  %4861 = vmatpush3.msra.mxu0 %v632_v46 }
  0x3e   :  { %4862 = vmatprep.subr.mxu0 %v6053_v0 }
  0x3f   :  { %4863 = vmatpush3.msra.mxu0 %v631_v55 }
  0x40   :  { %4755 = vmatmul.mubr.msk.f32.gmra.mxu0 %vm123_vm2, %v106_v7  ;;  %4864 = vmatprep.subr.mxu0 %v6053_v0 }
  0x41   :  { %4757 = vmatprep.mubr.msk.f32.mxu0 %vm6054_vm0, %v6053_v0  ;;  %4865 = vmatpush3.msra.mxu0 %v630_v60  ;;  %v298_v60 = vld [vmem:[%s7490_s6] sm:$0x1] }
  0x42   :  { %4866 = vmatprep.subr.mxu0 %v6053_v0 }
  0x43   :  { %4867 = vmatpush3.msra.mxu0 %v629_v6 }
  0x44   :  { %4758 = vmatmul.mubr.msk.f32.gmra.mxu0 %vm123_vm2, %v107_v8  ;;  %4868 = vmatprep.subr.mxu0 %v6053_v0 }
  0x45   :  { %4760 = vmatprep.mubr.msk.f32.mxu0 %vm6054_vm0, %v6053_v0 }
  0x48   :  { %4761 = vmatmul.mubr.msk.f32.gmra.mxu0 %vm123_vm2, %v108_v9 }
  0x49   :  { %4763 = vmatprep.mubr.msk.f32.mxu0 %vm6054_vm0, %v6053_v0 }
  0x4c   :  { %4764 = vmatmul.mubr.msk.f32.gmra.mxu0 %vm123_vm2, %v109_v10 }
  0x4d   :  { %4766 = vmatprep.mubr.msk.f32.mxu0 %vm6054_vm0, %v6053_v0 }
  0x50   :  { %4767 = vmatmul.mubr.msk.f32.gmra.mxu0 %vm123_vm2, %v110_v11  ;;  %v628_v11 = vld [vmem:[#allocation5 + $0xd8] sm:$0xff] }
  0x51   :  { %4769 = vmatprep.mubr.msk.f32.mxu0 %vm6054_vm0, %v6053_v0  ;;  %4869 = vmatpush3.msra.mxu0 %v628_v11 }
  0x52   :  { %4870 = vmatprep.subr.mxu0 %v6053_v0 }
  0x54   :  { %4770 = vmatmul.mubr.msk.f32.gmra.mxu0 %vm123_vm2, %v111_v12 }
  0x55   :  { %4772 = vmatprep.mubr.msk.f32.mxu0 %vm6054_vm0, %v6053_v0 }
  0x58   :  { %4773 = vmatmul.mubr.msk.f32.gmra.mxu0 %vm123_vm2, %v112_v13 }
  0x59   :  { %4775 = vmatprep.mubr.msk.f32.mxu0 %vm6054_vm0, %v6053_v0 }
  0x5c   :  { %4776 = vmatmul.mubr.msk.f32.gmra.mxu0 %vm123_vm2, %v113_v14 }
  0x5d   :  { %4778 = vmatprep.mubr.msk.f32.mxu0 %vm6054_vm0, %v6053_v0 }
  0x60   :  { %4779 = vmatmul.mubr.msk.f32.gmra.mxu0 %vm123_vm2, %v114_v15 }
  0x61   :  { %4781 = vmatprep.mubr.msk.f32.mxu0 %vm6054_vm0, %v6053_v0 }
  0x64   :  { %4782 = vmatmul.mubr.msk.f32.gmra.mxu0 %vm123_vm2, %v115_v16 }
  0x65   :  { %4784 = vmatprep.mubr.msk.f32.mxu0 %vm6054_vm0, %v6053_v0 }
  0x68   :  { %4785 = vmatmul.mubr.msk.f32.gmra.mxu0 %vm123_vm2, %v116_v17 }
  0x69   :  { %4787 = vmatprep.mubr.msk.f32.mxu0 %vm6054_vm0, %v6053_v0 }
  0x6c   :  { %4788 = vmatmul.mubr.msk.f32.gmra.mxu0 %vm123_vm2, %v117_v18 }
  0x6d   :  { %4892 = vmatprep.mubr.msk.f32.mxu0 %vm6054_vm0, %v6053_v0 }
  0xfc   :  { %v6275_v19 = vpop.f32.mrf.mxu0 }
  0xfd   :  { %v320_v34 = vmul.f32 %v6275_v19, %v6275_v19 }
  0xfe   :  { %v4753_v20 = vpop.f32.mrf.mxu0 }
 0x100   :  { %v6277_v21 = vpop.f32.mrf.mxu0 }
 0x101   :  { %v321_v32 = vmul.f32 %v6277_v21, %v6277_v21  ;;  %v299_v35 = vadd.f32 %v6277_v21, %v6275_v19 }
 0x102   :  { %v4756_v22 = vpop.f32.mrf.mxu0 }
 0x103   :  { %v333_v38 = vadd.f32 %v321_v32, %v320_v34 }
 0x104   :  { %v6279_v23 = vpop.f32.mrf.mxu0 }
 0x105   :  { %v322_v36 = vmul.f32 %v6279_v23, %v6279_v23  ;;  %v300_v39 = vadd.f32 %v299_v35, %v6279_v23 }
 0x106   :  { %v4759_v24 = vpop.f32.mrf.mxu0 }
 0x107   :  { %v334_v42 = vadd.f32 %v333_v38, %v322_v36  ;;  %v627_v24 = vld [vmem:[#allocation5 + $0xd0] sm:$0xff] }
 0x108   :  { %v6281_v25 = vpop.f32.mrf.mxu0  ;;  %4871 = vmatpush3.msra.mxu0 %v627_v24 }
 0x109   :  { %v323_v40 = vmul.f32 %v6281_v25, %v6281_v25  ;;  %v301_v43 = vadd.f32 %v300_v39, %v6281_v25  ;;  %4872 = vmatprep.subr.mxu0 %v6053_v0 }
 0x10a   :  { %v4762_v26 = vpop.f32.mrf.mxu0 }
 0x10b   :  { %v335_v47 = vadd.f32 %v334_v42, %v323_v40 }
 0x10c   :  { %v6283_v27 = vpop.f32.mrf.mxu0 }
 0x10d   :  { %v324_v44 = vmul.f32 %v6283_v27, %v6283_v27  ;;  %v302_v48 = vadd.f32 %v301_v43, %v6283_v27 }
 0x10e   :  { %v4765_v28 = vpop.f32.mrf.mxu0 }
 0x10f   :  { %v336_v51 = vadd.f32 %v335_v47, %v324_v44 }
 0x110   :  { %v6285_v29 = vpop.f32.mrf.mxu0 }
 0x111   :  { %v325_v49 = vmul.f32 %v6285_v29, %v6285_v29  ;;  %v303_v52 = vadd.f32 %v302_v48, %v6285_v29 }
 0x112   :  { %v4768_v30 = vpop.f32.mrf.mxu0 }
 0x113   :  { %v337_v56 = vadd.f32 %v336_v51, %v325_v49 }
 0x114   :  { %v6287_v31 = vpop.f32.mrf.mxu0 }
 0x115   :  { %v326_v53 = vmul.f32 %v6287_v31, %v6287_v31  ;;  %v304_v57 = vadd.f32 %v303_v52, %v6287_v31 }
 0x116   :  { %v4771_v33 = vpop.f32.mrf.mxu0 }
 0x117   :  { %v338_v61 = vadd.f32 %v337_v56, %v326_v53  ;;  %v361_v53 = vlaneseq  ;;  %v297_v56 = vld [vmem:[%s7489_s5] sm:$0x1] }
 0x118   :  { %v6297_v37 = vpop.f32.mrf.mxu0 }
 0x119   :  { %v327_v58 = vmul.f32 %v6297_v37, %v6297_v37  ;;  %v305_v62 = vadd.f32 %v304_v57, %v6297_v37  ;;  %v362_v55 = vshrl.u32 %v361_v53, 7  ;;  %v515_v53 = vld [vmem:[#allocation5 + $0x40] sm:$0xff] }
 0x11a   :  { %v4774_v41 = vpop.f32.mrf.mxu0 }
 0x11b   :  { %v339_v2 = vadd.f32 %v338_v61, %v327_v58  ;;  %v6341_v57 = vsub.s32 0, %v362_v55  ;;  %v514_v55 = vld [vmem:[#allocation5 + $0x38] sm:$0xff] }
 0x11c   :  { %v6305_v45 = vpop.f32.mrf.mxu0 }
 0x11d   :  { %v328_v63 = vmul.f32 %v6305_v45, %v6305_v45  ;;  %v306_v3 = vadd.f32 %v305_v62, %v6305_v45 }
 0x11e   :  { %v4777_v50 = vpop.f32.mrf.mxu0 }
 0x11f   :  { %v340_v7 = vadd.f32 %v339_v2, %v328_v63 }
 0x120   :  { %v6314_v54 = vpop.f32.mrf.mxu0 }
 0x121   :  { %v329_v4 = vmul.f32 %v6314_v54, %v6314_v54  ;;  %v307_v8 = vadd.f32 %v306_v3, %v6314_v54 }
 0x122   :  { %v4780_v59 = vpop.f32.mrf.mxu0 }
 0x123   :  { %v341_v12 = vadd.f32 %v340_v7, %v329_v4 }
 0x124   :  { %v6323_v1 = vpop.f32.mrf.mxu0 }
 0x125   :  { %v330_v9 = vmul.f32 %v6323_v1, %v6323_v1  ;;  %v308_v13 = vadd.f32 %v307_v8, %v6323_v1 }
 0x126   :  { %v4783_v5 = vpop.f32.mrf.mxu0 }
 0x127   :  { %v342_v16 = vadd.f32 %v341_v12, %v330_v9 }
 0x128   :  { %v288_v10 = vpop.f32.mrf.mxu0 }
 0x129   :  { %v331_v14 = vmul.f32 %v288_v10, %v288_v10  ;;  %v309_v17 = vadd.f32 %v308_v13, %v288_v10 }
 0x12a   :  { %v4786_v15 = vpop.f32.mrf.mxu0 }
 0x12b   :  { %v343_v26 = vadd.f32 %v342_v16, %v331_v14 }
 0x12c   :  { %v293_v18 = vpop.f32.mrf.mxu0 }
 0x12d   :  { %v311_v20 = vsel %vm310_vm3, %v293_v18, 0.0  ;;  %v332_v22 = vmul.f32 %v293_v18, %v293_v18 }
 0x12e   :  { %v312_v28 = vadd.f32 %v311_v20, %v309_v17  ;;  %v4789_v30 = vpop.f32.mrf.mxu0 }
 0x12f   :  { %v344_v32 = vsel %vm310_vm3, %v332_v22, 0.0 }
 0x130   :  { %v313_v33 = vrot.slane %v312_v28, 4  ;;  %v345_v34 = vadd.f32 %v344_v32, %v343_v26 }
 0x132   :  { %v314_v35 = vadd.f32 %v313_v33, %v312_v28  ;;  %v346_v36 = vrot.slane %v345_v34, 4 }
 0x134   :  { %v315_v38 = vrot.slane %v314_v35, 2  ;;  %v347_v39 = vadd.f32 %v346_v36, %v345_v34 }
 0x136   :  { %v316_v40 = vadd.f32 %v315_v38, %v314_v35  ;;  %v348_v41 = vrot.slane %v347_v39, 2 }
 0x138   :  { %v317_v42 = vrot.slane %v316_v40, 1  ;;  %v349_v43 = vadd.f32 %v348_v41, %v347_v39  ;;  %v413_v41 = vld [vmem:[%s7517_s28 + $0x10] sm:$0x3] }
 0x13a   :  { %v318_v44 = vadd.f32 %v317_v42, %v316_v40  ;;  %v350_v46 = vrot.slane %v349_v43, 1  ;;  %v412_v40 = vld [vmem:[%s7517_s28 + $0x8] sm:$0xff]  ;;  %v4093_v42 = vld [vmem:[%s7517_s28 + $0x18] sm:$0xff] }
 0x13c   :  { %v319_v47 = vmul.f32 0.010204081, %v318_v44  ;;  %v351_v48 = vadd.f32 %v350_v46, %v349_v43  ;;  %v522_v43 = vld [vmem:[#allocation5 + $0x78] sm:$0xff]  ;;  %v521_v44 = vld [vmem:[#allocation5 + $0x70] sm:$0xff] }
 0x13d   :  { %v4094_v46 = vld [vmem:[%s7517_s28 + $0x20] sm:$0xff] }
 0x13e   :  { %v352_v49 = vmul.f32 0.010204081, %v351_v48  ;;  %v353_v50 = vmul.f32 %v319_v47, %v319_v47  ;;  %v519_v48 = vld [vmem:[#allocation5 + $0x60] sm:$0xff] }
 0x140   :  { %v354_v51 = vsub.f32 %v352_v49, %v353_v50  ;;  %v4095_v49 = vld [vmem:[%s7517_s28 + $0x28] sm:$0x3]  ;;  %v518_v50 = vld [vmem:[#allocation5 + $0x58] sm:$0xff] }
 0x142   :  { %v355_v52 = vadd.f32 1e-05, %v354_v51  ;;  %v517_v51 = vld [vmem:[#allocation5 + $0x50] sm:$0xff] }
 0x144   :  { %5956 = vrsqrt.f32 %v355_v52  ;;  %v516_v52 = vld [vmem:[#allocation5 + $0x48] sm:$0xff] }
 0x151   :  { %v5957_v58 = vpop.eup %5956 }
 0x152   :  { %v357_v59 = vmul.f32 %v5957_v58, %v297_v56  ;;  %v513_v56 = vld [vmem:[#allocation5 + $0x30] sm:$0xff]  ;;  %v512_v58 = vld [vmem:[#allocation5 + $0x28] sm:$0xff] }
 0x154   :  { %v358_v61 = vmul.f32 %v357_v59, %v319_v47  ;;  %v364_v62 = vrot.slane %v357_v59, %v6341_v57  ;;  %v520_v47 = vld [vmem:[#allocation5 + $0x68] sm:$0xff]  ;;  %v511_v59 = vld [vmem:[#allocation5 + $0x20] sm:$0xff] }
 0x156   :  { %v359_v63 = vsub.f32 %v298_v60, %v358_v61  ;;  %v378_v2 = vmul.f32 %v364_v62, %v293_v18  ;;  %v377_v4 = vmul.f32 %v364_v62, %v288_v10  ;;  %v376_v7 = vmul.f32 %v364_v62, %v6323_v1  ;;  %v510_v60 = vld [vmem:[#allocation5 + $0x18] sm:$0xff]  ;;  %v509_v61 = vld [vmem:[#allocation5 + $0x10] sm:$0xff] }
 0x157   :  { %v375_v11 = vmul.f32 %v364_v62, %v6314_v54  ;;  %v374_v14 = vmul.f32 %v364_v62, %v6305_v45  ;;  %v373_v15 = vmul.f32 %v364_v62, %v6297_v37  ;;  %v372_v17 = vmul.f32 %v364_v62, %v6287_v31 }
 0x158   :  { %v383_v3 = vrot.slane %v359_v63, %v6341_v57  ;;  %v371_v20 = vmul.f32 %v364_v62, %v6285_v29  ;;  %v370_v24 = vmul.f32 %v364_v62, %v6283_v27  ;;  %v369_v28 = vmul.f32 %v364_v62, %v6281_v25  ;;  %v507_v63 = vld [vmem:[#allocation5] sm:$0xff] }
 0x159   :  { %v368_v32 = vmul.f32 %v364_v62, %v6279_v23  ;;  %v367_v34 = vmul.f32 %v364_v62, %v6277_v21  ;;  %v366_v36 = vmul.f32 %v364_v62, %v6275_v19  ;;  %v411_v19 = vld [vmem:[%s7517_s28] sm:$0xff]  ;;  %v508_v62 = vld [vmem:[#allocation5 + $0x8] sm:$0xff] }
 0x15a   :  { %v397_v5 = vadd.f32 %v383_v3, %v378_v2  ;;  %v396_v6 = vadd.f32 %v383_v3, %v377_v4  ;;  %v395_v9 = vadd.f32 %v383_v3, %v376_v7  ;;  %v394_v13 = vadd.f32 %v383_v3, %v375_v11  ;;  %v626_v2 = vld [vmem:[#allocation5 + $0xc8] sm:$0xff]  ;;  %v624_v4 = vld [vmem:[#allocation5 + $0xb8] sm:$0xff]  ;;  %v621_v7 = vld [vmem:[#allocation5 + $0xa0] sm:$0xff] }
 0x15b   :  { %v393_v1 = vadd.f32 %v383_v3, %v374_v14  ;;  %v392_v16 = vadd.f32 %v383_v3, %v373_v15  ;;  %v391_v18 = vadd.f32 %v383_v3, %v372_v17  ;;  %v390_v22 = vadd.f32 %v383_v3, %v371_v20  ;;  %4873 = vmatpush3.msra.mxu0 %v626_v2  ;;  %v619_v11 = vld [vmem:[#allocation5 + $0x90] sm:$0xff]  ;;  %v617_v14 = vld [vmem:[#allocation5 + $0x80] sm:$0xff] }
 0x15c   :  { %v6349_v8 = vmax.f32 %v397_v5, 0.0  ;;  %v6354_v12 = vmax.f32 %v396_v6, 0.0  ;;  %v6359_v10 = vmax.f32 %v395_v9, 0.0  ;;  %v6364_v54 = vmax.f32 %v394_v13, 0.0  ;;  %4874 = vmatprep.subr.mxu0 %v6053_v0  ;;  %v623_v5 = vld [vmem:[#allocation5 + $0xb0] sm:$0xff]  ;;  %v622_v6 = vld [vmem:[#allocation5 + $0xa8] sm:$0xff] }
 0x15d   :  { %v6369_v45 = vmax.f32 %v393_v1, 0.0  ;;  %v6374_v37 = vmax.f32 %v392_v16, 0.0  ;;  %v6379_v31 = vmax.f32 %v391_v18, 0.0  ;;  %v389_v26 = vadd.f32 %v383_v3, %v370_v24  ;;  %v620_v9 = vld [vmem:[#allocation5 + $0x98] sm:$0xff]  ;;  %v618_v13 = vld [vmem:[#allocation5 + $0x88] sm:$0xff]  ;;  %v1090_v2 = vld [vmem:[#allocation5 + $0x1d0] sm:$0xff] }
 0x15e   :  { %4791 = vmatpush3.msk.msra.mxu1 %vm310_vm3, %v6349_v8  ;;  %v6384_v29 = vmax.f32 %v390_v22, 0.0  ;;  %v388_v30 = vadd.f32 %v383_v3, %v369_v28  ;;  %v387_v33 = vadd.f32 %v383_v3, %v368_v32  ;;  %v386_v35 = vadd.f32 %v383_v3, %v367_v34  ;;  %v4101_v34 = vld [vmem:[%s7517_s28 + $0x38] sm:$0xff] }
 0x15f   :  { %4792 = vmatprep.subr.mxu1 %v6053_v0  ;;  %v6389_v27 = vmax.f32 %v389_v26, 0.0  ;;  %v385_v38 = vadd.f32 %v383_v3, %v366_v36  ;;  %v625_v3 = vld [vmem:[#allocation5 + $0xc0] sm:$0xff]  ;;  %v902_v36 = vld [vmem:[#allocation5 + $0x178] sm:$0xff] }
 0x160   :  { %4793 = vmatpush3.msra.mxu1 %v6354_v12  ;;  %v6394_v25 = vmax.f32 %v388_v30, 0.0  ;;  %v6399_v23 = vmax.f32 %v387_v33, 0.0  ;;  %v6403_v21 = vmax.f32 %v386_v35, 0.0  ;;  %4875 = vmatpush3.msra.mxu0 %v625_v3  ;;  %v4100_v33 = vld [vmem:[%s7517_s28 + $0x30] sm:$0xff]  ;;  %v4102_v35 = vld [vmem:[%s7517_s28 + $0x40] sm:$0x3] }
 0x161   :  { %4794 = vmatprep.subr.mxu1 %v6053_v0  ;;  %v6407_v39 = vmax.f32 %v385_v38, 0.0  ;;  %4876 = vmatprep.subr.mxu0 %v6053_v0  ;;  %v901_v38 = vld [vmem:[#allocation5 + $0x170] sm:$0xff]  ;;  %v1089_v3 = vld [vmem:[#allocation5 + $0x1c8] sm:$0xff] }
 0x162   :  { %4795 = vmatpush3.msra.mxu1 %v6359_v10  ;;  %4877 = vmatpush3.msra.mxu0 %v624_v4  ;;  %v1088_v4 = vld [vmem:[#allocation5 + $0x1c0] sm:$0xff] }
 0x163   :  { %4796 = vmatprep.subr.mxu1 %v6053_v0  ;;  %4878 = vmatprep.subr.mxu0 %v6053_v0 }
 0x164   :  { %4797 = vmatpush3.msra.mxu1 %v6364_v54  ;;  %4879 = vmatpush3.msra.mxu0 %v623_v5  ;;  %v1087_v5 = vld [vmem:[#allocation5 + $0x1b8] sm:$0xff] }
 0x165   :  { %4798 = vmatprep.subr.mxu1 %v6053_v0  ;;  %4880 = vmatprep.subr.mxu0 %v6053_v0 }
 0x166   :  { %4799 = vmatpush3.msra.mxu1 %v6369_v45  ;;  %4881 = vmatpush3.msra.mxu0 %v622_v6  ;;  %v1086_v6 = vld [vmem:[#allocation5 + $0x1b0] sm:$0xff] }
 0x167   :  { %4800 = vmatprep.subr.mxu1 %v6053_v0  ;;  %4882 = vmatprep.subr.mxu0 %v6053_v0 }
 0x168   :  { %4801 = vmatpush3.msra.mxu1 %v6374_v37  ;;  %4883 = vmatpush3.msra.mxu0 %v621_v7  ;;  %v1085_v7 = vld [vmem:[#allocation5 + $0x1a8] sm:$0xff] }
 0x169   :  { %4802 = vmatprep.subr.mxu1 %v6053_v0  ;;  %4884 = vmatprep.subr.mxu0 %v6053_v0 }
 0x16a   :  { %4803 = vmatpush3.msra.mxu1 %v6379_v31  ;;  %4885 = vmatpush3.msra.mxu0 %v620_v9  ;;  %v1084_v9 = vld [vmem:[#allocation5 + $0x1a0] sm:$0xff] }
 0x16b   :  { %4804 = vmatprep.subr.mxu1 %v6053_v0  ;;  %4886 = vmatprep.subr.mxu0 %v6053_v0 }
 0x16c   :  { %4805 = vmatpush3.msra.mxu1 %v6384_v29  ;;  %4887 = vmatpush3.msra.mxu0 %v619_v11  ;;  %v1083_v11 = vld [vmem:[#allocation5 + $0x198] sm:$0xff] }
 0x16d   :  { %4806 = vmatprep.subr.mxu1 %v6053_v0  ;;  %4888 = vmatprep.subr.mxu0 %v6053_v0 }
 0x16e   :  { %4807 = vmatpush3.msra.mxu1 %v6389_v27  ;;  %4889 = vmatpush3.msra.mxu0 %v618_v13  ;;  %v1082_v13 = vld [vmem:[#allocation5 + $0x190] sm:$0xff] }
 0x16f   :  { %4808 = vmatprep.subr.mxu1 %v6053_v0  ;;  %4890 = vmatprep.subr.mxu0 %v6053_v0 }
 0x170   :  { %4809 = vmatpush3.msra.mxu1 %v6394_v25  ;;  %4891 = vmatpush3.msra.mxu0 %v617_v14  ;;  %v1081_v14 = vld [vmem:[#allocation5 + $0x188] sm:$0xff] }
 0x171   :  { %4810 = vmatprep.subr.mxu1 %v6053_v0  ;;  %4942 = vmatprep.subr.mxu0 %v6053_v0 }
 0x172   :  { %4811 = vmatpush3.msra.mxu1 %v6399_v23 }
 0x173   :  { %4812 = vmatprep.subr.mxu1 %v6053_v0 }
 0x174   :  { %4813 = vmatpush3.msra.mxu1 %v6403_v21 }
 0x175   :  { %4814 = vmatprep.subr.mxu1 %v6053_v0 }
 0x176   :  { %4815 = vmatpush3.msra.mxu1 %v6407_v39 }
 0x177   :  { %4817 = vmatmul.mubr.msk.f32.vlgmr.msra.gmra.mxu1 %vm414_vm4, %v411_v19  ;;  %4825 = vmatprep.subr.mxu1 %v6053_v0  ;;  %v900_v19 = vld [vmem:[#allocation5 + $0x168] sm:$0xff] }
 0x178   :  { %4826 = vmatpush3.msk.msra.mxu1 %vm310_vm3, %v6349_v8  ;;  %4819 = vmatprep.mubr.msk.f32.mxu1 %vm6054_vm0, %v6053_v0 }
 0x179   :  { %4827 = vmatprep.subr.mxu1 %v6053_v0 }
 0x17a   :  { %4828 = vmatpush3.msra.mxu1 %v6354_v12 }
 0x17b   :  { %4829 = vmatprep.subr.mxu1 %v6053_v0  ;;  %4820 = vmatmul.mubr.msk.f32.gmra.mxu1 %vm414_vm4, %v412_v40  ;;  %v4107_v40 = vld [vmem:[%s7517_s28 + $0x48] sm:$0xff] }
 0x17c   :  { %4830 = vmatpush3.msra.mxu1 %v6359_v10  ;;  %4822 = vmatprep.mubr.msk.f32.mxu1 %vm6054_vm0, %v6053_v0 }
 0x17d   :  { %4831 = vmatprep.subr.mxu1 %v6053_v0 }
 0x17e   :  { %4832 = vmatpush3.msra.mxu1 %v6364_v54 }
 0x17f   :  { %4833 = vmatprep.subr.mxu1 %v6053_v0  ;;  %4823 = vmatmul.mubr.msk.f32.gmra.mxu1 %vm414_vm4, %v413_v41  ;;  %v4108_v41 = vld [vmem:[%s7517_s28 + $0x50] sm:$0xff] }
 0x180   :  { %4834 = vmatpush3.msra.mxu1 %v6369_v45  ;;  %4851 = vmatprep.mubr.msk.f32.mxu1 %vm6054_vm0, %v6053_v0 }
 0x181   :  { %4835 = vmatprep.subr.mxu1 %v6053_v0 }
 0x182   :  { %4836 = vmatpush3.msra.mxu1 %v6374_v37 }
 0x183   :  { %4837 = vmatprep.subr.mxu1 %v6053_v0 }
 0x184   :  { %4838 = vmatpush3.msra.mxu1 %v6379_v31 }
 0x185   :  { %4839 = vmatprep.subr.mxu1 %v6053_v0 }
 0x186   :  { %4840 = vmatpush3.msra.mxu1 %v6384_v29 }
 0x187   :  { %4841 = vmatprep.subr.mxu1 %v6053_v0 }
 0x188   :  { %4842 = vmatpush3.msra.mxu1 %v6389_v27 }
 0x189   :  { %4843 = vmatprep.subr.mxu1 %v6053_v0 }
 0x18a   :  { %4844 = vmatpush3.msra.mxu1 %v6394_v25 }
 0x18b   :  { %4845 = vmatprep.subr.mxu1 %v6053_v0 }
 0x18c   :  { %4846 = vmatpush3.msra.mxu1 %v6399_v23 }
 0x18d   :  { %4847 = vmatprep.subr.mxu1 %v6053_v0 }
 0x18e   :  { %4848 = vmatpush3.msra.mxu1 %v6403_v21 }
 0x18f   :  { %4849 = vmatprep.subr.mxu1 %v6053_v0 }
 0x190   :  { %4850 = vmatpush3.msra.mxu1 %v6407_v39 }
 0x191   :  { %4852 = vmatmul.mubr.msk.f32.vlgmr.msra.gmra.mxu1 %vm414_vm4, %v4093_v42  ;;  %4901 = vmatprep.subr.mxu1 %v6053_v0  ;;  %v4109_v42 = vld [vmem:[%s7517_s28 + $0x58] sm:$0x3] }
 0x192   :  { %4854 = vmatprep.mubr.msk.f32.mxu1 %vm6054_vm0, %v6053_v0  ;;  %4902 = vmatpush3.msra.mxu1 %v522_v43  ;;  %v899_v43 = vld [vmem:[#allocation5 + $0x160] sm:$0xff] }
 0x193   :  { %4903 = vmatprep.subr.mxu1 %v6053_v0 }
 0x194   :  { %4904 = vmatpush3.msra.mxu1 %v521_v44  ;;  %v898_v44 = vld [vmem:[#allocation5 + $0x158] sm:$0xff] }
 0x195   :  { %4855 = vmatmul.mubr.msk.f32.gmra.mxu1 %vm414_vm4, %v4094_v46  ;;  %4905 = vmatprep.subr.mxu1 %v6053_v0  ;;  %v897_v46 = vld [vmem:[#allocation5 + $0x150] sm:$0xff] }
 0x196   :  { %4857 = vmatprep.mubr.msk.f32.mxu1 %vm6054_vm0, %v6053_v0  ;;  %4906 = vmatpush3.msra.mxu1 %v520_v47  ;;  %v896_v47 = vld [vmem:[#allocation5 + $0x148] sm:$0xff] }
 0x197   :  { %4907 = vmatprep.subr.mxu1 %v6053_v0 }
 0x198   :  { %4908 = vmatpush3.msra.mxu1 %v519_v48  ;;  %v895_v48 = vld [vmem:[#allocation5 + $0x140] sm:$0xff] }
 0x199   :  { %4858 = vmatmul.mubr.msk.f32.gmra.mxu1 %vm414_vm4, %v4095_v49  ;;  %4909 = vmatprep.subr.mxu1 %v6053_v0  ;;  %v894_v49 = vld [vmem:[#allocation5 + $0x138] sm:$0xff] }
 0x19a   :  { %4910 = vmatpush3.msra.mxu1 %v518_v50  ;;  %4933 = vmatprep.mubr.msk.f32.mxu1 %vm6054_vm0, %v6053_v0  ;;  %v893_v50 = vld [vmem:[#allocation5 + $0x130] sm:$0xff] }
 0x19b   :  { %4911 = vmatprep.subr.mxu1 %v6053_v0 }
 0x19c   :  { %4912 = vmatpush3.msra.mxu1 %v517_v51  ;;  %v1095_v51 = vld [vmem:[#allocation5 + $0x1f8] sm:$0xff] }
 0x19d   :  { %4913 = vmatprep.subr.mxu1 %v6053_v0 }
 0x19e   :  { %4914 = vmatpush3.msra.mxu1 %v516_v52  ;;  %v1094_v52 = vld [vmem:[#allocation5 + $0x1f0] sm:$0xff] }
 0x19f   :  { %4915 = vmatprep.subr.mxu1 %v6053_v0 }
 0x1a0   :  { %4916 = vmatpush3.msra.mxu1 %v515_v53  ;;  %v892_v53 = vld [vmem:[#allocation5 + $0x128] sm:$0xff] }
 0x1a1   :  { %4917 = vmatprep.subr.mxu1 %v6053_v0 }
 0x1a2   :  { %4918 = vmatpush3.msra.mxu1 %v514_v55  ;;  %v1093_v55 = vld [vmem:[#allocation5 + $0x1e8] sm:$0xff] }
 0x1a3   :  { %4919 = vmatprep.subr.mxu1 %v6053_v0 }
 0x1a4   :  { %4920 = vmatpush3.msra.mxu1 %v513_v56  ;;  %v891_v56 = vld [vmem:[#allocation5 + $0x120] sm:$0xff] }
 0x1a5   :  { %4921 = vmatprep.subr.mxu1 %v6053_v0 }
 0x1a6   :  { %4922 = vmatpush3.msra.mxu1 %v512_v58  ;;  %v890_v58 = vld [vmem:[#allocation5 + $0x118] sm:$0xff] }
 0x1a7   :  { %4923 = vmatprep.subr.mxu1 %v6053_v0 }
 0x1a8   :  { %4924 = vmatpush3.msra.mxu1 %v511_v59  ;;  %v889_v59 = vld [vmem:[#allocation5 + $0x110] sm:$0xff] }
 0x1a9   :  { %4925 = vmatprep.subr.mxu1 %v6053_v0 }
 0x1aa   :  { %4926 = vmatpush3.msra.mxu1 %v510_v60  ;;  %v888_v60 = vld [vmem:[#allocation5 + $0x108] sm:$0xff] }
 0x1ab   :  { %4927 = vmatprep.subr.mxu1 %v6053_v0 }
 0x1ac   :  { %4928 = vmatpush3.msra.mxu1 %v509_v61  ;;  %v887_v61 = vld [vmem:[#allocation5 + $0x100] sm:$0xff] }
 0x1ad   :  { %4929 = vmatprep.subr.mxu1 %v6053_v0 }
 0x1ae   :  { %4930 = vmatpush3.msra.mxu1 %v508_v62  ;;  %v1092_v62 = vld [vmem:[#allocation5 + $0x1e0] sm:$0xff] }
 0x1af   :  { %4931 = vmatprep.subr.mxu1 %v6053_v0 }
 0x1b0   :  { %4932 = vmatpush3.msra.mxu1 %v507_v63  ;;  %v1091_v63 = vld [vmem:[#allocation5 + $0x1d8] sm:$0xff] }
 0x1b1   :  { %4977 = vmatprep.subr.mxu1 %v6053_v0 }
 0x237   :  { %v493_v1 = vpop.f32.mrf.mxu1 }
 0x238   :  { %4934 = vmatmul.mubr.f32.vlgmr.msra.gmra.mxu1 %v493_v1  ;;  %v1080_v1 = vld [vmem:[#allocation5 + $0x180] sm:$0xff] }
 0x239   :  { %v4818_v15 = vpop.f32.mrf.mxu1  ;;  %4936 = vmatprep.mubr.msk.f32.mxu1 %vm6054_vm0, %v6053_v0  ;;  %4978 = vmatpush3.msra.mxu1 %v902_v36 }
 0x23a   :  { %4979 = vmatprep.subr.mxu1 %v6053_v0 }
 0x23b   :  { %v498_v16 = vpop.f32.mrf.mxu1  ;;  %4980 = vmatpush3.msra.mxu1 %v901_v38 }
 0x23c   :  { %4937 = vmatmul.mubr.f32.gmra.mxu1 %v498_v16  ;;  %4981 = vmatprep.subr.mxu1 %v6053_v0 }
 0x23d   :  { %v4821_v17 = vpop.f32.mrf.mxu1  ;;  %4939 = vmatprep.mubr.msk.f32.mxu1 %vm6054_vm0, %v6053_v0  ;;  %4982 = vmatpush3.msra.mxu1 %v900_v19 }
 0x23e   :  { %4983 = vmatprep.subr.mxu1 %v6053_v0 }
 0x23f   :  { %v503_v18 = vpop.f32.mrf.mxu1  ;;  %4984 = vmatpush3.msra.mxu1 %v899_v43 }
 0x240   :  { %4940 = vmatmul.mubr.f32.gmra.mxu1 %v503_v18  ;;  %4985 = vmatprep.subr.mxu1 %v6053_v0 }
 0x241   :  { %v4824_v20 = vpop.f32.mrf.mxu1  ;;  %5009 = vmatprep.mubr.msk.f32.mxu1 %vm6054_vm0, %v6053_v0  ;;  %4986 = vmatpush3.msra.mxu1 %v898_v44  ;;  %v4114_v44 = vld [vmem:[%s7517_s28 + $0x60] sm:$0xff] }
 0x242   :  { %4987 = vmatprep.subr.mxu1 %v6053_v0 }
 0x243   :  { %4988 = vmatpush3.msra.mxu1 %v897_v46 }
 0x244   :  { %4989 = vmatprep.subr.mxu1 %v6053_v0 }
 0x245   :  { %4990 = vmatpush3.msra.mxu1 %v896_v47 }
 0x246   :  { %4991 = vmatprep.subr.mxu1 %v6053_v0 }
 0x247   :  { %4992 = vmatpush3.msra.mxu1 %v895_v48  ;;  %v4115_v48 = vld [vmem:[%s7517_s28 + $0x68] sm:$0xff] }
 0x248   :  { %4993 = vmatprep.subr.mxu1 %v6053_v0 }
 0x249   :  { %4994 = vmatpush3.msra.mxu1 %v894_v49 }
 0x24a   :  { %4995 = vmatprep.subr.mxu1 %v6053_v0 }
 0x24b   :  { %4996 = vmatpush3.msra.mxu1 %v893_v50  ;;  %v1288_v50 = vld [vmem:[#allocation5 + $0x278] sm:$0xff] }
 0x24c   :  { %4997 = vmatprep.subr.mxu1 %v6053_v0 }
 0x24d   :  { %4998 = vmatpush3.msra.mxu1 %v892_v53 }
 0x24e   :  { %4999 = vmatprep.subr.mxu1 %v6053_v0 }
 0x24f   :  { %5000 = vmatpush3.msra.mxu1 %v891_v56 }
 0x250   :  { %5001 = vmatprep.subr.mxu1 %v6053_v0 }
 0x251   :  { %v602_v22 = vpop.f32.mrf.mxu1  ;;  %5002 = vmatpush3.msra.mxu1 %v890_v58  ;;  %v1286_v58 = vld [vmem:[#allocation5 + $0x268] sm:$0xff] }
 0x252   :  { %4893 = vmatmul.mubr.f32.vlgmr.msra.gmra.mxu0 %v602_v22  ;;  %5003 = vmatprep.subr.mxu1 %v6053_v0 }
 0x253   :  { %4943 = vmatpush3.msk.msra.mxu0 %vm310_vm3, %v6349_v8  ;;  %v4853_v24 = vpop.f32.mrf.mxu1  ;;  %4895 = vmatprep.mubr.msk.f32.mxu0 %vm6054_vm0, %v6053_v0 }
 0x254   :  { %4944 = vmatprep.subr.mxu0 %v6053_v0  ;;  %5004 = vmatpush3.msra.mxu1 %v889_v59  ;;  %v4121_v59 = vld [vmem:[%s7517_s28 + $0x78] sm:$0xff] }
 0x255   :  { %4945 = vmatpush3.msra.mxu0 %v6354_v12  ;;  %v607_v26 = vpop.f32.mrf.mxu1  ;;  %5005 = vmatprep.subr.mxu1 %v6053_v0 }
 0x256   :  { %4946 = vmatprep.subr.mxu0 %v6053_v0  ;;  %4896 = vmatmul.mubr.f32.gmra.mxu0 %v607_v26 }
 0x257   :  { %4947 = vmatpush3.msra.mxu0 %v6359_v10  ;;  %v4856_v28 = vpop.f32.mrf.mxu1  ;;  %4898 = vmatprep.mubr.msk.f32.mxu0 %vm6054_vm0, %v6053_v0 }
 0x258   :  { %4948 = vmatprep.subr.mxu0 %v6053_v0  ;;  %5006 = vmatpush3.msra.mxu1 %v888_v60  ;;  %v4122_v60 = vld [vmem:[%s7517_s28 + $0x80] sm:$0xff] }
 0x259   :  { %4949 = vmatpush3.msra.mxu0 %v6364_v54  ;;  %v612_v30 = vpop.f32.mrf.mxu1  ;;  %5007 = vmatprep.subr.mxu1 %v6053_v0 }
 0x25a   :  { %4950 = vmatprep.subr.mxu0 %v6053_v0  ;;  %4899 = vmatmul.mubr.f32.gmra.mxu0 %v612_v30 }
 0x25b   :  { %4951 = vmatpush3.msra.mxu0 %v6369_v45  ;;  %v4859_v32 = vpop.f32.mrf.mxu1  ;;  %4968 = vmatprep.mubr.msk.f32.mxu0 %vm6054_vm0, %v6053_v0 }
 0x25c   :  { %4952 = vmatprep.subr.mxu0 %v6053_v0  ;;  %5008 = vmatpush3.msra.mxu1 %v887_v61  ;;  %v4123_v61 = vld [vmem:[%s7517_s28 + $0x88] sm:$0x3] }
 0x25d   :  { %4953 = vmatpush3.msra.mxu0 %v6374_v37  ;;  %5094 = vmatprep.subr.mxu1 %v6053_v0 }
 0x25e   :  { %4954 = vmatprep.subr.mxu0 %v6053_v0 }
 0x25f   :  { %4955 = vmatpush3.msra.mxu0 %v6379_v31 }
 0x260   :  { %4956 = vmatprep.subr.mxu0 %v6053_v0 }
 0x261   :  { %4957 = vmatpush3.msra.mxu0 %v6384_v29 }
 0x262   :  { %4958 = vmatprep.subr.mxu0 %v6053_v0 }
 0x263   :  { %4959 = vmatpush3.msra.mxu0 %v6389_v27 }
 0x264   :  { %4960 = vmatprep.subr.mxu0 %v6053_v0 }
 0x265   :  { %4961 = vmatpush3.msra.mxu0 %v6394_v25 }
 0x266   :  { %4962 = vmatprep.subr.mxu0 %v6053_v0 }
 0x267   :  { %4963 = vmatpush3.msra.mxu0 %v6399_v23 }
 0x268   :  { %4964 = vmatprep.subr.mxu0 %v6053_v0 }
 0x269   :  { %4965 = vmatpush3.msra.mxu0 %v6403_v21 }
 0x26a   :  { %4966 = vmatprep.subr.mxu0 %v6053_v0 }
 0x26b   :  { %4967 = vmatpush3.msra.mxu0 %v6407_v39 }
 0x26c   :  { %4969 = vmatmul.mubr.msk.f32.vlgmr.msra.gmra.mxu0 %vm414_vm4, %v4100_v33  ;;  %5018 = vmatprep.subr.mxu0 %v6053_v0 }
 0x26d   :  { %5019 = vmatpush3.msk.msra.mxu0 %vm310_vm3, %v6349_v8  ;;  %4971 = vmatprep.mubr.msk.f32.mxu0 %vm6054_vm0, %v6053_v0 }
 0x26e   :  { %5020 = vmatprep.subr.mxu0 %v6053_v0 }
 0x26f   :  { %5021 = vmatpush3.msra.mxu0 %v6354_v12 }
 0x270   :  { %4972 = vmatmul.mubr.msk.f32.gmra.mxu0 %vm414_vm4, %v4101_v34  ;;  %5022 = vmatprep.subr.mxu0 %v6053_v0 }
 0x271   :  { %5023 = vmatpush3.msra.mxu0 %v6359_v10  ;;  %4974 = vmatprep.mubr.msk.f32.mxu0 %vm6054_vm0, %v6053_v0 }
 0x272   :  { %5024 = vmatprep.subr.mxu0 %v6053_v0 }
 0x273   :  { %5025 = vmatpush3.msra.mxu0 %v6364_v54 }
 0x274   :  { %4975 = vmatmul.mubr.msk.f32.gmra.mxu0 %vm414_vm4, %v4102_v35  ;;  %5026 = vmatprep.subr.mxu0 %v6053_v0 }
 0x275   :  { %5027 = vmatpush3.msra.mxu0 %v6369_v45  ;;  %5044 = vmatprep.mubr.msk.f32.mxu0 %vm6054_vm0, %v6053_v0 }
 0x276   :  { %5028 = vmatprep.subr.mxu0 %v6053_v0 }
 0x277   :  { %5029 = vmatpush3.msra.mxu0 %v6374_v37 }
 0x278   :  { %5030 = vmatprep.subr.mxu0 %v6053_v0 }
 0x279   :  { %5031 = vmatpush3.msra.mxu0 %v6379_v31 }
 0x27a   :  { %5032 = vmatprep.subr.mxu0 %v6053_v0 }
 0x27b   :  { %5033 = vmatpush3.msra.mxu0 %v6384_v29 }
 0x27c   :  { %5034 = vmatprep.subr.mxu0 %v6053_v0 }
 0x27d   :  { %5035 = vmatpush3.msra.mxu0 %v6389_v27 }
 0x27e   :  { %5036 = vmatprep.subr.mxu0 %v6053_v0 }
 0x27f   :  { %5037 = vmatpush3.msra.mxu0 %v6394_v25 }
 0x280   :  { %5038 = vmatprep.subr.mxu0 %v6053_v0 }
 0x281   :  { %5039 = vmatpush3.msra.mxu0 %v6399_v23 }
 0x282   :  { %5040 = vmatprep.subr.mxu0 %v6053_v0 }
 0x283   :  { %5041 = vmatpush3.msra.mxu0 %v6403_v21 }
 0x284   :  { %5042 = vmatprep.subr.mxu0 %v6053_v0 }
 0x285   :  { %5043 = vmatpush3.msra.mxu0 %v6407_v39 }
 0x286   :  { %5045 = vmatmul.mubr.msk.f32.vlgmr.msra.gmra.mxu0 %vm414_vm4, %v4107_v40  ;;  %5053 = vmatprep.subr.mxu0 %v6053_v0 }
 0x287   :  { %5047 = vmatprep.mubr.msk.f32.mxu0 %vm6054_vm0, %v6053_v0  ;;  %5054 = vmatpush3.msra.mxu0 %v1095_v51 }
 0x288   :  { %5055 = vmatprep.subr.mxu0 %v6053_v0 }
 0x289   :  { %5056 = vmatpush3.msra.mxu0 %v1094_v52  ;;  %v4116_v52 = vld [vmem:[%s7517_s28 + $0x70] sm:$0x3] }
 0x28a   :  { %5048 = vmatmul.mubr.msk.f32.gmra.mxu0 %vm414_vm4, %v4108_v41  ;;  %5057 = vmatprep.subr.mxu0 %v6053_v0 }
 0x28b   :  { %5050 = vmatprep.mubr.msk.f32.mxu0 %vm6054_vm0, %v6053_v0  ;;  %5058 = vmatpush3.msra.mxu0 %v1093_v55  ;;  %v1287_v55 = vld [vmem:[#allocation5 + $0x270] sm:$0xff] }
 0x28c   :  { %5059 = vmatprep.subr.mxu0 %v6053_v0 }
 0x28d   :  { %5060 = vmatpush3.msra.mxu0 %v1092_v62  ;;  %v1285_v62 = vld [vmem:[#allocation5 + $0x260] sm:$0xff] }
 0x28e   :  { %5051 = vmatmul.mubr.msk.f32.gmra.mxu0 %vm414_vm4, %v4109_v42  ;;  %5061 = vmatprep.subr.mxu0 %v6053_v0 }
 0x28f   :  { %5085 = vmatprep.mubr.msk.f32.mxu0 %vm6054_vm0, %v6053_v0  ;;  %5062 = vmatpush3.msra.mxu0 %v1091_v63  ;;  %v1284_v63 = vld [vmem:[#allocation5 + $0x258] sm:$0xff] }
 0x290   :  { %5063 = vmatprep.subr.mxu0 %v6053_v0 }
 0x291   :  { %5064 = vmatpush3.msra.mxu0 %v1090_v2  ;;  %v1283_v2 = vld [vmem:[#allocation5 + $0x250] sm:$0xff] }
 0x292   :  { %5065 = vmatprep.subr.mxu0 %v6053_v0 }
 0x293   :  { %5066 = vmatpush3.msra.mxu0 %v1089_v3  ;;  %v1282_v3 = vld [vmem:[#allocation5 + $0x248] sm:$0xff] }
 0x294   :  { %5067 = vmatprep.subr.mxu0 %v6053_v0 }
 0x295   :  { %5068 = vmatpush3.msra.mxu0 %v1088_v4  ;;  %v1281_v4 = vld [vmem:[#allocation5 + $0x240] sm:$0xff] }
 0x296   :  { %5069 = vmatprep.subr.mxu0 %v6053_v0 }
 0x297   :  { %5070 = vmatpush3.msra.mxu0 %v1087_v5  ;;  %v1280_v5 = vld [vmem:[#allocation5 + $0x238] sm:$0xff] }
 0x298   :  { %5071 = vmatprep.subr.mxu0 %v6053_v0 }
 0x299   :  { %5072 = vmatpush3.msra.mxu0 %v1086_v6  ;;  %v1279_v6 = vld [vmem:[#allocation5 + $0x230] sm:$0xff] }
 0x29a   :  { %5073 = vmatprep.subr.mxu0 %v6053_v0 }
 0x29b   :  { %5074 = vmatpush3.msra.mxu0 %v1085_v7  ;;  %v1481_v7 = vld [vmem:[#allocation5 + $0x2f8] sm:$0xff] }
 0x29c   :  { %5075 = vmatprep.subr.mxu0 %v6053_v0 }
 0x29d   :  { %5076 = vmatpush3.msra.mxu0 %v1084_v9  ;;  %v1480_v9 = vld [vmem:[#allocation5 + $0x2f0] sm:$0xff] }
 0x29e   :  { %5077 = vmatprep.subr.mxu0 %v6053_v0 }
 0x29f   :  { %5078 = vmatpush3.msra.mxu0 %v1083_v11  ;;  %v1278_v11 = vld [vmem:[#allocation5 + $0x228] sm:$0xff] }
 0x2a0   :  { %5079 = vmatprep.subr.mxu0 %v6053_v0 }
 0x2a1   :  { %5080 = vmatpush3.msra.mxu0 %v1082_v13  ;;  %v1479_v13 = vld [vmem:[#allocation5 + $0x2e8] sm:$0xff] }
 0x2a2   :  { %5081 = vmatprep.subr.mxu0 %v6053_v0 }
 0x2a3   :  { %5082 = vmatpush3.msra.mxu0 %v1081_v14  ;;  %v1277_v14 = vld [vmem:[#allocation5 + $0x220] sm:$0xff] }
 0x2a4   :  { %5083 = vmatprep.subr.mxu0 %v6053_v0 }
 0x2a5   :  { %5084 = vmatpush3.msra.mxu0 %v1080_v1  ;;  %v1276_v1 = vld [vmem:[#allocation5 + $0x218] sm:$0xff] }
 0x2a6   :  { %5170 = vmatprep.subr.mxu0 %v6053_v0 }
 0x2f8   :  { %v779_v15 = vpop.f32.mrf.mxu1 }
 0x2fa   :  { %v4935_v16 = vpop.f32.mrf.mxu1 }
 0x2fb   :  { %v1274_v16 = vld [vmem:[#allocation5 + $0x208] sm:$0xff] }
 0x2fc   :  { %v784_v17 = vpop.f32.mrf.mxu1 }
 0x2fe   :  { %v4938_v18 = vpop.f32.mrf.mxu1 }
 0x2ff   :  { %v1478_v18 = vld [vmem:[#allocation5 + $0x2e0] sm:$0xff] }
 0x300   :  { %v789_v20 = vpop.f32.mrf.mxu1 }
 0x302   :  { %v4941_v22 = vpop.f32.mrf.mxu1 }
 0x303   :  { %v1476_v22 = vld [vmem:[#allocation5 + $0x2d0] sm:$0xff] }
 0x312   :  { %v699_v24 = vpop.f32.mrf.mxu0 }
 0x313   :  { %v6635_v26 = vadd.f32 %v779_v15, %v699_v24  ;;  %v1275_v15 = vld [vmem:[#allocation5 + $0x210] sm:$0xff]  ;;  %v1475_v24 = vld [vmem:[#allocation5 + $0x2c8] sm:$0xff] }
 0x314   :  { %v4894_v28 = vpop.f32.mrf.mxu0 }
 0x315   :  { %v1474_v28 = vld [vmem:[#allocation5 + $0x2c0] sm:$0xff] }
 0x316   :  { %v704_v30 = vpop.f32.mrf.mxu0 }
 0x317   :  { %v6637_v32 = vadd.f32 %v784_v17, %v704_v30  ;;  %v1273_v17 = vld [vmem:[#allocation5 + $0x200] sm:$0xff]  ;;  %v1473_v30 = vld [vmem:[#allocation5 + $0x2b8] sm:$0xff] }
 0x318   :  { %v4897_v33 = vpop.f32.mrf.mxu0 }
 0x319   :  { %v1472_v33 = vld [vmem:[#allocation5 + $0x2b0] sm:$0xff] }
 0x31a   :  { %v709_v34 = vpop.f32.mrf.mxu0 }
 0x31b   :  { %v6639_v35 = vadd.f32 %v789_v20, %v709_v34  ;;  %v1477_v20 = vld [vmem:[#allocation5 + $0x2d8] sm:$0xff]  ;;  %v1471_v34 = vld [vmem:[#allocation5 + $0x2a8] sm:$0xff] }
 0x31c   :  { %v4900_v36 = vpop.f32.mrf.mxu0 }
 0x31d   :  { %v1470_v36 = vld [vmem:[#allocation5 + $0x2a0] sm:$0xff] }
 0x32c   :  { %v872_v38 = vpop.f32.mrf.mxu0 }
 0x32d   :  { %5010 = vmatmul.mubr.f32.vlgmr.msra.gmra.mxu1 %v872_v38  ;;  %v1469_v38 = vld [vmem:[#allocation5 + $0x298] sm:$0xff] }
 0x32e   :  { %5095 = vmatpush3.msk.msra.mxu1 %vm310_vm3, %v6349_v8  ;;  %v4970_v19 = vpop.f32.mrf.mxu0  ;;  %5012 = vmatprep.mubr.msk.f32.mxu1 %vm6054_vm0, %v6053_v0 }
 0x32f   :  { %5096 = vmatprep.subr.mxu1 %v6053_v0  ;;  %v1468_v19 = vld [vmem:[#allocation5 + $0x290] sm:$0xff] }
 0x330   :  { %5097 = vmatpush3.msra.mxu1 %v6354_v12  ;;  %v877_v40 = vpop.f32.mrf.mxu0 }
 0x331   :  { %5098 = vmatprep.subr.mxu1 %v6053_v0  ;;  %5013 = vmatmul.mubr.f32.gmra.mxu1 %v877_v40  ;;  %v1467_v40 = vld [vmem:[#allocation5 + $0x288] sm:$0xff] }
 0x332   :  { %5099 = vmatpush3.msra.mxu1 %v6359_v10  ;;  %v4973_v41 = vpop.f32.mrf.mxu0  ;;  %5015 = vmatprep.mubr.msk.f32.mxu1 %vm6054_vm0, %v6053_v0 }
 0x333   :  { %5100 = vmatprep.subr.mxu1 %v6053_v0  ;;  %v1466_v41 = vld [vmem:[#allocation5 + $0x280] sm:$0xff] }
 0x334   :  { %5101 = vmatpush3.msra.mxu1 %v6364_v54  ;;  %v882_v42 = vpop.f32.mrf.mxu0 }
 0x335   :  { %5102 = vmatprep.subr.mxu1 %v6053_v0  ;;  %5016 = vmatmul.mubr.f32.gmra.mxu1 %v882_v42 }
 0x336   :  { %5103 = vmatpush3.msra.mxu1 %v6369_v45  ;;  %v4976_v43 = vpop.f32.mrf.mxu0  ;;  %5120 = vmatprep.mubr.msk.f32.mxu1 %vm6054_vm0, %v6053_v0 }
 0x337   :  { %5104 = vmatprep.subr.mxu1 %v6053_v0 }
 0x338   :  { %5105 = vmatpush3.msra.mxu1 %v6374_v37 }
 0x339   :  { %5106 = vmatprep.subr.mxu1 %v6053_v0 }
 0x33a   :  { %5107 = vmatpush3.msra.mxu1 %v6379_v31 }
 0x33b   :  { %5108 = vmatprep.subr.mxu1 %v6053_v0 }
 0x33c   :  { %5109 = vmatpush3.msra.mxu1 %v6384_v29 }
 0x33d   :  { %5110 = vmatprep.subr.mxu1 %v6053_v0 }
 0x33e   :  { %5111 = vmatpush3.msra.mxu1 %v6389_v27 }
 0x33f   :  { %5112 = vmatprep.subr.mxu1 %v6053_v0 }
 0x340   :  { %5113 = vmatpush3.msra.mxu1 %v6394_v25 }
 0x341   :  { %5114 = vmatprep.subr.mxu1 %v6053_v0 }
 0x342   :  { %5115 = vmatpush3.msra.mxu1 %v6399_v23 }
 0x343   :  { %5116 = vmatprep.subr.mxu1 %v6053_v0 }
 0x344   :  { %5117 = vmatpush3.msra.mxu1 %v6403_v21 }
 0x345   :  { %5118 = vmatprep.subr.mxu1 %v6053_v0 }
 0x346   :  { %5119 = vmatpush3.msra.mxu1 %v6407_v39  ;;  %v1065_v46 = vpop.f32.mrf.mxu0 }
 0x347   :  { %5121 = vmatmul.mubr.msk.f32.vlgmr.msra.gmra.mxu1 %vm414_vm4, %v4114_v44  ;;  %5086 = vmatmul.mubr.f32.vlgmr.msra.gmra.mxu0 %v1065_v46 }
 0x348   :  { %5171 = vmatpush3.msk.msra.mxu0 %vm310_vm3, %v6349_v8  ;;  %v5046_v47 = vpop.f32.mrf.mxu0  ;;  %5123 = vmatprep.mubr.msk.f32.mxu1 %vm6054_vm0, %v6053_v0 }
 0x349   :  { %5172 = vmatprep.subr.mxu0 %v6053_v0  ;;  %5088 = vmatprep.mubr.msk.f32.mxu0 %vm6054_vm0, %v6053_v0 }
 0x34a   :  { %5173 = vmatpush3.msra.mxu0 %v6354_v12  ;;  %v1070_v49 = vpop.f32.mrf.mxu0  ;;  %5129 = vmatprep.subr.mxu1 %v6053_v0 }
 0x34b   :  { %5124 = vmatmul.mubr.msk.f32.gmra.mxu1 %vm414_vm4, %v4115_v48  ;;  %5174 = vmatprep.subr.mxu0 %v6053_v0 }
 0x34c   :  { %5089 = vmatmul.mubr.f32.gmra.mxu0 %v1070_v49  ;;  %v5049_v51 = vpop.f32.mrf.mxu0  ;;  %5126 = vmatprep.mubr.msk.f32.mxu1 %vm6054_vm0, %v6053_v0 }
 0x34d   :  { %5175 = vmatpush3.msra.mxu0 %v6359_v10  ;;  %5091 = vmatprep.mubr.msk.f32.mxu0 %vm6054_vm0, %v6053_v0 }
 0x34e   :  { %5176 = vmatprep.subr.mxu0 %v6053_v0  ;;  %v1075_v53 = vpop.f32.mrf.mxu0  ;;  %5130 = vmatpush3.msra.mxu1 %v1288_v50 }
 0x34f   :  { %5177 = vmatpush3.msra.mxu0 %v6364_v54  ;;  %5127 = vmatmul.mubr.msk.f32.gmra.mxu1 %vm414_vm4, %v4116_v52 }
 0x350   :  { %5178 = vmatprep.subr.mxu0 %v6053_v0  ;;  %5092 = vmatmul.mubr.f32.gmra.mxu0 %v1075_v53  ;;  %v5052_v56 = vpop.f32.mrf.mxu0 }
 0x351   :  { %5179 = vmatpush3.msra.mxu0 %v6369_v45  ;;  %5196 = vmatprep.mubr.msk.f32.mxu0 %vm6054_vm0, %v6053_v0 }
 0x352   :  { %5180 = vmatprep.subr.mxu0 %v6053_v0  ;;  %5131 = vmatprep.subr.mxu1 %v6053_v0 }
 0x353   :  { %5181 = vmatpush3.msra.mxu0 %v6374_v37  ;;  %5132 = vmatpush3.msra.mxu1 %v1287_v55 }
 0x354   :  { %5182 = vmatprep.subr.mxu0 %v6053_v0  ;;  %5133 = vmatprep.subr.mxu1 %v6053_v0 }
 0x355   :  { %5183 = vmatpush3.msra.mxu0 %v6379_v31  ;;  %5134 = vmatpush3.msra.mxu1 %v1286_v58 }
 0x356   :  { %5184 = vmatprep.subr.mxu0 %v6053_v0  ;;  %5135 = vmatprep.subr.mxu1 %v6053_v0 }
 0x357   :  { %5185 = vmatpush3.msra.mxu0 %v6384_v29  ;;  %5161 = vmatprep.mubr.msk.f32.mxu1 %vm6054_vm0, %v6053_v0 }
 0x358   :  { %5186 = vmatprep.subr.mxu0 %v6053_v0  ;;  %5136 = vmatpush3.msra.mxu1 %v1285_v62 }
 0x359   :  { %5187 = vmatpush3.msra.mxu0 %v6389_v27  ;;  %5137 = vmatprep.subr.mxu1 %v6053_v0 }
 0x35a   :  { %5188 = vmatprep.subr.mxu0 %v6053_v0  ;;  %5138 = vmatpush3.msra.mxu1 %v1284_v63 }
 0x35b   :  { %5189 = vmatpush3.msra.mxu0 %v6394_v25  ;;  %5139 = vmatprep.subr.mxu1 %v6053_v0 }
 0x35c   :  { %5190 = vmatprep.subr.mxu0 %v6053_v0  ;;  %5140 = vmatpush3.msra.mxu1 %v1283_v2 }
 0x35d   :  { %5191 = vmatpush3.msra.mxu0 %v6399_v23  ;;  %5141 = vmatprep.subr.mxu1 %v6053_v0 }
 0x35e   :  { %5192 = vmatprep.subr.mxu0 %v6053_v0  ;;  %5142 = vmatpush3.msra.mxu1 %v1282_v3 }
 0x35f   :  { %5193 = vmatpush3.msra.mxu0 %v6403_v21  ;;  %5143 = vmatprep.subr.mxu1 %v6053_v0 }
 0x360   :  { %5194 = vmatprep.subr.mxu0 %v6053_v0  ;;  %5144 = vmatpush3.msra.mxu1 %v1281_v4  ;;  %v4128_v4 = vld [vmem:[%s7517_s28 + $0x90] sm:$0xff] }
 0x361   :  { %5195 = vmatpush3.msra.mxu0 %v6407_v39  ;;  %5145 = vmatprep.subr.mxu1 %v6053_v0 }
 0x362   :  { %5197 = vmatmul.mubr.msk.f32.vlgmr.msra.gmra.mxu0 %vm414_vm4, %v4121_v59  ;;  %5205 = vmatprep.subr.mxu0 %v6053_v0 }
 0x363   :  { %5199 = vmatprep.mubr.msk.f32.mxu0 %vm6054_vm0, %v6053_v0  ;;  %5146 = vmatpush3.msra.mxu1 %v1280_v5 }
 0x364   :  { %5206 = vmatpush3.msra.mxu0 %v1481_v7  ;;  %5147 = vmatprep.subr.mxu1 %v6053_v0  ;;  %v4129_v7 = vld [vmem:[%s7517_s28 + $0x98] sm:$0xff] }
 0x365   :  { %5207 = vmatprep.subr.mxu0 %v6053_v0  ;;  %5148 = vmatpush3.msra.mxu1 %v1279_v6  ;;  %v1674_v6 = vld [vmem:[#allocation5 + $0x378] sm:$0xff] }
 0x366   :  { %5200 = vmatmul.mubr.msk.f32.gmra.mxu0 %vm414_vm4, %v4122_v60  ;;  %5149 = vmatprep.subr.mxu1 %v6053_v0 }
 0x367   :  { %5202 = vmatprep.mubr.msk.f32.mxu0 %vm6054_vm0, %v6053_v0  ;;  %5208 = vmatpush3.msra.mxu0 %v1480_v9 }
 0x368   :  { %5209 = vmatprep.subr.mxu0 %v6053_v0  ;;  %5150 = vmatpush3.msra.mxu1 %v1278_v11 }
 0x369   :  { %5210 = vmatpush3.msra.mxu0 %v1479_v13  ;;  %5151 = vmatprep.subr.mxu1 %v6053_v0  ;;  %v4130_v13 = vld [vmem:[%s7517_s28 + $0xa0] sm:$0x3] }
 0x36a   :  { %5203 = vmatmul.mubr.msk.f32.gmra.mxu0 %vm414_vm4, %v4123_v61  ;;  %5211 = vmatprep.subr.mxu0 %v6053_v0 }
 0x36b   :  { %5237 = vmatprep.mubr.msk.f32.mxu0 %vm6054_vm0, %v6053_v0  ;;  %5152 = vmatpush3.msra.mxu1 %v1277_v14 }
 0x36c   :  { %5153 = vmatprep.subr.mxu1 %v6053_v0  ;;  %5212 = vmatpush3.msra.mxu0 %v1478_v18  ;;  %v4135_v18 = vld [vmem:[%s7517_s28 + $0xa8] sm:$0xff] }
 0x36d   :  { %5154 = vmatpush3.msra.mxu1 %v1276_v1  ;;  %5213 = vmatprep.subr.mxu0 %v6053_v0 }
 0x36e   :  { %5155 = vmatprep.subr.mxu1 %v6053_v0  ;;  %5214 = vmatpush3.msra.mxu0 %v1477_v20  ;;  %v4136_v20 = vld [vmem:[%s7517_s28 + $0xb0] sm:$0xff] }
 0x36f   :  { %5156 = vmatpush3.msra.mxu1 %v1275_v15  ;;  %5215 = vmatprep.subr.mxu0 %v6053_v0  ;;  %v1673_v15 = vld [vmem:[#allocation5 + $0x370] sm:$0xff] }
 0x370   :  { %5157 = vmatprep.subr.mxu1 %v6053_v0  ;;  %5216 = vmatpush3.msra.mxu0 %v1476_v22  ;;  %v4137_v22 = vld [vmem:[%s7517_s28 + $0xb8] sm:$0x3] }
 0x371   :  { %5158 = vmatpush3.msra.mxu1 %v1274_v16  ;;  %5217 = vmatprep.subr.mxu0 %v6053_v0 }
 0x372   :  { %5159 = vmatprep.subr.mxu1 %v6053_v0  ;;  %5218 = vmatpush3.msra.mxu0 %v1475_v24  ;;  %v1671_v24 = vld [vmem:[#allocation5 + $0x360] sm:$0xff] }
 0x373   :  { %5160 = vmatpush3.msra.mxu1 %v1273_v17  ;;  %5219 = vmatprep.subr.mxu0 %v6053_v0  ;;  %v1672_v17 = vld [vmem:[#allocation5 + $0x368] sm:$0xff] }
 0x374   :  { %5246 = vmatprep.subr.mxu1 %v6053_v0  ;;  %5220 = vmatpush3.msra.mxu0 %v1474_v28  ;;  %v1670_v28 = vld [vmem:[#allocation5 + $0x358] sm:$0xff] }
 0x375   :  { %5221 = vmatprep.subr.mxu0 %v6053_v0 }
 0x376   :  { %5222 = vmatpush3.msra.mxu0 %v1473_v30  ;;  %v1669_v30 = vld [vmem:[#allocation5 + $0x350] sm:$0xff] }
 0x377   :  { %5223 = vmatprep.subr.mxu0 %v6053_v0 }
 0x378   :  { %5224 = vmatpush3.msra.mxu0 %v1472_v33  ;;  %v1668_v33 = vld [vmem:[#allocation5 + $0x348] sm:$0xff] }
 0x379   :  { %5225 = vmatprep.subr.mxu0 %v6053_v0 }
 0x37a   :  { %5226 = vmatpush3.msra.mxu0 %v1471_v34  ;;  %v1667_v34 = vld [vmem:[#allocation5 + $0x340] sm:$0xff] }
 0x37b   :  { %5227 = vmatprep.subr.mxu0 %v6053_v0 }
 0x37c   :  { %5228 = vmatpush3.msra.mxu0 %v1470_v36  ;;  %v1666_v36 = vld [vmem:[#allocation5 + $0x338] sm:$0xff] }
 0x37d   :  { %5229 = vmatprep.subr.mxu0 %v6053_v0 }
 0x37e   :  { %5230 = vmatpush3.msra.mxu0 %v1469_v38  ;;  %v1665_v38 = vld [vmem:[#allocation5 + $0x330] sm:$0xff] }
 0x37f   :  { %5231 = vmatprep.subr.mxu0 %v6053_v0 }
 0x380   :  { %5232 = vmatpush3.msra.mxu0 %v1468_v19  ;;  %v1867_v19 = vld [vmem:[#allocation5 + $0x3f8] sm:$0xff] }
 0x381   :  { %5233 = vmatprep.subr.mxu0 %v6053_v0 }
 0x382   :  { %5234 = vmatpush3.msra.mxu0 %v1467_v40  ;;  %v1866_v40 = vld [vmem:[#allocation5 + $0x3f0] sm:$0xff] }
 0x383   :  { %5235 = vmatprep.subr.mxu0 %v6053_v0 }
 0x384   :  { %5236 = vmatpush3.msra.mxu0 %v1466_v41  ;;  %v1664_v41 = vld [vmem:[#allocation5 + $0x328] sm:$0xff] }
 0x385   :  { %5322 = vmatprep.subr.mxu0 %v6053_v0 }
 0x3ed   :  { %v969_v42 = vpop.f32.mrf.mxu1 }
 0x3ee   :  { %v983_v43 = vadd.f32 %v969_v42, %v6635_v26  ;;  %v1663_v42 = vld [vmem:[#allocation5 + $0x320] sm:$0xff] }
 0x3ef   :  { %v5011_v44 = vpop.f32.mrf.mxu1 }
 0x3f0   :  { %v1661_v44 = vld [vmem:[#allocation5 + $0x310] sm:$0xff] }
 0x3f1   :  { %v974_v46 = vpop.f32.mrf.mxu1 }
 0x3f2   :  { %v984_v47 = vadd.f32 %v974_v46, %v6637_v32  ;;  %v1660_v46 = vld [vmem:[#allocation5 + $0x308] sm:$0xff] }
 0x3f3   :  { %v5014_v48 = vpop.f32.mrf.mxu1 }
 0x3f4   :  { %v1865_v48 = vld [vmem:[#allocation5 + $0x3e8] sm:$0xff] }
 0x3f5   :  { %v979_v49 = vpop.f32.mrf.mxu1 }
 0x3f6   :  { %v985_v50 = vadd.f32 %v979_v49, %v6639_v35  ;;  %v1864_v49 = vld [vmem:[#allocation5 + $0x3e0] sm:$0xff] }
 0x3f7   :  { %v5017_v51 = vpop.f32.mrf.mxu1 }
 0x3f8   :  { %v1862_v51 = vld [vmem:[#allocation5 + $0x3d0] sm:$0xff] }
 0x407   :  { %v1258_v52 = vpop.f32.mrf.mxu1  ;;  %v1162_v53 = vpop.f32.mrf.mxu0 }
 0x408   :  { %v6778_v55 = vadd.f32 %v1162_v53, %v983_v43  ;;  %5162 = vmatmul.mubr.f32.vlgmr.msra.gmra.mxu1 %v1258_v52  ;;  %v1662_v43 = vld [vmem:[#allocation5 + $0x318] sm:$0xff]  ;;  %v1861_v52 = vld [vmem:[#allocation5 + $0x3c8] sm:$0xff]  ;;  %v1860_v53 = vld [vmem:[#allocation5 + $0x3c0] sm:$0xff] }
 0x409   :  { %5247 = vmatpush3.msk.msra.mxu1 %vm310_vm3, %v6349_v8  ;;  %v5122_v56 = vpop.f32.mrf.mxu1  ;;  %v5087_v58 = vpop.f32.mrf.mxu0  ;;  %5164 = vmatprep.mubr.msk.f32.mxu1 %vm6054_vm0, %v6053_v0 }
 0x40a   :  { %5248 = vmatprep.subr.mxu1 %v6053_v0  ;;  %v1859_v56 = vld [vmem:[#allocation5 + $0x3b8] sm:$0xff]  ;;  %v1858_v58 = vld [vmem:[#allocation5 + $0x3b0] sm:$0xff] }
 0x40b   :  { %5249 = vmatpush3.msra.mxu1 %v6354_v12  ;;  %v1263_v26 = vpop.f32.mrf.mxu1 }
 0x40c   :  { %5250 = vmatprep.subr.mxu1 %v6053_v0  ;;  %v1167_v32 = vpop.f32.mrf.mxu0  ;;  %5165 = vmatmul.mubr.f32.gmra.mxu1 %v1263_v26  ;;  %v1857_v26 = vld [vmem:[#allocation5 + $0x3a8] sm:$0xff] }
 0x40d   :  { %v6787_v35 = vadd.f32 %v1167_v32, %v984_v47  ;;  %5251 = vmatpush3.msra.mxu1 %v6359_v10  ;;  %v5125_v59 = vpop.f32.mrf.mxu1  ;;  %5167 = vmatprep.mubr.msk.f32.mxu1 %vm6054_vm0, %v6053_v0  ;;  %v1659_v47 = vld [vmem:[#allocation5 + $0x300] sm:$0xff] }
 0x40e   :  { %5252 = vmatprep.subr.mxu1 %v6053_v0  ;;  %v5090_v60 = vpop.f32.mrf.mxu0  ;;  %v1856_v32 = vld [vmem:[#allocation5 + $0x3a0] sm:$0xff]  ;;  %v1855_v59 = vld [vmem:[#allocation5 + $0x398] sm:$0xff] }
 0x40f   :  { %5253 = vmatpush3.msra.mxu1 %v6364_v54  ;;  %v1268_v61 = vpop.f32.mrf.mxu1  ;;  %v1854_v60 = vld [vmem:[#allocation5 + $0x390] sm:$0xff] }
 0x410   :  { %5254 = vmatprep.subr.mxu1 %v6053_v0  ;;  %v1172_v62 = vpop.f32.mrf.mxu0  ;;  %5168 = vmatmul.mubr.f32.gmra.mxu1 %v1268_v61  ;;  %v1853_v61 = vld [vmem:[#allocation5 + $0x388] sm:$0xff] }
 0x411   :  { %v6795_v63 = vadd.f32 %v1172_v62, %v985_v50  ;;  %5255 = vmatpush3.msra.mxu1 %v6369_v45  ;;  %v5128_v2 = vpop.f32.mrf.mxu1  ;;  %5272 = vmatprep.mubr.msk.f32.mxu1 %vm6054_vm0, %v6053_v0  ;;  %v1863_v50 = vld [vmem:[#allocation5 + $0x3d8] sm:$0xff]  ;;  %v1852_v62 = vld [vmem:[#allocation5 + $0x380] sm:$0xff] }
 0x412   :  { %5256 = vmatprep.subr.mxu1 %v6053_v0  ;;  %v5093_v3 = vpop.f32.mrf.mxu0 }
 0x413   :  { %5257 = vmatpush3.msra.mxu1 %v6374_v37 }
 0x414   :  { %5258 = vmatprep.subr.mxu1 %v6053_v0 }
 0x415   :  { %5259 = vmatpush3.msra.mxu1 %v6379_v31 }
 0x416   :  { %5260 = vmatprep.subr.mxu1 %v6053_v0 }
 0x417   :  { %5261 = vmatpush3.msra.mxu1 %v6384_v29 }
 0x418   :  { %5262 = vmatprep.subr.mxu1 %v6053_v0 }
 0x419   :  { %5263 = vmatpush3.msra.mxu1 %v6389_v27 }
 0x41a   :  { %5264 = vmatprep.subr.mxu1 %v6053_v0 }
 0x41b   :  { %5265 = vmatpush3.msra.mxu1 %v6394_v25 }
 0x41c   :  { %5266 = vmatprep.subr.mxu1 %v6053_v0 }
 0x41d   :  { %5267 = vmatpush3.msra.mxu1 %v6399_v23 }
 0x41e   :  { %5268 = vmatprep.subr.mxu1 %v6053_v0 }
 0x41f   :  { %5269 = vmatpush3.msra.mxu1 %v6403_v21 }
 0x420   :  { %5270 = vmatprep.subr.mxu1 %v6053_v0 }
 0x421   :  { %5271 = vmatpush3.msra.mxu1 %v6407_v39 }
 0x422   :  { %v1451_v5 = vpop.f32.mrf.mxu0  ;;  %5273 = vmatmul.mubr.msk.f32.vlgmr.msra.gmra.mxu1 %vm414_vm4, %v4128_v4  ;;  %5281 = vmatprep.subr.mxu1 %v6053_v0 }
 0x423   :  { %5238 = vmatmul.mubr.f32.vlgmr.msra.gmra.mxu0 %v1451_v5  ;;  %5275 = vmatprep.mubr.msk.f32.mxu1 %vm6054_vm0, %v6053_v0 }
 0x424   :  { %5323 = vmatpush3.msk.msra.mxu0 %vm310_vm3, %v6349_v8  ;;  %v5198_v9 = vpop.f32.mrf.mxu0  ;;  %5240 = vmatprep.mubr.msk.f32.mxu0 %vm6054_vm0, %v6053_v0 }
 0x425   :  { %5324 = vmatprep.subr.mxu0 %v6053_v0  ;;  %5282 = vmatpush3.msra.mxu1 %v1674_v6 }
 0x426   :  { %5325 = vmatpush3.msra.mxu0 %v6354_v12  ;;  %v1456_v11 = vpop.f32.mrf.mxu0  ;;  %5276 = vmatmul.mubr.msk.f32.gmra.mxu1 %vm414_vm4, %v4129_v7 }
 0x427   :  { %5326 = vmatprep.subr.mxu0 %v6053_v0  ;;  %5241 = vmatmul.mubr.f32.gmra.mxu0 %v1456_v11 }
 0x428   :  { %5327 = vmatpush3.msra.mxu0 %v6359_v10  ;;  %v5201_v14 = vpop.f32.mrf.mxu0  ;;  %5278 = vmatprep.mubr.msk.f32.mxu1 %vm6054_vm0, %v6053_v0 }
 0x429   :  { %5328 = vmatprep.subr.mxu0 %v6053_v0  ;;  %5243 = vmatprep.mubr.msk.f32.mxu0 %vm6054_vm0, %v6053_v0 }
 0x42a   :  { %5329 = vmatpush3.msra.mxu0 %v6364_v54  ;;  %v1461_v1 = vpop.f32.mrf.mxu0  ;;  %5279 = vmatmul.mubr.msk.f32.gmra.mxu1 %vm414_vm4, %v4130_v13 }
 0x42b   :  { %5330 = vmatprep.subr.mxu0 %v6053_v0  ;;  %5244 = vmatmul.mubr.f32.gmra.mxu0 %v1461_v1 }
 0x42c   :  { %5331 = vmatpush3.msra.mxu0 %v6369_v45  ;;  %5348 = vmatprep.mubr.msk.f32.mxu0 %vm6054_vm0, %v6053_v0  ;;  %v5204_v16 = vpop.f32.mrf.mxu0 }
 0x42d   :  { %5332 = vmatprep.subr.mxu0 %v6053_v0  ;;  %5283 = vmatprep.subr.mxu1 %v6053_v0 }
 0x42e   :  { %5333 = vmatpush3.msra.mxu0 %v6374_v37  ;;  %5284 = vmatpush3.msra.mxu1 %v1673_v15 }
 0x42f   :  { %5334 = vmatprep.subr.mxu0 %v6053_v0  ;;  %5285 = vmatprep.subr.mxu1 %v6053_v0 }
 0x430   :  { %5335 = vmatpush3.msra.mxu0 %v6379_v31  ;;  %5286 = vmatpush3.msra.mxu1 %v1672_v17 }
 0x431   :  { %5336 = vmatprep.subr.mxu0 %v6053_v0  ;;  %5287 = vmatprep.subr.mxu1 %v6053_v0 }
 0x432   :  { %5337 = vmatpush3.msra.mxu0 %v6384_v29  ;;  %5313 = vmatprep.mubr.msk.f32.mxu1 %vm6054_vm0, %v6053_v0 }
 0x433   :  { %5338 = vmatprep.subr.mxu0 %v6053_v0  ;;  %5288 = vmatpush3.msra.mxu1 %v1671_v24 }
 0x434   :  { %5339 = vmatpush3.msra.mxu0 %v6389_v27  ;;  %5289 = vmatprep.subr.mxu1 %v6053_v0 }
 0x435   :  { %5340 = vmatprep.subr.mxu0 %v6053_v0  ;;  %5290 = vmatpush3.msra.mxu1 %v1670_v28 }
 0x436   :  { %5341 = vmatpush3.msra.mxu0 %v6394_v25  ;;  %5291 = vmatprep.subr.mxu1 %v6053_v0 }
 0x437   :  { %5342 = vmatprep.subr.mxu0 %v6053_v0  ;;  %5292 = vmatpush3.msra.mxu1 %v1669_v30 }
 0x438   :  { %5343 = vmatpush3.msra.mxu0 %v6399_v23  ;;  %5293 = vmatprep.subr.mxu1 %v6053_v0 }
 0x439   :  { %5344 = vmatprep.subr.mxu0 %v6053_v0  ;;  %5294 = vmatpush3.msra.mxu1 %v1668_v33  ;;  %v2057_v33 = vld [vmem:[#allocation5 + $0x460] sm:$0xff] }
 0x43a   :  { %5345 = vmatpush3.msra.mxu0 %v6403_v21  ;;  %5295 = vmatprep.subr.mxu1 %v6053_v0 }
 0x43b   :  { %5346 = vmatprep.subr.mxu0 %v6053_v0  ;;  %5296 = vmatpush3.msra.mxu1 %v1667_v34  ;;  %v2056_v34 = vld [vmem:[#allocation5 + $0x458] sm:$0xff] }
 0x43c   :  { %5347 = vmatpush3.msra.mxu0 %v6407_v39  ;;  %5297 = vmatprep.subr.mxu1 %v6053_v0 }
 0x43d   :  { %5349 = vmatmul.mubr.msk.f32.vlgmr.msra.gmra.mxu0 %vm414_vm4, %v4135_v18  ;;  %5357 = vmatprep.subr.mxu0 %v6053_v0 }
 0x43e   :  { %5351 = vmatprep.mubr.msk.f32.mxu0 %vm6054_vm0, %v6053_v0  ;;  %5298 = vmatpush3.msra.mxu1 %v1666_v36  ;;  %v2055_v36 = vld [vmem:[#allocation5 + $0x450] sm:$0xff] }
 0x43f   :  { %5358 = vmatpush3.msra.mxu0 %v1867_v19  ;;  %5299 = vmatprep.subr.mxu1 %v6053_v0  ;;  %v2053_v19 = vld [vmem:[#allocation5 + $0x440] sm:$0xff] }
 0x440   :  { %5359 = vmatprep.subr.mxu0 %v6053_v0  ;;  %5300 = vmatpush3.msra.mxu1 %v1665_v38  ;;  %v2054_v38 = vld [vmem:[#allocation5 + $0x448] sm:$0xff] }
 0x441   :  { %5352 = vmatmul.mubr.msk.f32.gmra.mxu0 %vm414_vm4, %v4136_v20  ;;  %5301 = vmatprep.subr.mxu1 %v6053_v0 }
 0x442   :  { %5354 = vmatprep.mubr.msk.f32.mxu0 %vm6054_vm0, %v6053_v0  ;;  %5360 = vmatpush3.msra.mxu0 %v1866_v40  ;;  %v2052_v40 = vld [vmem:[#allocation5 + $0x438] sm:$0xff] }
 0x443   :  { %5361 = vmatprep.subr.mxu0 %v6053_v0  ;;  %5302 = vmatpush3.msra.mxu1 %v1664_v41  ;;  %v2051_v41 = vld [vmem:[#allocation5 + $0x430] sm:$0xff] }
 0x444   :  { %5303 = vmatprep.subr.mxu1 %v6053_v0  ;;  %5362 = vmatpush3.msra.mxu0 %v1865_v48  ;;  %v2045_v48 = vld [vmem:[#allocation5 + $0x400] sm:$0xff] }
 0x445   :  { %5355 = vmatmul.mubr.msk.f32.gmra.mxu0 %vm414_vm4, %v4137_v22  ;;  %5304 = vmatpush3.msra.mxu1 %v1663_v42  ;;  %v2050_v42 = vld [vmem:[#allocation5 + $0x428] sm:$0xff] }
 0x446   :  { %5389 = vmatprep.mubr.msk.f32.mxu0 %vm6054_vm0, %v6053_v0  ;;  %5305 = vmatprep.subr.mxu1 %v6053_v0 }
 0x447   :  { %5306 = vmatpush3.msra.mxu1 %v1662_v43  ;;  %5363 = vmatprep.subr.mxu0 %v6053_v0  ;;  %v2049_v43 = vld [vmem:[#allocation5 + $0x420] sm:$0xff] }
 0x448   :  { %5307 = vmatprep.subr.mxu1 %v6053_v0  ;;  %5364 = vmatpush3.msra.mxu0 %v1864_v49 }
 0x449   :  { %5308 = vmatpush3.msra.mxu1 %v1661_v44  ;;  %5365 = vmatprep.subr.mxu0 %v6053_v0  ;;  %v2048_v44 = vld [vmem:[#allocation5 + $0x418] sm:$0xff] }
 0x44a   :  { %5309 = vmatprep.subr.mxu1 %v6053_v0  ;;  %5366 = vmatpush3.msra.mxu0 %v1863_v50 }
 0x44b   :  { %5310 = vmatpush3.msra.mxu1 %v1660_v46  ;;  %5367 = vmatprep.subr.mxu0 %v6053_v0  ;;  %v2047_v46 = vld [vmem:[#allocation5 + $0x410] sm:$0xff] }
 0x44c   :  { %5311 = vmatprep.subr.mxu1 %v6053_v0  ;;  %5368 = vmatpush3.msra.mxu0 %v1862_v51 }
 0x44d   :  { %5312 = vmatpush3.msra.mxu1 %v1659_v47  ;;  %5369 = vmatprep.subr.mxu0 %v6053_v0  ;;  %v2046_v47 = vld [vmem:[#allocation5 + $0x408] sm:$0xff] }
 0x44e   :  { %5398 = vmatprep.subr.mxu1 %v6053_v0  ;;  %5370 = vmatpush3.msra.mxu0 %v1861_v52 }
 0x44f   :  { %5371 = vmatprep.subr.mxu0 %v6053_v0 }
 0x450   :  { %5372 = vmatpush3.msra.mxu0 %v1860_v53 }
 0x451   :  { %5373 = vmatprep.subr.mxu0 %v6053_v0 }
 0x452   :  { %5374 = vmatpush3.msra.mxu0 %v1859_v56 }
 0x453   :  { %5375 = vmatprep.subr.mxu0 %v6053_v0 }
 0x454   :  { %5376 = vmatpush3.msra.mxu0 %v1858_v58 }
 0x455   :  { %5377 = vmatprep.subr.mxu0 %v6053_v0 }
 0x456   :  { %5378 = vmatpush3.msra.mxu0 %v1857_v26 }
 0x457   :  { %5379 = vmatprep.subr.mxu0 %v6053_v0 }
 0x458   :  { %5380 = vmatpush3.msra.mxu0 %v1856_v32 }
 0x459   :  { %5381 = vmatprep.subr.mxu0 %v6053_v0 }
 0x45a   :  { %5382 = vmatpush3.msra.mxu0 %v1855_v59 }
 0x45b   :  { %5383 = vmatprep.subr.mxu0 %v6053_v0 }
 0x45c   :  { %5384 = vmatpush3.msra.mxu0 %v1854_v60 }
 0x45d   :  { %5385 = vmatprep.subr.mxu0 %v6053_v0 }
 0x45e   :  { %5386 = vmatpush3.msra.mxu0 %v1853_v61 }
 0x45f   :  { %5387 = vmatprep.subr.mxu0 %v6053_v0 }
 0x460   :  { %5388 = vmatpush3.msra.mxu0 %v1852_v62 }
 0x461   :  { %5474 = vmatprep.subr.mxu0 %v6053_v0 }
 0x4c8   :  { %v1355_v2 = vpop.f32.mrf.mxu1 }
 0x4c9   :  { %v1369_v3 = vadd.f32 %v1355_v2, %v6778_v55 }
 0x4ca   :  { %v5163_v4 = vpop.f32.mrf.mxu1 }
 0x4cc   :  { %v1360_v5 = vpop.f32.mrf.mxu1 }
 0x4cd   :  { %v1370_v6 = vadd.f32 %v1360_v5, %v6787_v35 }
 0x4ce   :  { %v5166_v7 = vpop.f32.mrf.mxu1 }
 0x4d0   :  { %v1365_v9 = vpop.f32.mrf.mxu1 }
 0x4d1   :  { %v1371_v11 = vadd.f32 %v1365_v9, %v6795_v63 }
 0x4d2   :  { %v5169_v13 = vpop.f32.mrf.mxu1 }
 0x4e2   :  { %v1644_v14 = vpop.f32.mrf.mxu1 }
 0x4e3   :  { %v1548_v1 = vpop.f32.mrf.mxu0  ;;  %5314 = vmatmul.mubr.f32.vlgmr.msra.gmra.mxu1 %v1644_v14 }
 0x4e4   :  { %v6921_v15 = vadd.f32 %v1548_v1, %v1369_v3  ;;  %5399 = vmatpush3.msk.msra.mxu1 %vm310_vm3, %v6349_v8  ;;  %v5274_v16 = vpop.f32.mrf.mxu1  ;;  %5316 = vmatprep.mubr.msk.f32.mxu1 %vm6054_vm0, %v6053_v0 }
 0x4e5   :  { %5400 = vmatprep.subr.mxu1 %v6053_v0  ;;  %v5239_v55 = vpop.f32.mrf.mxu0  ;;  %v2289_v16 = vld [vmem:[#allocation7 + $0x70] sm:$0xff] }
 0x4e6   :  { %5401 = vmatpush3.msra.mxu1 %v6354_v12  ;;  %v1649_v35 = vpop.f32.mrf.mxu1  ;;  %v2288_v55 = vld [vmem:[#allocation7 + $0x68] sm:$0xff] }
 0x4e7   :  { %5402 = vmatprep.subr.mxu1 %v6053_v0  ;;  %v1553_v63 = vpop.f32.mrf.mxu0  ;;  %5317 = vmatmul.mubr.f32.gmra.mxu1 %v1649_v35  ;;  %v2287_v35 = vld [vmem:[#allocation7 + $0x60] sm:$0xff] }
 0x4e8   :  { %v6930_v17 = vadd.f32 %v1553_v63, %v1370_v6  ;;  %5403 = vmatpush3.msra.mxu1 %v6359_v10  ;;  %v5277_v18 = vpop.f32.mrf.mxu1  ;;  %5319 = vmatprep.mubr.msk.f32.mxu1 %vm6054_vm0, %v6053_v0  ;;  %v2286_v63 = vld [vmem:[#allocation7 + $0x58] sm:$0xff] }
 0x4e9   :  { %5404 = vmatprep.subr.mxu1 %v6053_v0  ;;  %v5242_v8 = vpop.f32.mrf.mxu0  ;;  %v2284_v18 = vld [vmem:[#allocation7 + $0x48] sm:$0xff] }
 0x4ea   :  { %5405 = vmatpush3.msra.mxu1 %v6364_v54  ;;  %v1654_v20 = vpop.f32.mrf.mxu1  ;;  %v4142_v54 = vld [vmem:[%s7517_s28 + $0xc0] sm:$0xff] }
 0x4eb   :  { %5406 = vmatprep.subr.mxu1 %v6053_v0  ;;  %v1558_v12 = vpop.f32.mrf.mxu0  ;;  %5320 = vmatmul.mubr.f32.gmra.mxu1 %v1654_v20  ;;  %v2283_v8 = vld [vmem:[#allocation7 + $0x40] sm:$0xff]  ;;  %v2282_v20 = vld [vmem:[#allocation7 + $0x38] sm:$0xff] }
 0x4ec   :  { %v6938_v22 = vadd.f32 %v1558_v12, %v1371_v11  ;;  %5407 = vmatpush3.msra.mxu1 %v6369_v45  ;;  %v5280_v24 = vpop.f32.mrf.mxu1  ;;  %5424 = vmatprep.mubr.msk.f32.mxu1 %vm6054_vm0, %v6053_v0  ;;  %v2060_v45 = vld [vmem:[#allocation5 + $0x478] sm:$0xff]  ;;  %v2281_v12 = vld [vmem:[#allocation7 + $0x30] sm:$0xff] }
 0x4ed   :  { %5408 = vmatprep.subr.mxu1 %v6053_v0  ;;  %v5245_v10 = vpop.f32.mrf.mxu0  ;;  %v2279_v24 = vld [vmem:[#allocation7 + $0x20] sm:$0xff] }
 0x4ee   :  { %5409 = vmatpush3.msra.mxu1 %v6374_v37  ;;  %v2278_v10 = vld [vmem:[#allocation7 + $0x18] sm:$0xff] }
 0x4ef   :  { %5410 = vmatprep.subr.mxu1 %v6053_v0 }
 0x4f0   :  { %5411 = vmatpush3.msra.mxu1 %v6379_v31  ;;  %v4143_v31 = vld [vmem:[%s7517_s28 + $0xc8] sm:$0xff] }
 0x4f1   :  { %5412 = vmatprep.subr.mxu1 %v6053_v0 }
 0x4f2   :  { %5413 = vmatpush3.msra.mxu1 %v6384_v29 }
 0x4f3   :  { %5414 = vmatprep.subr.mxu1 %v6053_v0 }
 0x4f4   :  { %5415 = vmatpush3.msra.mxu1 %v6389_v27  ;;  %v2059_v27 = vld [vmem:[#allocation5 + $0x470] sm:$0xff] }
 0x4f5   :  { %5416 = vmatprep.subr.mxu1 %v6053_v0 }
 0x4f6   :  { %5417 = vmatpush3.msra.mxu1 %v6394_v25 }
 0x4f7   :  { %5418 = vmatprep.subr.mxu1 %v6053_v0 }
 0x4f8   :  { %5419 = vmatpush3.msra.mxu1 %v6399_v23  ;;  %v4144_v23 = vld [vmem:[%s7517_s28 + $0xd0] sm:$0x3] }
 0x4f9   :  { %5420 = vmatprep.subr.mxu1 %v6053_v0 }
 0x4fa   :  { %5421 = vmatpush3.msra.mxu1 %v6403_v21 }
 0x4fb   :  { %5422 = vmatprep.subr.mxu1 %v6053_v0 }
 0x4fc   :  { %5423 = vmatpush3.msra.mxu1 %v6407_v39  ;;  %v2058_v39 = vld [vmem:[#allocation5 + $0x468] sm:$0xff] }
 0x4fd   :  { %v1837_v37 = vpop.f32.mrf.mxu0  ;;  %5425 = vmatmul.mubr.msk.f32.vlgmr.msra.gmra.mxu1 %vm414_vm4, %v4142_v54  ;;  %5433 = vmatprep.subr.mxu1 %v6053_v0  ;;  %v2277_v54 = vld [vmem:[#allocation7 + $0x10] sm:$0xff] }
 0x4fe   :  { %5390 = vmatmul.mubr.f32.vlgmr.msra.gmra.mxu0 %v1837_v37  ;;  %5427 = vmatprep.mubr.msk.f32.mxu1 %vm6054_vm0, %v6053_v0  ;;  %v2275_v37 = vld [vmem:[#allocation7] sm:$0xff] }
 0x4ff   :  { %v5350_v29 = vpop.f32.mrf.mxu0  ;;  %5392 = vmatprep.mubr.msk.f32.mxu0 %vm6054_vm0, %v6053_v0  ;;  %5434 = vmatpush3.msra.mxu1 %v2060_v45  ;;  %v2276_v45 = vld [vmem:[#allocation7 + $0x8] sm:$0xff] }
 0x500   :  { %5435 = vmatprep.subr.mxu1 %v6053_v0 }
 0x501   :  { %v1842_v25 = vpop.f32.mrf.mxu0  ;;  %5428 = vmatmul.mubr.msk.f32.gmra.mxu1 %vm414_vm4, %v4143_v31 }
 0x502   :  { %5393 = vmatmul.mubr.f32.gmra.mxu0 %v1842_v25  ;;  %5430 = vmatprep.mubr.msk.f32.mxu1 %vm6054_vm0, %v6053_v0 }
 0x503   :  { %v5353_v21 = vpop.f32.mrf.mxu0  ;;  %5395 = vmatprep.mubr.msk.f32.mxu0 %vm6054_vm0, %v6053_v0  ;;  %5436 = vmatpush3.msra.mxu1 %v2059_v27 }
 0x504   :  { %5437 = vmatprep.subr.mxu1 %v6053_v0 }
 0x505   :  { %v1847_v28 = vpop.f32.mrf.mxu0  ;;  %5431 = vmatmul.mubr.msk.f32.gmra.mxu1 %vm414_vm4, %v4144_v23 }
 0x506   :  { %5396 = vmatmul.mubr.f32.gmra.mxu0 %v1847_v28  ;;  %5438 = vmatpush3.msra.mxu1 %v2058_v39 }
 0x507   :  { %5439 = vmatprep.subr.mxu1 %v6053_v0  ;;  %v5356_v30 = vpop.f32.mrf.mxu0  ;;  %5465 = vmatprep.mubr.msk.f32.mxu1 %vm6054_vm0, %v6053_v0 }
 0x508   :  { %5480 = vmatprep.mubr.msk.f32.mxu0 %vm6054_vm0, %v6053_v0  ;;  %5440 = vmatpush3.msra.mxu1 %v2057_v33 }
 0x509   :  { %5441 = vmatprep.subr.mxu1 %v6053_v0 }
 0x50a   :  { %5442 = vmatpush3.msra.mxu1 %v2056_v34 }
 0x50b   :  { %5443 = vmatprep.subr.mxu1 %v6053_v0 }
 0x50c   :  { %5444 = vmatpush3.msra.mxu1 %v2055_v36 }
 0x50d   :  { %5445 = vmatprep.subr.mxu1 %v6053_v0 }
 0x50e   :  { %5446 = vmatpush3.msra.mxu1 %v2054_v38 }
 0x50f   :  { %5447 = vmatprep.subr.mxu1 %v6053_v0 }
 0x510   :  { %5448 = vmatpush3.msra.mxu1 %v2053_v19 }
 0x511   :  { %5449 = vmatprep.subr.mxu1 %v6053_v0 }
 0x512   :  { %5450 = vmatpush3.msra.mxu1 %v2052_v40 }
 0x513   :  { %5451 = vmatprep.subr.mxu1 %v6053_v0 }
 0x514   :  { %5452 = vmatpush3.msra.mxu1 %v2051_v41 }
 0x515   :  { %5453 = vmatprep.subr.mxu1 %v6053_v0 }
 0x516   :  { %5454 = vmatpush3.msra.mxu1 %v2050_v42 }
 0x517   :  { %5455 = vmatprep.subr.mxu1 %v6053_v0 }
 0x518   :  { %5456 = vmatpush3.msra.mxu1 %v2049_v43 }
 0x519   :  { %5457 = vmatprep.subr.mxu1 %v6053_v0 }
 0x51a   :  { %5458 = vmatpush3.msra.mxu1 %v2048_v44 }
 0x51b   :  { %5459 = vmatprep.subr.mxu1 %v6053_v0 }
 0x51c   :  { %5460 = vmatpush3.msra.mxu1 %v2047_v46 }
 0x51d   :  { %5461 = vmatprep.subr.mxu1 %v6053_v0 }
 0x51e   :  { %5462 = vmatpush3.msra.mxu1 %v2046_v47 }
 0x51f   :  { %5463 = vmatprep.subr.mxu1 %v6053_v0 }
 0x520   :  { %5464 = vmatpush3.msra.mxu1 %v2045_v48 }
 0x521   :  { %5527 = vmatprep.subr.mxu1 %v6053_v0 }
 0x5a3   :  { %v1741_v49 = vpop.f32.mrf.mxu1 }
 0x5a4   :  { %v1755_v50 = vadd.f32 %v1741_v49, %v6921_v15  ;;  %v2290_v15 = vld [vmem:[#allocation7 + $0x78] sm:$0xff] }
 0x5a5   :  { %v5315_v51 = vpop.f32.mrf.mxu1 }
 0x5a7   :  { %v1746_v52 = vpop.f32.mrf.mxu1 }
 0x5a8   :  { %v1756_v53 = vadd.f32 %v1746_v52, %v6930_v17  ;;  %v2285_v17 = vld [vmem:[#allocation7 + $0x50] sm:$0xff] }
 0x5a9   :  { %v5318_v56 = vpop.f32.mrf.mxu1 }
 0x5ab   :  { %v1751_v58 = vpop.f32.mrf.mxu1 }
 0x5ac   :  { %v1757_v26 = vadd.f32 %v1751_v58, %v6938_v22  ;;  %v2280_v22 = vld [vmem:[#allocation7 + $0x28] sm:$0xff] }
 0x5ad   :  { %v5321_v32 = vpop.f32.mrf.mxu1 }
 0x5bd   :  { %v2030_v59 = vpop.f32.mrf.mxu1 }
 0x5be   :  { %v1934_v60 = vpop.f32.mrf.mxu0  ;;  %5466 = vmatmul.mubr.f32.vlgmr.msra.gmra.mxu1 %v2030_v59 }
 0x5bf   :  { %v7003_v61 = vadd.f32 %v1934_v60, %v1755_v50  ;;  %v5426_v62 = vpop.f32.mrf.mxu1  ;;  %5468 = vmatprep.mubr.msk.f32.mxu1 %vm6054_vm0, %v6053_v0  ;;  %5528 = vmatpush3.msra.mxu1 %v2290_v15 }
 0x5c0   :  { %v5391_v2 = vpop.f32.mrf.mxu0  ;;  %5529 = vmatprep.subr.mxu1 %v6053_v0 }
 0x5c1   :  { %v2035_v3 = vpop.f32.mrf.mxu1  ;;  %5530 = vmatpush3.msra.mxu1 %v2289_v16  ;;  %v2144_v2 = vld [vmem:[%s7492_s8] sm:$0x1] }
 0x5c2   :  { %v1939_v4 = vpop.f32.mrf.mxu0  ;;  %5469 = vmatmul.mubr.f32.gmra.mxu1 %v2035_v3  ;;  %5531 = vmatprep.subr.mxu1 %v6053_v0 }
 0x5c3   :  { %v7007_v5 = vadd.f32 %v1939_v4, %v1756_v53  ;;  %v5429_v6 = vpop.f32.mrf.mxu1  ;;  %5471 = vmatprep.mubr.msk.f32.mxu1 %vm6054_vm0, %v6053_v0  ;;  %5532 = vmatpush3.msra.mxu1 %v2288_v55 }
 0x5c4   :  { %v5394_v7 = vpop.f32.mrf.mxu0  ;;  %5533 = vmatprep.subr.mxu1 %v6053_v0 }
 0x5c5   :  { %v2040_v9 = vpop.f32.mrf.mxu1  ;;  %5534 = vmatpush3.msra.mxu1 %v2287_v35 }
 0x5c6   :  { %v1944_v11 = vpop.f32.mrf.mxu0  ;;  %5472 = vmatmul.mubr.f32.gmra.mxu1 %v2040_v9  ;;  %5535 = vmatprep.subr.mxu1 %v6053_v0 }
 0x5c7   :  { %v7011_v13 = vadd.f32 %v1944_v11, %v1757_v26  ;;  %v5432_v14 = vpop.f32.mrf.mxu1  ;;  %5559 = vmatprep.mubr.msk.f32.mxu1 %vm6054_vm0, %v6053_v0  ;;  %5536 = vmatpush3.msra.mxu1 %v2286_v63 }
 0x5c8   :  { %v5397_v1 = vpop.f32.mrf.mxu0  ;;  %5537 = vmatprep.subr.mxu1 %v6053_v0 }
 0x5c9   :  { %5538 = vmatpush3.msra.mxu1 %v2285_v17 }
 0x5ca   :  { %5539 = vmatprep.subr.mxu1 %v6053_v0 }
 0x5cb   :  { %5540 = vmatpush3.msra.mxu1 %v2284_v18  ;;  %v2197_v18 = vld [vmem:[%s7518_s29] sm:$0x3] }
 0x5cc   :  { %5541 = vmatprep.subr.mxu1 %v6053_v0 }
 0x5cd   :  { %5542 = vmatpush3.msra.mxu1 %v2283_v8  ;;  %v4151_v8 = vld [vmem:[%s7518_s29 + $0x2] sm:$0x3] }
 0x5ce   :  { %5543 = vmatprep.subr.mxu1 %v6053_v0 }
 0x5cf   :  { %5544 = vmatpush3.msra.mxu1 %v2282_v20  ;;  %v2382_v20 = vld [vmem:[#allocation7 + $0xf8] sm:$0xff] }
 0x5d0   :  { %5545 = vmatprep.subr.mxu1 %v6053_v0 }
 0x5d1   :  { %5546 = vmatpush3.msra.mxu1 %v2281_v12  ;;  %v2381_v12 = vld [vmem:[#allocation7 + $0xf0] sm:$0xff] }
 0x5d2   :  { %5547 = vmatprep.subr.mxu1 %v6053_v0 }
 0x5d3   :  { %5548 = vmatpush3.msra.mxu1 %v2280_v22  ;;  %v2380_v22 = vld [vmem:[#allocation7 + $0xe8] sm:$0xff] }
 0x5d4   :  { %5549 = vmatprep.subr.mxu1 %v6053_v0 }
 0x5d5   :  { %5550 = vmatpush3.msra.mxu1 %v2279_v24  ;;  %v2379_v24 = vld [vmem:[#allocation7 + $0xe0] sm:$0xff] }
 0x5d6   :  { %5551 = vmatprep.subr.mxu1 %v6053_v0 }
 0x5d7   :  { %5552 = vmatpush3.msra.mxu1 %v2278_v10  ;;  %v2378_v10 = vld [vmem:[#allocation7 + $0xd8] sm:$0xff] }
 0x5d8   :  { %5553 = vmatprep.subr.mxu1 %v6053_v0 }
 0x5d9   :  { %5554 = vmatpush3.msra.mxu1 %v2277_v54  ;;  %v2377_v54 = vld [vmem:[#allocation7 + $0xd0] sm:$0xff] }
 0x5da   :  { %5555 = vmatprep.subr.mxu1 %v6053_v0 }
 0x5db   :  { %5556 = vmatpush3.msra.mxu1 %v2276_v45  ;;  %v2376_v45 = vld [vmem:[#allocation7 + $0xc8] sm:$0xff] }
 0x5dc   :  { %5557 = vmatprep.subr.mxu1 %v6053_v0 }
 0x5dd   :  { %5558 = vmatpush3.msra.mxu1 %v2275_v37  ;;  %v2375_v37 = vld [vmem:[#allocation7 + $0xc0] sm:$0xff] }
 0x5de   :  { %5606 = vmatprep.subr.mxu1 %v6053_v0 }
 0x67e   :  { %v2127_v31 = vpop.f32.mrf.mxu1 }
 0x67f   :  { %v2141_v27 = vadd.f32 %v2127_v31, %v7003_v61  ;;  %v2374_v31 = vld [vmem:[#allocation7 + $0xb8] sm:$0xff] }
 0x680   :  { %v5467_v29 = vpop.f32.mrf.mxu1 }
 0x681   :  { %v2156_v39 = vmul.f32 %v2141_v27, %v2141_v27  ;;  %v2373_v29 = vld [vmem:[#allocation7 + $0xb0] sm:$0xff] }
 0x682   :  { %v2132_v25 = vpop.f32.mrf.mxu1 }
 0x683   :  { %v2142_v23 = vadd.f32 %v2132_v25, %v7007_v5  ;;  %v2145_v5 = vld [vmem:[%s7493_s9] sm:$0x1]  ;;  %v2371_v25 = vld [vmem:[#allocation7 + $0xa0] sm:$0xff]  ;;  %s6055_s9 = smov [#allocation8]  }
 0x684   :  { %v5470_v21 = vpop.f32.mrf.mxu1 }
 0x685   :  { %v2146_v28 = vadd.f32 %v2142_v23, %v2141_v27  ;;  %v2157_v30 = vmul.f32 %v2142_v23, %v2142_v23  ;;  %v2369_v21 = vld [vmem:[#allocation7 + $0x90] sm:$0xff] }
 0x686   :  { %v2137_v33 = vpop.f32.mrf.mxu1 }
 0x687   :  { %v2159_v34 = vadd.f32 %v2157_v30, %v2156_v39  ;;  %v2143_v36 = vadd.f32 %v2137_v33, %v7011_v13  ;;  %v2368_v39 = vld [vmem:[#allocation7 + $0x88] sm:$0xff] }
 0x688   :  { %v5473_v38 = vpop.f32.mrf.mxu1 }
 0x689   :  { %v2147_v19 = vsel %vm310_vm3, %v2143_v36, 0.0  ;;  %v2158_v40 = vmul.f32 %v2143_v36, %v2143_v36  ;;  %v2777_v38 = vld [vmem:[#allocation7 + $0x1f8] sm:$0xff] }
 0x68a   :  { %v2148_v41 = vadd.f32 %v2147_v19, %v2146_v28  ;;  %v2367_v28 = vld [vmem:[#allocation7 + $0x80] sm:$0xff] }
 0x68b   :  { %v2160_v42 = vsel %vm310_vm3, %v2158_v40, 0.0  ;;  %v2776_v40 = vld [vmem:[#allocation7 + $0x1f0] sm:$0xff] }
 0x68c   :  { %v2149_v43 = vrot.slane %v2148_v41, 4  ;;  %v2161_v44 = vadd.f32 %v2160_v42, %v2159_v34  ;;  %v4157_v34 = vld [vmem:[%s7518_s29 + $0x6] sm:$0x3]  ;;  %v2775_v42 = vld [vmem:[#allocation7 + $0x1e8] sm:$0xff] }
 0x68e   :  { %v2150_v46 = vadd.f32 %v2149_v43, %v2148_v41  ;;  %v2162_v47 = vrot.slane %v2161_v44, 4  ;;  %v4154_v41 = vld [vmem:[%s7518_s29 + $0x4] sm:$0x3]  ;;  %v2614_v43 = vld [vmem:[#allocation7 + $0x178] sm:$0xff] }
 0x690   :  { %v2151_v48 = vrot.slane %v2150_v46, 2  ;;  %v2163_v49 = vadd.f32 %v2162_v47, %v2161_v44  ;;  %v2774_v44 = vld [vmem:[#allocation7 + $0x1e0] sm:$0xff]  ;;  %v2773_v47 = vld [vmem:[#allocation7 + $0x1d8] sm:$0xff] }
 0x692   :  { %v2152_v50 = vadd.f32 %v2151_v48, %v2150_v46  ;;  %v2164_v51 = vrot.slane %v2163_v49, 2  ;;  %v2613_v46 = vld [vmem:[#allocation7 + $0x170] sm:$0xff]  ;;  %v2612_v48 = vld [vmem:[#allocation7 + $0x168] sm:$0xff] }
 0x694   :  { %v2153_v52 = vrot.slane %v2152_v50, 1  ;;  %v2165_v53 = vadd.f32 %v2164_v51, %v2163_v49  ;;  %v2772_v49 = vld [vmem:[#allocation7 + $0x1d0] sm:$0xff]  ;;  %v2771_v51 = vld [vmem:[#allocation7 + $0x1c8] sm:$0xff] }
 0x696   :  { %v2154_v56 = vadd.f32 %v2153_v52, %v2152_v50  ;;  %v2166_v58 = vrot.slane %v2165_v53, 1  ;;  %v2611_v50 = vld [vmem:[#allocation7 + $0x160] sm:$0xff]  ;;  %v2610_v52 = vld [vmem:[#allocation7 + $0x158] sm:$0xff] }
 0x698   :  { %v2155_v26 = vmul.f32 0.055555556, %v2154_v56  ;;  %v2167_v32 = vadd.f32 %v2166_v58, %v2165_v53  ;;  %v2770_v53 = vld [vmem:[#allocation7 + $0x1c0] sm:$0xff]  ;;  %v2609_v56 = vld [vmem:[#allocation7 + $0x150] sm:$0xff]  ;;  %v2769_v58 = vld [vmem:[#allocation7 + $0x1b8] sm:$0xff] }
 0x69a   :  { %v2168_v59 = vmul.f32 0.055555556, %v2167_v32  ;;  %v2169_v60 = vmul.f32 %v2155_v26, %v2155_v26  ;;  %v2768_v32 = vld [vmem:[#allocation7 + $0x1b0] sm:$0xff] }
 0x69c   :  { %v2170_v61 = vsub.f32 %v2168_v59, %v2169_v60  ;;  %v2607_v59 = vld [vmem:[#allocation7 + $0x140] sm:$0xff]  ;;  %v2767_v60 = vld [vmem:[#allocation7 + $0x1a8] sm:$0xff] }
 0x69e   :  { %v2171_v62 = vadd.f32 1e-05, %v2170_v61  ;;  %v2606_v61 = vld [vmem:[#allocation7 + $0x138] sm:$0xff] }
 0x6a0   :  { %5958 = vrsqrt.f32 %v2171_v62  ;;  %v2766_v62 = vld [vmem:[#allocation7 + $0x1a0] sm:$0xff] }
 0x6ad   :  { %v5959_v3 = vpop.eup %5958 }
 0x6ae   :  { %v2173_v4 = vmul.f32 %v5959_v3, %v2144_v2  ;;  %v2605_v2 = vld [vmem:[#allocation7 + $0x130] sm:$0xff]  ;;  %v2765_v3 = vld [vmem:[#allocation7 + $0x198] sm:$0xff] }
 0x6b0   :  { %v2174_v6 = vmul.f32 %v2173_v4, %v2155_v26  ;;  %v2180_v7 = vrot.slane %v2173_v4, %v6341_v57  ;;  %v2608_v26 = vld [vmem:[#allocation7 + $0x148] sm:$0xff] }
 0x6b1   :  { %v2604_v4 = vld [vmem:[#allocation7 + $0x128] sm:$0xff] }
 0x6b2   :  { %v2175_v9 = vsub.f32 %v2145_v5, %v2174_v6  ;;  %v2182_v11 = vmul.f32 %v2180_v7, %v2141_v27  ;;  %v2183_v13 = vmul.f32 %v2180_v7, %v2142_v23  ;;  %v2184_v14 = vmul.f32 %v2180_v7, %v2143_v36  ;;  %v2372_v27 = vld [vmem:[#allocation7 + $0xa8] sm:$0xff]  ;;  %v2370_v23 = vld [vmem:[#allocation7 + $0x98] sm:$0xff]  ;;  %v2764_v5 = vld [vmem:[#allocation7 + $0x190] sm:$0xff] }
 0x6b3   :  { %v2603_v6 = vld [vmem:[#allocation7 + $0x120] sm:$0xff]  ;;  %v2763_v7 = vld [vmem:[#allocation7 + $0x188] sm:$0xff] }
 0x6b4   :  { %v2189_v1 = vrot.slane %v2175_v9, %v6341_v57  ;;  %v2602_v9 = vld [vmem:[#allocation7 + $0x118] sm:$0xff] }
 0x6b6   :  { %v2191_v15 = vadd.f32 %v2189_v1, %v2182_v11  ;;  %v2192_v16 = vadd.f32 %v2189_v1, %v2183_v13  ;;  %v2193_v55 = vadd.f32 %v2189_v1, %v2184_v14  ;;  %v2762_v11 = vld [vmem:[#allocation7 + $0x180] sm:$0xff]  ;;  %v2601_v13 = vld [vmem:[#allocation7 + $0x110] sm:$0xff]  ;;  %v2600_v14 = vld [vmem:[#allocation7 + $0x108] sm:$0xff] }
 0x6b7   :  { %v2599_v1 = vld [vmem:[#allocation7 + $0x100] sm:$0xff] }
 0x6b8   :  { %v7044_v35 = vmax.f32 %v2193_v55, 0.0  ;;  %v7046_v63 = vmax.f32 %v2192_v16, 0.0  ;;  %v7051_v17 = vmax.f32 %v2191_v15, 0.0 }
 0x6ba   :  { %5475 = vmatpush3.msk.msra.mxu0 %vm310_vm3, %v7044_v35 }
 0x6bb   :  { %5476 = vmatprep.subr.mxu0 %v6053_v0 }
 0x6bc   :  { %5477 = vmatpush3.msra.mxu0 %v7046_v63 }
 0x6bd   :  { %5478 = vmatprep.subr.mxu0 %v6053_v0 }
 0x6be   :  { %5479 = vmatpush3.msra.mxu0 %v7051_v17 }
 0x6bf   :  { %5481 = vmatmul.mubr.msk.f32.vlgmr.msra.gmra.mxu0 %vm2198_vm5, %v2197_v18  ;;  %5483 = vmatprep.subr.mxu0 %v6053_v0 }
 0x6c0   :  { %5484 = vmatpush3.msk.msra.mxu0 %vm310_vm3, %v7044_v35  ;;  %5489 = vmatprep.mubr.msk.f32.mxu0 %vm6054_vm0, %v6053_v0 }
 0x6c1   :  { %5485 = vmatprep.subr.mxu0 %v6053_v0 }
 0x6c2   :  { %5486 = vmatpush3.msra.mxu0 %v7046_v63 }
 0x6c3   :  { %5487 = vmatprep.subr.mxu0 %v6053_v0 }
 0x6c4   :  { %5488 = vmatpush3.msra.mxu0 %v7051_v17 }
 0x6c5   :  { %5490 = vmatmul.mubr.msk.f32.vlgmr.msra.gmra.mxu0 %vm2198_vm5, %v4151_v8  ;;  %5492 = vmatprep.subr.mxu0 %v6053_v0 }
 0x6c6   :  { %5493 = vmatpush3.msra.mxu0 %v2382_v20  ;;  %5524 = vmatprep.mubr.msk.f32.mxu0 %vm6054_vm0, %v6053_v0 }
 0x6c7   :  { %5494 = vmatprep.subr.mxu0 %v6053_v0 }
 0x6c8   :  { %5495 = vmatpush3.msra.mxu0 %v2381_v12 }
 0x6c9   :  { %5496 = vmatprep.subr.mxu0 %v6053_v0 }
 0x6ca   :  { %5497 = vmatpush3.msra.mxu0 %v2380_v22  ;;  %v4163_v22 = vld [vmem:[%s7518_s29 + $0xa] sm:$0x3] }
 0x6cb   :  { %5498 = vmatprep.subr.mxu0 %v6053_v0 }
 0x6cc   :  { %5499 = vmatpush3.msra.mxu0 %v2379_v24 }
 0x6cd   :  { %5500 = vmatprep.subr.mxu0 %v6053_v0 }
 0x6ce   :  { %5501 = vmatpush3.msra.mxu0 %v2378_v10  ;;  %v3103_v10 = vld [vmem:[#allocation7 + $0x2f8] sm:$0xff] }
 0x6cf   :  { %5502 = vmatprep.subr.mxu0 %v6053_v0 }
 0x6d0   :  { %5503 = vmatpush3.msra.mxu0 %v2377_v54 }
 0x6d1   :  { %5504 = vmatprep.subr.mxu0 %v6053_v0 }
 0x6d2   :  { %5505 = vmatpush3.msra.mxu0 %v2376_v45  ;;  %v3102_v45 = vld [vmem:[#allocation7 + $0x2f0] sm:$0xff] }
 0x6d3   :  { %5506 = vmatprep.subr.mxu0 %v6053_v0 }
 0x6d4   :  { %5507 = vmatpush3.msra.mxu0 %v2375_v37  ;;  %v4160_v37 = vld [vmem:[%s7518_s29 + $0x8] sm:$0x3] }
 0x6d5   :  { %5508 = vmatprep.subr.mxu0 %v6053_v0 }
 0x6d6   :  { %5509 = vmatpush3.msra.mxu0 %v2374_v31  ;;  %v3101_v31 = vld [vmem:[#allocation7 + $0x2e8] sm:$0xff] }
 0x6d7   :  { %5510 = vmatprep.subr.mxu0 %v6053_v0 }
 0x6d8   :  { %5511 = vmatpush3.msra.mxu0 %v2373_v29  ;;  %v2940_v29 = vld [vmem:[#allocation7 + $0x278] sm:$0xff] }
 0x6d9   :  { %5512 = vmatprep.subr.mxu0 %v6053_v0 }
 0x6da   :  { %5513 = vmatpush3.msra.mxu0 %v2372_v27  ;;  %v3100_v27 = vld [vmem:[#allocation7 + $0x2e0] sm:$0xff] }
 0x6db   :  { %5514 = vmatprep.subr.mxu0 %v6053_v0 }
 0x6dc   :  { %5515 = vmatpush3.msra.mxu0 %v2371_v25  ;;  %v2939_v25 = vld [vmem:[#allocation7 + $0x270] sm:$0xff] }
 0x6dd   :  { %5516 = vmatprep.subr.mxu0 %v6053_v0 }
 0x6de   :  { %5517 = vmatpush3.msra.mxu0 %v2370_v23  ;;  %v3099_v23 = vld [vmem:[#allocation7 + $0x2d8] sm:$0xff] }
 0x6df   :  { %5518 = vmatprep.subr.mxu0 %v6053_v0 }
 0x6e0   :  { %5519 = vmatpush3.msra.mxu0 %v2369_v21  ;;  %v2938_v21 = vld [vmem:[#allocation7 + $0x268] sm:$0xff] }
 0x6e1   :  { %5520 = vmatprep.subr.mxu0 %v6053_v0 }
 0x6e2   :  { %5521 = vmatpush3.msra.mxu0 %v2368_v39  ;;  %v3098_v39 = vld [vmem:[#allocation7 + $0x2d0] sm:$0xff] }
 0x6e3   :  { %5522 = vmatprep.subr.mxu0 %v6053_v0 }
 0x6e4   :  { %5523 = vmatpush3.msra.mxu0 %v2367_v28  ;;  %v2937_v28 = vld [vmem:[#allocation7 + $0x260] sm:$0xff] }
 0x6e5   :  { %5562 = vmatprep.subr.mxu0 %v6053_v0 }
 0x77f   :  { %v2271_v30 = vpop.f32.mrf.mxu0 }
 0x780   :  { %5560 = vmatmul.mubr.f32.vlgmr.msra.gmra.mxu1 %v2271_v30  ;;  %v3097_v30 = vld [vmem:[#allocation7 + $0x2c8] sm:$0xff] }
 0x781   :  { %5607 = vmatpush3.msk.msra.mxu1 %vm310_vm3, %v7044_v35  ;;  %v5482_v33 = vpop.f32.mrf.mxu0  ;;  %5612 = vmatprep.mubr.msk.f32.mxu1 %vm6054_vm0, %v6053_v0 }
 0x782   :  { %5608 = vmatprep.subr.mxu1 %v6053_v0  ;;  %v2936_v33 = vld [vmem:[#allocation7 + $0x258] sm:$0xff] }
 0x783   :  { %5609 = vmatpush3.msra.mxu1 %v7046_v63 }
 0x784   :  { %5610 = vmatprep.subr.mxu1 %v6053_v0 }
 0x785   :  { %5611 = vmatpush3.msra.mxu1 %v7051_v17  ;;  %v2362_v36 = vpop.f32.mrf.mxu0 }
 0x786   :  { %5613 = vmatmul.mubr.msk.f32.vlgmr.msra.gmra.mxu1 %vm2198_vm5, %v4157_v34  ;;  %5525 = vmatmul.mubr.f32.vlgmr.msra.gmra.mxu0 %v2362_v36  ;;  %v3096_v34 = vld [vmem:[#allocation7 + $0x2c0] sm:$0xff]  ;;  %v2935_v36 = vld [vmem:[#allocation7 + $0x250] sm:$0xff] }
 0x787   :  { %5563 = vmatpush3.msk.msra.mxu0 %vm310_vm3, %v7044_v35  ;;  %5568 = vmatprep.mubr.msk.f32.mxu0 %vm6054_vm0, %v6053_v0  ;;  %v5491_v19 = vpop.f32.mrf.mxu0 }
 0x788   :  { %5564 = vmatprep.subr.mxu0 %v6053_v0  ;;  %5615 = vmatprep.subr.mxu1 %v6053_v0  ;;  %v2934_v19 = vld [vmem:[#allocation7 + $0x248] sm:$0xff] }
 0x789   :  { %5565 = vmatpush3.msra.mxu0 %v7046_v63  ;;  %5616 = vmatpush3.msra.mxu1 %v2777_v38  ;;  %v3095_v38 = vld [vmem:[#allocation7 + $0x2b8] sm:$0xff] }
 0x78a   :  { %5566 = vmatprep.subr.mxu0 %v6053_v0  ;;  %5617 = vmatprep.subr.mxu1 %v6053_v0 }
 0x78b   :  { %5567 = vmatpush3.msra.mxu0 %v7051_v17  ;;  %5618 = vmatpush3.msra.mxu1 %v2776_v40  ;;  %v3094_v40 = vld [vmem:[#allocation7 + $0x2b0] sm:$0xff] }
 0x78c   :  { %5569 = vmatmul.mubr.msk.f32.vlgmr.msra.gmra.mxu0 %vm2198_vm5, %v4154_v41  ;;  %5619 = vmatprep.subr.mxu1 %v6053_v0  ;;  %v2933_v41 = vld [vmem:[#allocation7 + $0x240] sm:$0xff] }
 0x78d   :  { %5620 = vmatpush3.msra.mxu1 %v2775_v42  ;;  %5571 = vmatprep.subr.mxu0 %v6053_v0  ;;  %v3093_v42 = vld [vmem:[#allocation7 + $0x2a8] sm:$0xff] }
 0x78e   :  { %5621 = vmatprep.subr.mxu1 %v6053_v0  ;;  %5572 = vmatpush3.msra.mxu0 %v2614_v43  ;;  %v2932_v43 = vld [vmem:[#allocation7 + $0x238] sm:$0xff] }
 0x78f   :  { %5622 = vmatpush3.msra.mxu1 %v2774_v44  ;;  %5573 = vmatprep.subr.mxu0 %v6053_v0  ;;  %v3092_v44 = vld [vmem:[#allocation7 + $0x2a0] sm:$0xff] }
 0x790   :  { %5623 = vmatprep.subr.mxu1 %v6053_v0  ;;  %5574 = vmatpush3.msra.mxu0 %v2613_v46  ;;  %v2931_v46 = vld [vmem:[#allocation7 + $0x230] sm:$0xff] }
 0x791   :  { %5624 = vmatpush3.msra.mxu1 %v2773_v47  ;;  %5575 = vmatprep.subr.mxu0 %v6053_v0  ;;  %v3091_v47 = vld [vmem:[#allocation7 + $0x298] sm:$0xff] }
 0x792   :  { %5625 = vmatprep.subr.mxu1 %v6053_v0  ;;  %5576 = vmatpush3.msra.mxu0 %v2612_v48  ;;  %v2930_v48 = vld [vmem:[#allocation7 + $0x228] sm:$0xff] }
 0x793   :  { %5626 = vmatpush3.msra.mxu1 %v2772_v49  ;;  %5577 = vmatprep.subr.mxu0 %v6053_v0  ;;  %v3090_v49 = vld [vmem:[#allocation7 + $0x290] sm:$0xff] }
 0x794   :  { %5627 = vmatprep.subr.mxu1 %v6053_v0  ;;  %5578 = vmatpush3.msra.mxu0 %v2611_v50  ;;  %v2929_v50 = vld [vmem:[#allocation7 + $0x220] sm:$0xff] }
 0x795   :  { %5628 = vmatpush3.msra.mxu1 %v2771_v51  ;;  %5579 = vmatprep.subr.mxu0 %v6053_v0  ;;  %v3089_v51 = vld [vmem:[#allocation7 + $0x288] sm:$0xff] }
 0x796   :  { %5629 = vmatprep.subr.mxu1 %v6053_v0  ;;  %5580 = vmatpush3.msra.mxu0 %v2610_v52  ;;  %v2928_v52 = vld [vmem:[#allocation7 + $0x218] sm:$0xff] }
 0x797   :  { %5630 = vmatpush3.msra.mxu1 %v2770_v53  ;;  %5581 = vmatprep.subr.mxu0 %v6053_v0  ;;  %v3088_v53 = vld [vmem:[#allocation7 + $0x280] sm:$0xff] }
 0x798   :  { %5631 = vmatprep.subr.mxu1 %v6053_v0  ;;  %5582 = vmatpush3.msra.mxu0 %v2609_v56  ;;  %v2927_v56 = vld [vmem:[#allocation7 + $0x210] sm:$0xff] }
 0x799   :  { %5632 = vmatpush3.msra.mxu1 %v2769_v58  ;;  %5583 = vmatprep.subr.mxu0 %v6053_v0  ;;  %v2926_v58 = vld [vmem:[#allocation7 + $0x208] sm:$0xff] }
 0x79a   :  { %5633 = vmatprep.subr.mxu1 %v6053_v0  ;;  %5584 = vmatpush3.msra.mxu0 %v2608_v26  ;;  %v2925_v26 = vld [vmem:[#allocation7 + $0x200] sm:$0xff] }
 0x79b   :  { %5634 = vmatpush3.msra.mxu1 %v2768_v32  ;;  %5585 = vmatprep.subr.mxu0 %v6053_v0 }
 0x79c   :  { %5635 = vmatprep.subr.mxu1 %v6053_v0  ;;  %5586 = vmatpush3.msra.mxu0 %v2607_v59 }
 0x79d   :  { %5636 = vmatpush3.msra.mxu1 %v2767_v60  ;;  %5587 = vmatprep.subr.mxu0 %v6053_v0 }
 0x79e   :  { %5637 = vmatprep.subr.mxu1 %v6053_v0  ;;  %5588 = vmatpush3.msra.mxu0 %v2606_v61 }
 0x79f   :  { %5638 = vmatpush3.msra.mxu1 %v2766_v62  ;;  %5589 = vmatprep.subr.mxu0 %v6053_v0 }
 0x7a0   :  { %5639 = vmatprep.subr.mxu1 %v6053_v0  ;;  %5590 = vmatpush3.msra.mxu0 %v2605_v2 }
 0x7a1   :  { %5640 = vmatpush3.msra.mxu1 %v2765_v3  ;;  %5591 = vmatprep.subr.mxu0 %v6053_v0 }
 0x7a2   :  { %5641 = vmatprep.subr.mxu1 %v6053_v0  ;;  %5592 = vmatpush3.msra.mxu0 %v2604_v4 }
 0x7a3   :  { %5642 = vmatpush3.msra.mxu1 %v2764_v5  ;;  %5593 = vmatprep.subr.mxu0 %v6053_v0  ;;  %v4169_v5 = vld [vmem:[%s7518_s29 + $0xe] sm:$0x3] }
 0x7a4   :  { %5643 = vmatprep.subr.mxu1 %v6053_v0  ;;  %5647 = vmatprep.mubr.msk.f32.mxu1 %vm6054_vm0, %v6053_v0 }
 0x7a5   :  { %5603 = vmatprep.mubr.msk.f32.mxu0 %vm6054_vm0, %v6053_v0  ;;  %5594 = vmatpush3.msra.mxu0 %v2603_v6 }
 0x7a6   :  { %5644 = vmatpush3.msra.mxu1 %v2763_v7  ;;  %5595 = vmatprep.subr.mxu0 %v6053_v0  ;;  %v3429_v7 = vld [vmem:[#allocation7 + $0x3f8] sm:$0xff] }
 0x7a7   :  { %5645 = vmatprep.subr.mxu1 %v6053_v0  ;;  %5596 = vmatpush3.msra.mxu0 %v2602_v9 }
 0x7a8   :  { %5646 = vmatpush3.msra.mxu1 %v2762_v11  ;;  %5597 = vmatprep.subr.mxu0 %v6053_v0  ;;  %v3428_v11 = vld [vmem:[#allocation7 + $0x3f0] sm:$0xff] }
 0x7a9   :  { %5694 = vmatprep.subr.mxu1 %v6053_v0  ;;  %5598 = vmatpush3.msra.mxu0 %v2601_v13  ;;  %v4166_v13 = vld [vmem:[%s7518_s29 + $0xc] sm:$0x3] }
 0x7aa   :  { %5599 = vmatprep.subr.mxu0 %v6053_v0 }
 0x7ab   :  { %5600 = vmatpush3.msra.mxu0 %v2600_v14  ;;  %v3266_v14 = vld [vmem:[#allocation7 + $0x378] sm:$0xff] }
 0x7ac   :  { %5601 = vmatprep.subr.mxu0 %v6053_v0 }
 0x7ad   :  { %5602 = vmatpush3.msra.mxu0 %v2599_v1  ;;  %v3427_v1 = vld [vmem:[#allocation7 + $0x3e8] sm:$0xff] }
 0x7ae   :  { %5650 = vmatprep.subr.mxu0 %v6053_v0 }
 0x840   :  { %v2519_v15 = vpop.f32.mrf.mxu1 }
 0x842   :  { %v5561_v16 = vpop.f32.mrf.mxu1 }
 0x843   :  { %v3426_v16 = vld [vmem:[#allocation7 + $0x3e0] sm:$0xff] }
 0x846   :  { %v2757_v55 = vpop.f32.mrf.mxu1  ;;  %v2449_v18 = vpop.f32.mrf.mxu0 }
 0x847   :  { %5648 = vmatmul.mubr.f32.vlgmr.msra.gmra.mxu1 %v2757_v55  ;;  %v7154_v8 = vadd.f32 %v2519_v15, %v2449_v18  ;;  %v3265_v15 = vld [vmem:[#allocation7 + $0x370] sm:$0xff]  ;;  %v3264_v55 = vld [vmem:[#allocation7 + $0x368] sm:$0xff]  ;;  %v3425_v18 = vld [vmem:[#allocation7 + $0x3d8] sm:$0xff] }
 0x848   :  { %5695 = vmatpush3.msk.msra.mxu1 %vm310_vm3, %v7044_v35  ;;  %v5526_v20 = vpop.f32.mrf.mxu0  ;;  %5700 = vmatprep.mubr.msk.f32.mxu1 %vm6054_vm0, %v6053_v0  ;;  %v5614_v12 = vpop.f32.mrf.mxu1 }
 0x849   :  { %5696 = vmatprep.subr.mxu1 %v6053_v0  ;;  %v3424_v20 = vld [vmem:[#allocation7 + $0x3d0] sm:$0xff]  ;;  %v3262_v12 = vld [vmem:[#allocation7 + $0x358] sm:$0xff] }
 0x84a   :  { %5697 = vmatpush3.msra.mxu1 %v7046_v63 }
 0x84b   :  { %5698 = vmatprep.subr.mxu1 %v6053_v0 }
 0x84c   :  { %5699 = vmatpush3.msra.mxu1 %v7051_v17  ;;  %v2594_v24 = vpop.f32.mrf.mxu0 }
 0x84d   :  { %5701 = vmatmul.mubr.msk.f32.vlgmr.msra.gmra.mxu1 %vm2198_vm5, %v4163_v22  ;;  %5604 = vmatmul.mubr.f32.vlgmr.msra.gmra.mxu0 %v2594_v24  ;;  %v3423_v22 = vld [vmem:[#allocation7 + $0x3c8] sm:$0xff]  ;;  %v3261_v24 = vld [vmem:[#allocation7 + $0x350] sm:$0xff] }
 0x84e   :  { %5651 = vmatpush3.msk.msra.mxu0 %vm310_vm3, %v7044_v35  ;;  %5656 = vmatprep.mubr.msk.f32.mxu0 %vm6054_vm0, %v6053_v0  ;;  %v5570_v54 = vpop.f32.mrf.mxu0 }
 0x84f   :  { %5652 = vmatprep.subr.mxu0 %v6053_v0  ;;  %5703 = vmatprep.subr.mxu1 %v6053_v0  ;;  %v3260_v54 = vld [vmem:[#allocation7 + $0x348] sm:$0xff] }
 0x850   :  { %5653 = vmatpush3.msra.mxu0 %v7046_v63  ;;  %5704 = vmatpush3.msra.mxu1 %v3103_v10  ;;  %v3422_v10 = vld [vmem:[#allocation7 + $0x3c0] sm:$0xff] }
 0x851   :  { %5654 = vmatprep.subr.mxu0 %v6053_v0  ;;  %5705 = vmatprep.subr.mxu1 %v6053_v0 }
 0x852   :  { %5655 = vmatpush3.msra.mxu0 %v7051_v17  ;;  %5706 = vmatpush3.msra.mxu1 %v3102_v45  ;;  %v3421_v45 = vld [vmem:[#allocation7 + $0x3b8] sm:$0xff] }
 0x853   :  { %5657 = vmatmul.mubr.msk.f32.vlgmr.msra.gmra.mxu0 %vm2198_vm5, %v4160_v37  ;;  %5707 = vmatprep.subr.mxu1 %v6053_v0  ;;  %v3259_v37 = vld [vmem:[#allocation7 + $0x340] sm:$0xff] }
 0x854   :  { %5708 = vmatpush3.msra.mxu1 %v3101_v31  ;;  %5659 = vmatprep.subr.mxu0 %v6053_v0  ;;  %v3420_v31 = vld [vmem:[#allocation7 + $0x3b0] sm:$0xff] }
 0x855   :  { %5709 = vmatprep.subr.mxu1 %v6053_v0  ;;  %5660 = vmatpush3.msra.mxu0 %v2940_v29  ;;  %v3258_v29 = vld [vmem:[#allocation7 + $0x338] sm:$0xff] }
 0x856   :  { %5710 = vmatpush3.msra.mxu1 %v3100_v27  ;;  %5661 = vmatprep.subr.mxu0 %v6053_v0  ;;  %v3419_v27 = vld [vmem:[#allocation7 + $0x3a8] sm:$0xff] }
 0x857   :  { %5711 = vmatprep.subr.mxu1 %v6053_v0  ;;  %5662 = vmatpush3.msra.mxu0 %v2939_v25  ;;  %v3257_v25 = vld [vmem:[#allocation7 + $0x330] sm:$0xff] }
 0x858   :  { %5712 = vmatpush3.msra.mxu1 %v3099_v23  ;;  %5663 = vmatprep.subr.mxu0 %v6053_v0  ;;  %v3418_v23 = vld [vmem:[#allocation7 + $0x3a0] sm:$0xff] }
 0x859   :  { %5713 = vmatprep.subr.mxu1 %v6053_v0  ;;  %5664 = vmatpush3.msra.mxu0 %v2938_v21  ;;  %v3256_v21 = vld [vmem:[#allocation7 + $0x328] sm:$0xff] }
 0x85a   :  { %5714 = vmatpush3.msra.mxu1 %v3098_v39  ;;  %5665 = vmatprep.subr.mxu0 %v6053_v0  ;;  %v3255_v39 = vld [vmem:[#allocation7 + $0x320] sm:$0xff] }
 0x85b   :  { %5715 = vmatprep.subr.mxu1 %v6053_v0  ;;  %5666 = vmatpush3.msra.mxu0 %v2937_v28  ;;  %v3254_v28 = vld [vmem:[#allocation7 + $0x318] sm:$0xff] }
 0x85c   :  { %5716 = vmatpush3.msra.mxu1 %v3097_v30  ;;  %5667 = vmatprep.subr.mxu0 %v6053_v0  ;;  %v3253_v30 = vld [vmem:[#allocation7 + $0x310] sm:$0xff] }
 0x85d   :  { %5717 = vmatprep.subr.mxu1 %v6053_v0  ;;  %5668 = vmatpush3.msra.mxu0 %v2936_v33  ;;  %v3417_v33 = vld [vmem:[#allocation7 + $0x398] sm:$0xff] }
 0x85e   :  { %5718 = vmatpush3.msra.mxu1 %v3096_v34  ;;  %5669 = vmatprep.subr.mxu0 %v6053_v0  ;;  %v3252_v34 = vld [vmem:[#allocation7 + $0x308] sm:$0xff] }
 0x85f   :  { %5719 = vmatprep.subr.mxu1 %v6053_v0  ;;  %5670 = vmatpush3.msra.mxu0 %v2935_v36  ;;  %v3416_v36 = vld [vmem:[#allocation7 + $0x390] sm:$0xff] }
 0x860   :  { %5720 = vmatpush3.msra.mxu1 %v3095_v38  ;;  %5671 = vmatprep.subr.mxu0 %v6053_v0  ;;  %v3251_v38 = vld [vmem:[#allocation7 + $0x300] sm:$0xff] }
 0x861   :  { %5721 = vmatprep.subr.mxu1 %v6053_v0  ;;  %5672 = vmatpush3.msra.mxu0 %v2934_v19  ;;  %v3415_v19 = vld [vmem:[#allocation7 + $0x388] sm:$0xff] }
 0x862   :  { %5722 = vmatpush3.msra.mxu1 %v3094_v40  ;;  %5673 = vmatprep.subr.mxu0 %v6053_v0  ;;  %v3414_v40 = vld [vmem:[#allocation7 + $0x380] sm:$0xff] }
 0x863   :  { %5723 = vmatprep.subr.mxu1 %v6053_v0  ;;  %5674 = vmatpush3.msra.mxu0 %v2933_v41 }
 0x864   :  { %5724 = vmatpush3.msra.mxu1 %v3093_v42  ;;  %5675 = vmatprep.subr.mxu0 %v6053_v0 }
 0x865   :  { %5725 = vmatprep.subr.mxu1 %v6053_v0  ;;  %5676 = vmatpush3.msra.mxu0 %v2932_v43 }
 0x866   :  { %5726 = vmatpush3.msra.mxu1 %v3092_v44  ;;  %5677 = vmatprep.subr.mxu0 %v6053_v0 }
 0x867   :  { %5727 = vmatprep.subr.mxu1 %v6053_v0  ;;  %5678 = vmatpush3.msra.mxu0 %v2931_v46 }
 0x868   :  { %5728 = vmatpush3.msra.mxu1 %v3091_v47  ;;  %5679 = vmatprep.subr.mxu0 %v6053_v0 }
 0x869   :  { %5729 = vmatprep.subr.mxu1 %v6053_v0  ;;  %5680 = vmatpush3.msra.mxu0 %v2930_v48 }
 0x86a   :  { %5730 = vmatpush3.msra.mxu1 %v3090_v49  ;;  %5681 = vmatprep.subr.mxu0 %v6053_v0 }
 0x86b   :  { %5731 = vmatprep.subr.mxu1 %v6053_v0  ;;  %5735 = vmatprep.mubr.msk.f32.mxu1 %vm6054_vm0, %v6053_v0 }
 0x86c   :  { %5691 = vmatprep.mubr.msk.f32.mxu0 %vm6054_vm0, %v6053_v0  ;;  %5682 = vmatpush3.msra.mxu0 %v2929_v50 }
 0x86d   :  { %5732 = vmatpush3.msra.mxu1 %v3089_v51  ;;  %5683 = vmatprep.subr.mxu0 %v6053_v0 }
 0x86e   :  { %5733 = vmatprep.subr.mxu1 %v6053_v0  ;;  %5684 = vmatpush3.msra.mxu0 %v2928_v52  ;;  %v4172_v52 = vld [vmem:[%s7518_s29 + $0x10] sm:$0x3]  ;;  %s4065_s29 = sshll.u32 %s6055_s9, 4  ;;  %s4066_s29 = int_to_ptr.vmem [resolvable:$true] %s4065_s29 }
 0x86f   :  { %5734 = vmatpush3.msra.mxu1 %v3088_v53  ;;  %5685 = vmatprep.subr.mxu0 %v6053_v0  ;;  %v3592_v53 = vld [vmem:[#allocation7 + $0x478] sm:$0xff]  ;;  %p6027_p2 = scmp.lt.s32.totalorder %s4066_s29, %s4066_s29 }
 0x870   :  { %5782 = vmatprep.subr.mxu1 %v6053_v0  ;;  %5686 = vmatpush3.msra.mxu0 %v2927_v56  ;;  %v3589_v56 = vld [vmem:[#allocation7 + $0x460] sm:$0xff] }
 0x871   :  { %5687 = vmatprep.subr.mxu0 %v6053_v0 }
 0x872   :  { %5688 = vmatpush3.msra.mxu0 %v2926_v58  ;;  %v3587_v58 = vld [vmem:[#allocation7 + $0x450] sm:$0xff] }
 0x873   :  { %5689 = vmatprep.subr.mxu0 %v6053_v0 }
 0x874   :  { %5690 = vmatpush3.msra.mxu0 %v2925_v26  ;;  %v3586_v26 = vld [vmem:[#allocation7 + $0x448] sm:$0xff] }
 0x875   :  { %5738 = vmatprep.subr.mxu0 %v6053_v0 }
 0x907   :  { %v2844_v32 = vpop.f32.mrf.mxu1 }
 0x909   :  { %v5649_v59 = vpop.f32.mrf.mxu1 }
 0x90a   :  { %v3584_v59 = vld [vmem:[#allocation7 + $0x438] sm:$0xff] }
 0x90d   :  { %v3083_v60 = vpop.f32.mrf.mxu1  ;;  %v2681_v61 = vpop.f32.mrf.mxu0 }
 0x90e   :  { %v2685_v62 = vadd.f32 %v2681_v61, %v7154_v8  ;;  %5736 = vmatmul.mubr.f32.vlgmr.msra.gmra.mxu1 %v3083_v60  ;;  %v3263_v8 = vld [vmem:[#allocation7 + $0x360] sm:$0xff]  ;;  %v3583_v60 = vld [vmem:[#allocation7 + $0x430] sm:$0xff]  ;;  %v3582_v61 = vld [vmem:[#allocation7 + $0x428] sm:$0xff] }
 0x90f   :  { %5783 = vmatpush3.msk.msra.mxu1 %vm310_vm3, %v7044_v35  ;;  %v5605_v2 = vpop.f32.mrf.mxu0  ;;  %5788 = vmatprep.mubr.msk.f32.mxu1 %vm6054_vm0, %v6053_v0  ;;  %v5702_v3 = vpop.f32.mrf.mxu1 }
 0x910   :  { %5784 = vmatprep.subr.mxu1 %v6053_v0  ;;  %v7224_v4 = vadd.f32 %v2844_v32, %v2685_v62  ;;  %v3585_v32 = vld [vmem:[#allocation7 + $0x440] sm:$0xff]  ;;  %v3580_v2 = vld [vmem:[#allocation7 + $0x418] sm:$0xff]  ;;  %v3579_v3 = vld [vmem:[#allocation7 + $0x410] sm:$0xff] }
 0x911   :  { %5785 = vmatpush3.msra.mxu1 %v7046_v63  ;;  %v3581_v62 = vld [vmem:[#allocation7 + $0x420] sm:$0xff] }
 0x912   :  { %5786 = vmatprep.subr.mxu1 %v6053_v0 }
 0x913   :  { %5787 = vmatpush3.msra.mxu1 %v7051_v17  ;;  %v2920_v6 = vpop.f32.mrf.mxu0 }
 0x914   :  { %5692 = vmatmul.mubr.f32.vlgmr.msra.gmra.mxu0 %v2920_v6  ;;  %5789 = vmatmul.mubr.msk.f32.vlgmr.msra.gmra.mxu1 %vm2198_vm5, %v4169_v5  ;;  %v3577_v5 = vld [vmem:[#allocation7 + $0x400] sm:$0xff] }
 0x915   :  { %5739 = vmatpush3.msk.msra.mxu0 %vm310_vm3, %v7044_v35  ;;  %5744 = vmatprep.mubr.msk.f32.mxu0 %vm6054_vm0, %v6053_v0  ;;  %v5658_v9 = vpop.f32.mrf.mxu0 }
 0x916   :  { %5740 = vmatprep.subr.mxu0 %v6053_v0  ;;  %5791 = vmatprep.subr.mxu1 %v6053_v0 }
 0x917   :  { %5741 = vmatpush3.msra.mxu0 %v7046_v63  ;;  %5792 = vmatpush3.msra.mxu1 %v3429_v7 }
 0x918   :  { %5742 = vmatprep.subr.mxu0 %v6053_v0  ;;  %5793 = vmatprep.subr.mxu1 %v6053_v0 }
 0x919   :  { %5743 = vmatpush3.msra.mxu0 %v7051_v17  ;;  %5794 = vmatpush3.msra.mxu1 %v3428_v11 }
 0x91a   :  { %5745 = vmatmul.mubr.msk.f32.vlgmr.msra.gmra.mxu0 %vm2198_vm5, %v4166_v13  ;;  %5747 = vmatprep.subr.mxu0 %v6053_v0 }
 0x91b   :  { %5748 = vmatpush3.msra.mxu0 %v3266_v14  ;;  %5795 = vmatprep.subr.mxu1 %v6053_v0 }
 0x91c   :  { %5749 = vmatprep.subr.mxu0 %v6053_v0  ;;  %5796 = vmatpush3.msra.mxu1 %v3427_v1 }
 0x91d   :  { %5750 = vmatpush3.msra.mxu0 %v3265_v15  ;;  %5797 = vmatprep.subr.mxu1 %v6053_v0 }
 0x91e   :  { %5751 = vmatprep.subr.mxu0 %v6053_v0  ;;  %5798 = vmatpush3.msra.mxu1 %v3426_v16  ;;  %v3720_v16 = vld [vmem:[%s7497_s13 + $0x78] sm:$0xff] }
 0x91f   :  { %5752 = vmatpush3.msra.mxu0 %v3264_v55  ;;  %5799 = vmatprep.subr.mxu1 %v6053_v0  ;;  %v3719_v55 = vld [vmem:[%s7497_s13 + $0x70] sm:$0xff] }
 0x920   :  { %5753 = vmatprep.subr.mxu0 %v6053_v0  ;;  %5800 = vmatpush3.msra.mxu1 %v3425_v18  ;;  %v3718_v18 = vld [vmem:[%s7497_s13 + $0x68] sm:$0xff] }
 0x921   :  { %5754 = vmatpush3.msra.mxu0 %v3263_v8  ;;  %5801 = vmatprep.subr.mxu1 %v6053_v0  ;;  %v3717_v8 = vld [vmem:[%s7497_s13 + $0x60] sm:$0xff] }
 0x922   :  { %5755 = vmatprep.subr.mxu0 %v6053_v0  ;;  %5802 = vmatpush3.msra.mxu1 %v3424_v20  ;;  %v3716_v20 = vld [vmem:[%s7497_s13 + $0x58] sm:$0xff] }
 0x923   :  { %5756 = vmatpush3.msra.mxu0 %v3262_v12  ;;  %5803 = vmatprep.subr.mxu1 %v6053_v0  ;;  %v3715_v12 = vld [vmem:[%s7497_s13 + $0x50] sm:$0xff] }
 0x924   :  { %5757 = vmatprep.subr.mxu0 %v6053_v0  ;;  %5804 = vmatpush3.msra.mxu1 %v3423_v22  ;;  %v3714_v22 = vld [vmem:[%s7497_s13 + $0x48] sm:$0xff] }
 0x925   :  { %5758 = vmatpush3.msra.mxu0 %v3261_v24  ;;  %5805 = vmatprep.subr.mxu1 %v6053_v0  ;;  %v3713_v24 = vld [vmem:[%s7497_s13 + $0x40] sm:$0xff] }
 0x926   :  { %5759 = vmatprep.subr.mxu0 %v6053_v0  ;;  %5806 = vmatpush3.msra.mxu1 %v3422_v10  ;;  %v3712_v10 = vld [vmem:[%s7497_s13 + $0x38] sm:$0xff] }
 0x927   :  { %5760 = vmatpush3.msra.mxu0 %v3260_v54  ;;  %5807 = vmatprep.subr.mxu1 %v6053_v0  ;;  %v3711_v54 = vld [vmem:[%s7497_s13 + $0x30] sm:$0xff] }
 0x928   :  { %5761 = vmatprep.subr.mxu0 %v6053_v0  ;;  %5808 = vmatpush3.msra.mxu1 %v3421_v45  ;;  %v3710_v45 = vld [vmem:[%s7497_s13 + $0x28] sm:$0xff] }
 0x929   :  { %5762 = vmatpush3.msra.mxu0 %v3259_v37  ;;  %5809 = vmatprep.subr.mxu1 %v6053_v0  ;;  %v3709_v37 = vld [vmem:[%s7497_s13 + $0x20] sm:$0xff] }
 0x92a   :  { %5763 = vmatprep.subr.mxu0 %v6053_v0  ;;  %5810 = vmatpush3.msra.mxu1 %v3420_v31  ;;  %v3708_v31 = vld [vmem:[%s7497_s13 + $0x18] sm:$0xff] }
 0x92b   :  { %5764 = vmatpush3.msra.mxu0 %v3258_v29  ;;  %5811 = vmatprep.subr.mxu1 %v6053_v0  ;;  %v3707_v29 = vld [vmem:[%s7497_s13 + $0x10] sm:$0xff] }
 0x92c   :  { %5765 = vmatprep.subr.mxu0 %v6053_v0  ;;  %5812 = vmatpush3.msra.mxu1 %v3419_v27  ;;  %v3706_v27 = vld [vmem:[%s7497_s13 + $0x8] sm:$0xff] }
 0x92d   :  { %5766 = vmatpush3.msra.mxu0 %v3257_v25  ;;  %5813 = vmatprep.subr.mxu1 %v6053_v0  ;;  %v3722_v25 = vld [vmem:[%s7498_s14] sm:$0xf] }
 0x92e   :  { %5767 = vmatprep.subr.mxu0 %v6053_v0  ;;  %5814 = vmatpush3.msra.mxu1 %v3418_v23  ;;  %v3705_v23 = vld [vmem:[%s7497_s13] sm:$0xff] }
 0x92f   :  { %5768 = vmatpush3.msra.mxu0 %v3256_v21  ;;  %5815 = vmatprep.subr.mxu1 %v6053_v0  ;;  %v3721_v21 = vld [vmem:[#allocation2] sm:$0x3] }
 0x930   :  { %5769 = vmatprep.subr.mxu0 %v6053_v0  ;;  %5779 = vmatprep.mubr.msk.f32.mxu0 %vm6054_vm0, %v6053_v0 }
 0x931   :  { %5770 = vmatpush3.msra.mxu0 %v3255_v39  ;;  %5823 = vmatprep.mubr.msk.f32.mxu1 %vm6054_vm0, %v6053_v0  ;;  %v3886_v39 = vld [vmem:[%s7500_s16 + $0x38] sm:$0xff] }
 0x932   :  { %5771 = vmatprep.subr.mxu0 %v6053_v0  ;;  %5816 = vmatpush3.msra.mxu1 %v3417_v33  ;;  %v3883_v33 = vld [vmem:[%s7500_s16 + $0x20] sm:$0xff] }
 0x933   :  { %5772 = vmatpush3.msra.mxu0 %v3254_v28  ;;  %5817 = vmatprep.subr.mxu1 %v6053_v0  ;;  %v3885_v28 = vld [vmem:[%s7500_s16 + $0x30] sm:$0xff] }
 0x934   :  { %5773 = vmatprep.subr.mxu0 %v6053_v0  ;;  %5818 = vmatpush3.msra.mxu1 %v3416_v36 }
 0x935   :  { %5774 = vmatpush3.msra.mxu0 %v3253_v30  ;;  %5819 = vmatprep.subr.mxu1 %v6053_v0  ;;  %v3884_v30 = vld [vmem:[%s7500_s16 + $0x28] sm:$0xff] }
 0x936   :  { %5775 = vmatprep.subr.mxu0 %v6053_v0  ;;  %5820 = vmatpush3.msra.mxu1 %v3415_v19 }
 0x937   :  { %5776 = vmatpush3.msra.mxu0 %v3252_v34  ;;  %5821 = vmatprep.subr.mxu1 %v6053_v0 }
 0x938   :  { %5777 = vmatprep.subr.mxu0 %v6053_v0  ;;  %5822 = vmatpush3.msra.mxu1 %v3414_v40 }
 0x939   :  { %5778 = vmatpush3.msra.mxu0 %v3251_v38  ;;  %5875 = vmatprep.subr.mxu1 %v6053_v0 }
 0x93a   :  { %5826 = vmatprep.subr.mxu0 %v6053_v0 }
 0x9ce   :  { %v3170_v41 = vpop.f32.mrf.mxu1 }
 0x9d0   :  { %v5737_v42 = vpop.f32.mrf.mxu1 }
 0x9d4   :  { %v3007_v43 = vpop.f32.mrf.mxu0  ;;  %v3409_v44 = vpop.f32.mrf.mxu1 }
 0x9d5   :  { %v3011_v46 = vadd.f32 %v3007_v43, %v7224_v4  ;;  %5824 = vmatmul.mubr.f32.vlgmr.msra.gmra.mxu1 %v3409_v44  ;;  %v3578_v4 = vld [vmem:[#allocation7 + $0x408] sm:$0xff] }
 0x9d6   :  { %v5693_v47 = vpop.f32.mrf.mxu0  ;;  %v5790_v48 = vpop.f32.mrf.mxu1  ;;  %5907 = vmatprep.mubr.msk.f32.mxu1 %vm6054_vm0, %v6053_v0  ;;  %5876 = vmatpush3.msra.mxu1 %v3720_v16  ;;  %v3975_v16 = vld [vmem:[%s7502_s18 + $0x30] sm:$0xff] }
 0x9d7   :  { %v7286_v49 = vadd.f32 %v3170_v41, %v3011_v46  ;;  %5877 = vmatprep.subr.mxu1 %v6053_v0 }
 0x9d8   :  { %5878 = vmatpush3.msra.mxu1 %v3719_v55  ;;  %v3974_v55 = vld [vmem:[%s7502_s18 + $0x28] sm:$0xff] }
 0x9d9   :  { %5879 = vmatprep.subr.mxu1 %v6053_v0 }
 0x9da   :  { %v3246_v50 = vpop.f32.mrf.mxu0  ;;  %5880 = vmatpush3.msra.mxu1 %v3718_v18  ;;  %v3973_v18 = vld [vmem:[%s7502_s18 + $0x20] sm:$0xff] }
 0x9db   :  { %5780 = vmatmul.mubr.f32.vlgmr.msra.gmra.mxu0 %v3246_v50  ;;  %5881 = vmatprep.subr.mxu1 %v6053_v0 }
 0x9dc   :  { %5827 = vmatpush3.msk.msra.mxu0 %vm310_vm3, %v7044_v35  ;;  %5832 = vmatprep.mubr.msk.f32.mxu0 %vm6054_vm0, %v6053_v0  ;;  %v5746_v51 = vpop.f32.mrf.mxu0  ;;  %v3591_v35 = vld [vmem:[#allocation7 + $0x470] sm:$0xff] }
 0x9dd   :  { %5828 = vmatprep.subr.mxu0 %v6053_v0  ;;  %5882 = vmatpush3.msra.mxu1 %v3717_v8  ;;  %v3972_v8 = vld [vmem:[%s7502_s18 + $0x18] sm:$0xff] }
 0x9de   :  { %5829 = vmatpush3.msra.mxu0 %v7046_v63  ;;  %v3590_v63 = vld [vmem:[#allocation7 + $0x468] sm:$0xff]  ;;  %5883 = vmatprep.subr.mxu1 %v6053_v0 }
 0x9df   :  { %5830 = vmatprep.subr.mxu0 %v6053_v0  ;;  %5884 = vmatpush3.msra.mxu1 %v3716_v20 }
 0x9e0   :  { %5831 = vmatpush3.msra.mxu0 %v7051_v17  ;;  %v3588_v17 = vld [vmem:[#allocation7 + $0x458] sm:$0xff]  ;;  %5885 = vmatprep.subr.mxu1 %v6053_v0 }
 0x9e1   :  { %5833 = vmatmul.mubr.msk.f32.vlgmr.msra.gmra.mxu0 %vm2198_vm5, %v4172_v52  ;;  %5835 = vmatprep.subr.mxu0 %v6053_v0 }
 0x9e2   :  { %5836 = vmatpush3.msra.mxu0 %v3592_v53  ;;  %5867 = vmatprep.mubr.msk.f32.mxu0 %vm6054_vm0, %v6053_v0 }
 0x9e3   :  { %5837 = vmatprep.subr.mxu0 %v6053_v0  ;;  %5886 = vmatpush3.msra.mxu1 %v3715_v12  ;;  %v4177_v12 = vld [vmem:[%s7499_s15] ss:$0 sm:$0xff] }
 0x9e4   :  { %5838 = vmatpush3.msra.mxu0 %v3591_v35  ;;  %5887 = vmatprep.subr.mxu1 %v6053_v0 }
 0x9e5   :  { %5839 = vmatprep.subr.mxu0 %v6053_v0  ;;  %5888 = vmatpush3.msra.mxu1 %v3714_v22 }
 0x9e6   :  { %5840 = vmatpush3.msra.mxu0 %v3590_v63  ;;  %5889 = vmatprep.subr.mxu1 %v6053_v0 }
 0x9e7   :  { %5841 = vmatprep.subr.mxu0 %v6053_v0  ;;  %5890 = vmatpush3.msra.mxu1 %v3713_v24 }
 0x9e8   :  { %5842 = vmatpush3.msra.mxu0 %v3589_v56  ;;  %5891 = vmatprep.subr.mxu1 %v6053_v0 }
 0x9e9   :  { %5843 = vmatprep.subr.mxu0 %v6053_v0  ;;  %5892 = vmatpush3.msra.mxu1 %v3712_v10 }
 0x9ea   :  { %5844 = vmatpush3.msra.mxu0 %v3588_v17  ;;  %5893 = vmatprep.subr.mxu1 %v6053_v0 }
 0x9eb   :  { %5845 = vmatprep.subr.mxu0 %v6053_v0  ;;  %5894 = vmatpush3.msra.mxu1 %v3711_v54 }
 0x9ec   :  { %5846 = vmatpush3.msra.mxu0 %v3587_v58  ;;  %5895 = vmatprep.subr.mxu1 %v6053_v0 }
 0x9ed   :  { %5847 = vmatprep.subr.mxu0 %v6053_v0  ;;  %5896 = vmatpush3.msra.mxu1 %v3710_v45  ;;  %v3971_v45 = vld [vmem:[%s7502_s18 + $0x10] sm:$0xff] }
 0x9ee   :  { %5848 = vmatpush3.msra.mxu0 %v3586_v26  ;;  %5897 = vmatprep.subr.mxu1 %v6053_v0 }
 0x9ef   :  { %5849 = vmatprep.subr.mxu0 %v6053_v0  ;;  %5898 = vmatpush3.msra.mxu1 %v3709_v37  ;;  %v3970_v37 = vld [vmem:[%s7502_s18 + $0x8] sm:$0xff] }
 0x9f0   :  { %5850 = vmatpush3.msra.mxu0 %v3585_v32  ;;  %5899 = vmatprep.subr.mxu1 %v6053_v0  ;;  %v3664_v32 = vld [vmem:[%s7495_s11] sm:$0x1] }
 0x9f1   :  { %5851 = vmatprep.subr.mxu0 %v6053_v0  ;;  %5900 = vmatpush3.msra.mxu1 %v3708_v31  ;;  %v3969_v31 = vld [vmem:[%s7502_s18] sm:$0xff] }
 0x9f2   :  { %5852 = vmatpush3.msra.mxu0 %v3584_v59  ;;  %5901 = vmatprep.subr.mxu1 %v6053_v0 }
 0x9f3   :  { %5853 = vmatprep.subr.mxu0 %v6053_v0  ;;  %5902 = vmatpush3.msra.mxu1 %v3707_v29  ;;  %v4178_v29 = vld [vmem:[%s7501_s17] ss:$0 sm:$0xff] }
 0x9f4   :  { %5854 = vmatpush3.msra.mxu0 %v3583_v60  ;;  %5903 = vmatprep.subr.mxu1 %v6053_v0 }
 0x9f5   :  { %5855 = vmatprep.subr.mxu0 %v6053_v0  ;;  %5904 = vmatpush3.msra.mxu1 %v3706_v27 }
 0x9f6   :  { %5856 = vmatpush3.msra.mxu0 %v3582_v61  ;;  %5905 = vmatprep.subr.mxu1 %v6053_v0  ;;  %v3665_v61 = vld [vmem:[%s7496_s12] sm:$0x1] }
 0x9f7   :  { %5857 = vmatprep.subr.mxu0 %v6053_v0  ;;  %5906 = vmatpush3.msra.mxu1 %v3705_v23 }
 0x9f8   :  { %5858 = vmatpush3.msra.mxu0 %v3581_v62  ;;  %5929 = vmatprep.subr.mxu1 %v6053_v0 }
 0x9f9   :  { %5859 = vmatprep.subr.mxu0 %v6053_v0 }
 0x9fa   :  { %5860 = vmatpush3.msra.mxu0 %v3580_v2 }
 0x9fb   :  { %5861 = vmatprep.subr.mxu0 %v6053_v0 }
 0x9fc   :  { %5862 = vmatpush3.msra.mxu0 %v3579_v3 }
 0x9fd   :  { %5863 = vmatprep.subr.mxu0 %v6053_v0 }
 0x9fe   :  { %5864 = vmatpush3.msra.mxu0 %v3578_v4 }
 0x9ff   :  { %5865 = vmatprep.subr.mxu0 %v6053_v0 }
 0xa00   :  { %5866 = vmatpush3.msra.mxu0 %v3577_v5 }
 0xa01   :  { %5870 = vmatprep.subr.mxu0 %v6053_v0 }
 0xa95   :  { %v3496_v6 = vpop.f32.mrf.mxu1 }
 0xa97   :  { %v5825_v7 = vpop.f32.mrf.mxu1 }
 0xa9b   :  { %v3333_v9 = vpop.f32.mrf.mxu0 }
 0xa9c   :  { %v3337_v11 = vadd.f32 %v3333_v9, %v7286_v49 }
 0xa9d   :  { %v5781_v13 = vpop.f32.mrf.mxu0 }
 0xa9e   :  { %v7320_v14 = vadd.f32 %v3496_v6, %v3337_v11  ;;  %v3882_v11 = vld [vmem:[%s7500_s16 + $0x18] sm:$0xff] }
 0xaa1   :  { %v3572_v1 = vpop.f32.mrf.mxu0 }
 0xaa2   :  { %5868 = vmatmul.mubr.f32.vlgmr.msra.gmra.mxu0 %v3572_v1  ;;  %v3879_v1 = vld [vmem:[%s7500_s16] sm:$0xff] }
 0xaa3   :  { %v5834_v15 = vpop.f32.mrf.mxu0  ;;  %5872 = vmatprep.mubr.msk.f32.mxu0 %vm6054_vm0, %v6053_v0  ;;  %5871 = vmatpush3.msk.msra.mxu0 %vm163_vm1, %v3722_v25 }
 0xaa4   :  { %5910 = vmatprep.subr.mxu0 %v6053_v0  ;;  %v3976_v15 = vld [vmem:[%s7502_s18 + $0x38] sm:$0xff]  ;;  %s6022_s18 = scalar_lea.vmem %s4066_s29, 32 }
 0xaa5   :  { %p6023_p1 = scmp.ne.s32.totalorder %s4066_s29, %s6022_s18  ;;  %p6028_p3 = scmp.lt.s32.totalorder %s6022_s18, %s6022_s18 }
 0xaa6   :  { %5873 = vmatmul.mubr.msk.f32.vlgmr.msra.gmra.mxu0 %vm3723_vm6, %v3721_v21 }
 0xaa7   :  { %5926 = vmatprep.mubr.msk.f32.mxu0 %vm6054_vm0, %v6053_v0  ;;  %5911 = vmatpush3.msra.mxu0 %v3886_v39  ;;  %v4180_v39 = vld [vmem:[%s7503_s19] ss:$0 sm:$0xff]  ;;  %p6029_p4 = por %p6028_p3, %p6027_p2 }
 0xaa8   :  { %5912 = vmatprep.subr.mxu0 %v6053_v0 }
 0xaa9   :  { %5913 = vmatpush3.msra.mxu0 %v3885_v28  ;;  %p6030_p5 = pnand %p6029_p4, %p6023_p1 }
 0xaaa   :  { %5914 = vmatprep.subr.mxu0 %v6053_v0 }
 0xaab   :  { %5915 = vmatpush3.msra.mxu0 %v3884_v30 }
 0xaac   :  { %5916 = vmatprep.subr.mxu0 %v6053_v0 }
 0xaad   :  { %5917 = vmatpush3.msra.mxu0 %v3883_v33 }
 0xaae   :  { %5918 = vmatprep.subr.mxu0 %v6053_v0 }
 0xaaf   :  { %5919 = vmatpush3.msra.mxu0 %v3882_v11 }
 0xab0   :  { %5920 = vmatprep.subr.mxu0 %v6053_v0 }
 0xb62   :  { %v3659_v34 = vpop.f32.mrf.mxu0 }
 0xb63   :  { %v3663_v36 = vadd.f32 %v3659_v34, %v7320_v14  ;;  %v3881_v14 = vld [vmem:[%s7500_s16 + $0x10] sm:$0xff] }
 0xb64   :  { %v5869_v38 = vpop.f32.mrf.mxu0  ;;  %5921 = vmatpush3.msra.mxu0 %v3881_v14 }
 0xb65   :  { %v3666_v19 = vsel %vm310_vm3, %v3663_v36, 0.0  ;;  %v3674_v40 = vmul.f32 %v3663_v36, %v3663_v36  ;;  %5922 = vmatprep.subr.mxu0 %v6053_v0 }
 0xb66   :  { %v3667_v41 = vrot.slane %v3666_v19, 4  ;;  %v3796_v9 = vpop.f32.mrf.mxu0 }
 0xb67   :  { %v3675_v42 = vsel %vm310_vm3, %v3674_v40, 0.0 }
 0xb68   :  { %v3668_v43 = vadd.f32 %v3667_v41, %v3666_v19  ;;  %v3676_v44 = vrot.slane %v3675_v42, 4  ;;  %v5874_v13 = vpop.f32.mrf.mxu0 }
 0xb6a   :  { %v3669_v46 = vrot.slane %v3668_v43, 2  ;;  %v3677_v47 = vadd.f32 %v3676_v44, %v3675_v42 }
 0xb6c   :  { %v3670_v48 = vadd.f32 %v3669_v46, %v3668_v43  ;;  %v3678_v49 = vrot.slane %v3677_v47, 2 }
 0xb6e   :  { %v3671_v50 = vrot.slane %v3670_v48, 1  ;;  %v3679_v51 = vadd.f32 %v3678_v49, %v3677_v47 }
 0xb70   :  { %v3672_v52 = vadd.f32 %v3671_v50, %v3670_v48  ;;  %v3680_v53 = vrot.slane %v3679_v51, 1 }
 0xb72   :  { %v3673_v35 = vmul.f32 0.5, %v3672_v52  ;;  %v3681_v63 = vadd.f32 %v3680_v53, %v3679_v51 }
 0xb74   :  { %v3682_v56 = vmul.f32 0.5, %v3681_v63  ;;  %v3683_v17 = vmul.f32 %v3673_v35, %v3673_v35 }
 0xb76   :  { %v3684_v58 = vsub.f32 %v3682_v56, %v3683_v17 }
 0xb78   :  { %v3685_v26 = vadd.f32 1e-05, %v3684_v58 }
 0xb7a   :  { %5960 = vrsqrt.f32 %v3685_v26 }
 0xb87   :  { %v5961_v59 = vpop.eup %5960 }
 0xb88   :  { %v3687_v60 = vmul.f32 %v5961_v59, %v3664_v32 }
 0xb8a   :  { %v3688_v62 = vmul.f32 %v3687_v60, %v3673_v35  ;;  %v3694_v2 = vrot.slane %v3687_v60, %v6341_v57 }
 0xb8c   :  { %v3689_v3 = vsub.f32 %v3665_v61, %v3688_v62  ;;  %v3696_v4 = vmul.f32 %v3694_v2, %v3663_v36 }
 0xb8e   :  { %v3701_v5 = vrot.slane %v3689_v3, %v6341_v57  ;;  %v3880_v57 = vld [vmem:[%s7500_s16 + $0x8] sm:$0xff] }
 0xb8f   :  { %5923 = vmatpush3.msra.mxu0 %v3880_v57 }
 0xb90   :  { %v3703_v6 = vadd.f32 %v3701_v5, %v3696_v4  ;;  %5924 = vmatprep.subr.mxu0 %v6053_v0 }
 0xb91   :  { %5925 = vmatpush3.msra.mxu0 %v3879_v1 }
 0xb92   :  { %v3704_v7 = vmax.f32 %v3703_v6, 0.0 }
 0xb94   :  { %5908 = vmatmul.mubr.f32.vlgmr.msra.gmra.mxu1 %v3704_v7 }
 0xb95   :  { %5945 = vmatprep.mubr.msk.f32.mxu1 %vm6054_vm0, %v6053_v0  ;;  %5930 = vmatpush3.msra.mxu1 %v3976_v15 }
 0xb96   :  { %5931 = vmatprep.subr.mxu1 %v6053_v0 }
 0xb97   :  { %5932 = vmatpush3.msra.mxu1 %v3975_v16 }
 0xb98   :  { %5933 = vmatprep.subr.mxu1 %v6053_v0 }
 0xb99   :  { %5934 = vmatpush3.msra.mxu1 %v3974_v55 }
 0xb9a   :  { %5935 = vmatprep.subr.mxu1 %v6053_v0 }
 0xb9b   :  { %5936 = vmatpush3.msra.mxu1 %v3973_v18 }
 0xb9c   :  { %5937 = vmatprep.subr.mxu1 %v6053_v0 }
 0xb9d   :  { %5938 = vmatpush3.msra.mxu1 %v3972_v8 }
 0xb9e   :  { %5939 = vmatprep.subr.mxu1 %v6053_v0 }
 0xb9f   :  { %5940 = vmatpush3.msra.mxu1 %v3971_v45 }
 0xba0   :  { %5941 = vmatprep.subr.mxu1 %v6053_v0 }
 0xba1   :  { %5942 = vmatpush3.msra.mxu1 %v3970_v37 }
 0xba2   :  { %5943 = vmatprep.subr.mxu1 %v6053_v0 }
 0xba3   :  { %5944 = vmatpush3.msra.mxu1 %v3969_v31 }
 0xc54   :  { %v3866_v20 = vpop.f32.mrf.mxu1 }
 0xc55   :  { %v3867_v22 = vadd.f32 %v3866_v20, %v3796_v9 }
 0xc56   :  { %v5909_v24 = vpop.f32.mrf.mxu1 }
 0xc57   :  { %v3877_v10 = vadd.f32 %v4177_v12, %v3867_v22 }
 0xc59   :  { %v3878_v54 = vmax.f32 %v3877_v10, 0.0 }
 0xc5b   :  { %5927 = vmatmul.mubr.msk.f32.vlgmr.msra.gmra.mxu0 %vm3894_vm7, %v3878_v54 }
 0xd1b   :  { %v3964_v27 = vpop.f32.mrf.mxu0 }
 0xd1c   :  { %v3965_v25 = vadd.f32 %v4178_v29, %v3964_v27 }
 0xd1d   :  { %v5928_v23 = vpop.f32.mrf.mxu0 }
 0xd1e   :  { %v3968_v21 = vmax.f32 %v3965_v25, 0.0 }
 0xd20   :  { %5946 = vmatmul.mubr.msk.f32.vlgmr.msra.gmra.mxu1 %vm3894_vm7, %v3968_v21 }
 0xde0   :  { %v4053_v0 = vpop.f32.mrf.mxu1 }
 0xde1   :  { %v4054_v28 = vadd.f32 %v4180_v39, %v4053_v0 }
 0xde2   :  { %v5947_v30 = vpop.f32.mrf.mxu1 }
 0xde3   :  { %4058 = vst.msk [vmem:[#allocation8] sm:$0x3] %vm4057_vm8, %v4054_v28 }
 0xde4   :  { %6033 = shalt.err (!%p6030_p5)
}
 0xde5   :  { %4068 = dma.vmem_to_hbm [thread:$0]  %s4066_s29, 32, %s7504_s20, [#allocation4]  }
 0xde6   :  { %6046 = dma.done.wait [#allocation4], 32  }
 0xde7   :  { %6047 = vsyncadd [#allocation4], 4294967264 }
 0xde8   :  { %4072 = vsyncpa [#allocation3], 1 }
 0xde9   :  { %4073 = vsyncpa [#allocation6], 1 }
 0xdea   :  { %4074 = vsyncpa [#allocation4], 1 }

</bundles_post_ra>
